<compile_context>
chip_gen: v7x
topology: tpu7x:2x2x1
jax: 0.10.0
libtpu: 0.0.40
codegen_flags: <defaults>
</compile_context>

<pallas_src>
import jax
import jax.numpy as jnp
import numpy as np
from jax.experimental import pallas as pl
from jax.experimental.pallas import tpu as pltpu

TILE_M_MAX = 512  # pixel-rows per grid step (sweep 256/512/1024 on real shapes)


def _round_up(n, m):
    return -(-n // m) * m


# ----------------------------------------------------------------------------- fused kernel
def _rpn_fused_kernel(patches_ref, ws_ref, bs_ref, wh_ref, bh_ref, out_ref, probs_ref):
    # patches: (TM, 9*C_in) bf16      ws: (9*C_in, 512) bf16   bs: (1, 512) f32
    # wh: (512, N_pad) bf16 = [W_cls (2A, channel order) | W_bbox (4A) | zeros]
    # bh: (1, N_pad) f32
    shared = jnp.dot(patches_ref[...], ws_ref[...], preferred_element_type=jnp.float32)
    shared = jnp.maximum(shared + bs_ref[...], 0.0)                 # relu; kept on-chip

    y = jnp.dot(shared.astype(jnp.bfloat16), wh_ref[...],
                preferred_element_type=jnp.float32) + bh_ref[...]
    out_ref[...] = y                                                # lane-dense 128-wide store

    # pairwise (2-class) softmax over consecutive column pairs (0,1),(2,3),...
    # partner of an even column i is i+1, of an odd column i is i-1 (cheap XLU rotates).
    n = y.shape[-1]
    cols = jax.lax.broadcasted_iota(jnp.int32, y.shape, 1)
    partner = jnp.where(cols % 2 == 0,
                        pltpu.roll(y, shift=n - 1, axis=1),         # brings col i+1 to i
                        pltpu.roll(y, shift=1, axis=1))             # brings col i-1 to i
    m = jnp.maximum(y, partner)
    e = jnp.exp(y - m)
    ep = jnp.exp(partner - m)
    probs_ref[...] = e * pl.reciprocal(e + ep, approx=True)


# ----------------------------------------------------------------------------- pallas wrapper
def rpn_fused(patches, w_shared, b_shared, w_heads, b_heads, *, tile_m):
    rows_p, k = patches.shape
    c_mid = w_shared.shape[1]
    n_pad = w_heads.shape[1]
    grid = (rows_p // tile_m,)

    # rough VMEM budget (double-buffered bf16 inputs + f32 outputs + intermediate)
    vmem_est = (2 * (tile_m * k + k * c_mid + c_mid * n_pad) * 2      # bf16 inputs, 2x buffered
                + 2 * (c_mid + n_pad) * 4                             # f32 biases
                + 2 * 2 * (tile_m * n_pad) * 4                        # two f32 outputs, 2x buffered
                + tile_m * c_mid * 4)                                 # in-flight intermediate
    vmem_limit = int(min(max(2 * vmem_est, 32 * 1024 * 1024), 56 * 1024 * 1024))

    out_shapes = (
        jax.ShapeDtypeStruct((rows_p, n_pad), jnp.float32),  # [cls logits (2A) | bbox (4A) | pad]
        jax.ShapeDtypeStruct((rows_p, n_pad), jnp.float32),  # [cls probs  (2A) | garbage  | pad]
    )
    return pl.pallas_call(
        _rpn_fused_kernel,
        out_shape=out_shapes,
        grid_spec=pltpu.PrefetchScalarGridSpec(
            num_scalar_prefetch=0,
            grid=grid,
            in_specs=[
                pl.BlockSpec((tile_m, k), lambda i: (i, 0)),
                pl.BlockSpec((k, c_mid), lambda i: (0, 0)),
                pl.BlockSpec((1, c_mid), lambda i: (0, 0)),
                pl.BlockSpec((c_mid, n_pad), lambda i: (0, 0)),
                pl.BlockSpec((1, n_pad), lambda i: (0, 0)),
            ],
            out_specs=[
                pl.BlockSpec((tile_m, n_pad), lambda i: (i, 0)),
                pl.BlockSpec((tile_m, n_pad), lambda i: (i, 0)),
            ],
        ),
        compiler_params=pltpu.CompilerParams(
            dimension_semantics=("parallel",),
            vmem_limit_bytes=vmem_limit,
        ),
    )(patches, w_shared, b_shared, w_heads, b_heads)


# ----------------------------------------------------------------------------- glue
def same_pad_2d(x_nhwc, kernel_size, stride):
    """TF 'SAME' padding, matching SamePad2d."""
    _, h, w, _ = x_nhwc.shape

    def pads(n):
        out = -(-n // stride)
        total = max((out - 1) * stride + kernel_size - n, 0)
        lo = total // 2
        return lo, total - lo

    pt, pb = pads(h)
    pleft, pright = pads(w)
    return jnp.pad(x_nhwc, ((0, 0), (pt, pb), (pleft, pright), (0, 0)))


def im2col_3x3(xp, stride):
    b, hp, wp, c = xp.shape
    ho = (hp - 3) // stride + 1
    wo = (wp - 3) // stride + 1
    cols = []
    for dy in range(3):
        for dx in range(3):
            cols.append(xp[:, dy:dy + stride * ho:stride, dx:dx + stride * wo:stride, :])
    patches = jnp.concatenate(cols, axis=-1)  # (B, Ho, Wo, 9*C), order (dy, dx, c)
    return patches.reshape(b * ho * wo, 9 * c), ho, wo


def prep_params(raw):
    """Rearrange PyTorch-convention weights into kernel-friendly matrices."""
    c512, depth = raw["w_shared"].shape[0], raw["w_shared"].shape[1]
    # (O, I, kh, kw) -> (kh, kw, I, O) -> (9*I, O); matches im2col (dy, dx, c) ordering.
    w_shared_flat = jnp.transpose(raw["w_shared"], (2, 3, 1, 0)).reshape(9 * depth, c512)
    # Heads: keep PyTorch channel order so no interleave is needed after the kernel.
    w_heads = jnp.concatenate([raw["w_cls"].T, raw["w_bbox"].T], axis=1)   # (512, 6A)
    b_heads = jnp.concatenate([raw["b_cls"], raw["b_bbox"]])               # (6A,)
    n_heads = w_heads.shape[1]
    n_pad = _round_up(n_heads, 128)
    w_heads = jnp.pad(w_heads, ((0, 0), (0, n_pad - n_heads)))
    b_heads = jnp.pad(b_heads, (0, n_pad - n_heads)).reshape(1, n_pad)
    return {
        "w_shared_flat": w_shared_flat.astype(jnp.bfloat16),
        "b_shared": raw["b_shared"].reshape(1, -1).astype(jnp.float32),
        "w_heads": w_heads.astype(jnp.bfloat16),
        "b_heads": b_heads.astype(jnp.float32),
    }


def rpn_forward(x_nchw, params, anchors_per_location, anchor_stride):
    a = anchors_per_location
    b = x_nchw.shape[0]
    x = jnp.transpose(x_nchw, (0, 2, 3, 1)).astype(jnp.bfloat16)  # NCHW -> NHWC, bf16 streaming
    xp = same_pad_2d(x, 3, anchor_stride)
    patches, ho, wo = im2col_3x3(xp, anchor_stride)
    rows = patches.shape[0]

    tile_m = min(TILE_M_MAX, _round_up(rows, 128))
    rows_p = _round_up(rows, tile_m)
    if rows_p != rows:
        patches = jnp.pad(patches, ((0, rows_p - rows), (0, 0)))

    y, probs = rpn_fused(patches, params["w_shared_flat"], params["b_shared"],
                         params["w_heads"], params["b_heads"], tile_m=tile_m)
    y = y[:rows]
    probs = probs[:rows]

    # columns are already in PyTorch channel order -> plain reshapes, no interleave.
    rpn_class_logits = y[:, :2 * a].reshape(b, ho * wo * a, 2)
    rpn_probs = probs[:, :2 * a].reshape(b, ho * wo * a, 2)
    rpn_bbox = y[:, 2 * a:6 * a].reshape(b, ho * wo * a, 4)
    return [rpn_class_logits, rpn_probs, rpn_bbox]


# ----------------------------------------------------------------------------- pure-JAX reference
def ref_forward(x_nchw, raw, anchors_per_location, anchor_stride):
    a = anchors_per_location
    b = x_nchw.shape[0]
    x = jnp.transpose(x_nchw, (0, 2, 3, 1)).astype(jnp.float32)
    xp = same_pad_2d(x, 3, anchor_stride)
    w = jnp.transpose(raw["w_shared"], (2, 3, 1, 0))  # HWIO
    y = jax.lax.conv_general_dilated(
        xp, w, (anchor_stride, anchor_stride), "VALID",
        dimension_numbers=("NHWC", "HWIO", "NHWC"),
        precision=jax.lax.Precision.HIGHEST)
    y = jax.nn.relu(y + raw["b_shared"])
    ho, wo = y.shape[1], y.shape[2]
    logits = jnp.einsum("bhwc,oc->bhwo", y, raw["w_cls"],
                        precision=jax.lax.Precision.HIGHEST) + raw["b_cls"]
    logits = logits.reshape(b, ho * wo * a, 2)
    probs = jax.nn.softmax(logits, axis=-1)
    bbox = jnp.einsum("bhwc,oc->bhwo", y, raw["w_bbox"],
                      precision=jax.lax.Precision.HIGHEST) + raw["b_bbox"]
    bbox = bbox.reshape(b, ho * wo * a, 4)
    return [logits, probs, bbox]


# ----------------------------------------------------------------------------- main
if __name__ == "__main__":
    # small, deterministic configuration
    batch, depth, hw = 2, 8, 16
    anchors_per_location, anchor_stride = 3, 1

    key = jax.random.PRNGKey(0)
    k_x, k_ws, k_bs, k_wc, k_bc, k_wb, k_bb = jax.random.split(key, 7)

    x = jax.random.normal(k_x, (batch, depth, hw, hw), dtype=jnp.float32)

    raw = {
        "w_shared": 0.05 * jax.random.normal(k_ws, (512, depth, 3, 3), dtype=jnp.float32),
        "b_shared": 0.05 * jax.random.normal(k_bs, (512,), dtype=jnp.float32),
        "w_cls":    0.05 * jax.random.normal(k_wc, (2 * anchors_per_location, 512), dtype=jnp.float32),
        "b_cls":    0.05 * jax.random.normal(k_bc, (2 * anchors_per_location,), dtype=jnp.float32),
        "w_bbox":   0.05 * jax.random.normal(k_wb, (4 * anchors_per_location, 512), dtype=jnp.float32),
        "b_bbox":   0.05 * jax.random.normal(k_bb, (4 * anchors_per_location,), dtype=jnp.float32),
    }
    params = prep_params(raw)

    outs = rpn_forward(x, params, anchors_per_location, anchor_stride)
    outs = jax.block_until_ready(outs)

    refs = ref_forward(x, raw, anchors_per_location, anchor_stride)
    # kernel runs in bf16 on the MXU (f32 accumulation); reference is f32 HIGHEST,
    # so tolerances are set for bf16-level agreement.
    for got, want in zip(outs, refs):
        assert got.shape == want.shape and got.dtype == want.dtype
        np.testing.assert_allclose(np.asarray(got), np.asarray(want), rtol=1e-2, atol=1e-2)

    print("KERNEL_OK")
</pallas_src>

<mosaic_0001>
module attributes {stable_mosaic.version = 11 : i64} {
  func.func @_rpn_fused_kernel(%arg0: i32, %arg1: memref<512x72xbf16, #tpu.memory_space<vmem>>, %arg2: memref<72x512xbf16, #tpu.memory_space<vmem>>, %arg3: memref<1x512xf32, #tpu.memory_space<vmem>>, %arg4: memref<512x128xbf16, #tpu.memory_space<vmem>>, %arg5: memref<1x128xf32, #tpu.memory_space<vmem>>, %arg6: memref<512x128xf32, #tpu.memory_space<vmem>>, %arg7: memref<512x128xf32, #tpu.memory_space<vmem>>) attributes {dimension_semantics = [#tpu.dimension_semantics<parallel>], iteration_bounds = array<i64: 1>, scalar_prefetch = 0 : i64, scratch_operands = 0 : i64, tpu.core_type = #tpu.core_type<tc>, window_params = [{transform_indices = @transform_0, window_bounds = array<i64: 512, 72>}, {pipeline_mode = #tpu.pipeline_mode<synchronous>, transform_indices = @transform_1, window_bounds = array<i64: 72, 512>}, {pipeline_mode = #tpu.pipeline_mode<synchronous>, transform_indices = @transform_2, window_bounds = array<i64: 1, 512>}, {pipeline_mode = #tpu.pipeline_mode<synchronous>, transform_indices = @transform_3, window_bounds = array<i64: 512, 128>}, {pipeline_mode = #tpu.pipeline_mode<synchronous>, transform_indices = @transform_4, window_bounds = array<i64: 1, 128>}, {transform_indices = @transform_5, window_bounds = array<i64: 512, 128>}, {transform_indices = @transform_6, window_bounds = array<i64: 512, 128>}]} {
    %c0 = arith.constant 0 : index
    %c0_0 = arith.constant 0 : index
    %0 = vector.load %arg1[%c0, %c0_0] : memref<512x72xbf16, #tpu.memory_space<vmem>>, vector<512x72xbf16>
    %c0_1 = arith.constant 0 : index
    %c0_2 = arith.constant 0 : index
    %1 = vector.load %arg2[%c0_1, %c0_2] : memref<72x512xbf16, #tpu.memory_space<vmem>>, vector<72x512xbf16>
    %cst = arith.constant dense<0.000000e+00> : vector<512x512xf32>
    %2 = tpu.matmul %0, %1, %cst {dimension_numbers = #tpu.dot_dimension_numbers<[1], [0], [0], [1], [0, 0, 1, 1], [], []>} : vector<512x72xbf16>, vector<72x512xbf16>, vector<512x512xf32> -> vector<512x512xf32>
    %c0_3 = arith.constant 0 : index
    %c0_4 = arith.constant 0 : index
    %3 = vector.load %arg3[%c0_3, %c0_4] : memref<1x512xf32, #tpu.memory_space<vmem>>, vector<1x512xf32>
    %4 = vector.broadcast %3 : vector<1x512xf32> to vector<512x512xf32>
    %5 = arith.addf %2, %4 : vector<512x512xf32>
    %cst_5 = arith.constant 0.000000e+00 : f32
    %6 = vector.broadcast %cst_5 : f32 to vector<512x512xf32>
    %7 = arith.maximumf %5, %6 : vector<512x512xf32>
    %8 = arith.truncf %7 : vector<512x512xf32> to vector<512x512xbf16>
    %c0_6 = arith.constant 0 : index
    %c0_7 = arith.constant 0 : index
    %9 = vector.load %arg4[%c0_6, %c0_7] : memref<512x128xbf16, #tpu.memory_space<vmem>>, vector<512x128xbf16>
    %cst_8 = arith.constant dense<0.000000e+00> : vector<512x128xf32>
    %10 = tpu.matmul %8, %9, %cst_8 {dimension_numbers = #tpu.dot_dimension_numbers<[1], [0], [0], [1], [0, 0, 1, 1], [], []>} : vector<512x512xbf16>, vector<512x128xbf16>, vector<512x128xf32> -> vector<512x128xf32>
    %c0_9 = arith.constant 0 : index
    %c0_10 = arith.constant 0 : index
    %11 = vector.load %arg5[%c0_9, %c0_10] : memref<1x128xf32, #tpu.memory_space<vmem>>, vector<1x128xf32>
    %12 = vector.broadcast %11 : vector<1x128xf32> to vector<512x128xf32>
    %13 = arith.addf %10, %12 : vector<512x128xf32>
    %c0_11 = arith.constant 0 : index
    %c0_12 = arith.constant 0 : index
    %14 = vector.load %arg6[%c0_11, %c0_12] : memref<512x128xf32, #tpu.memory_space<vmem>>, vector<512x128xf32>
    tpu.vector_store %arg6[%c0_11, %c0_12], %13 {strides = array<i32>} : memref<512x128xf32, #tpu.memory_space<vmem>>, vector<512x128xf32>,
    %15 = tpu.iota {dimensions = array<i32: 1>} : vector<512x128xi32>
    %c2_i32 = arith.constant 2 : i32
    %c0_i32 = arith.constant 0 : i32
    %16 = arith.cmpi eq, %c2_i32, %c0_i32 : i32
    %c1_i32 = arith.constant 1 : i32
    %17 = arith.select %16, %c1_i32, %c2_i32 : i32
    %18 = vector.broadcast %17 : i32 to vector<512x128xi32>
    %19 = arith.remsi %15, %18 : vector<512x128xi32>
    %c0_i32_13 = arith.constant 0 : i32
    %20 = vector.broadcast %c0_i32_13 : i32 to vector<512x128xi32>
    %21 = arith.cmpi ne, %19, %20 : vector<512x128xi32>
    %c0_i32_14 = arith.constant 0 : i32
    %22 = vector.broadcast %c0_i32_14 : i32 to vector<512x128xi32>
    %23 = arith.cmpi slt, %19, %22 : vector<512x128xi32>
    %c0_i32_15 = arith.constant 0 : i32
    %24 = arith.cmpi slt, %17, %c0_i32_15 : i32
    %25 = vector.broadcast %24 : i1 to vector<512x128xi1>
    %26 = vector.broadcast %25 : vector<512x128xi1> to vector<512x128xi1>
    %27 = arith.xori %23, %26 : vector<512x128xi1>
    %28 = arith.andi %27, %21 : vector<512x128xi1>
    %29 = vector.broadcast %17 : i32 to vector<512x128xi32>
    %30 = arith.addi %19, %29 : vector<512x128xi32>
    %31 = arith.select %28, %30, %19 : vector<512x128xi1>, vector<512x128xi32>
    %c0_i32_16 = arith.constant 0 : i32
    %32 = vector.broadcast %c0_i32_16 : i32 to vector<512x128xi32>
    %33 = arith.cmpi eq, %31, %32 : vector<512x128xi32>
    %c127_i32 = arith.constant 127 : i32
    %34 = tpu.dynamic_rotate %13 by %c127_i32 dim 1 : vector<512x128xf32>, i32 -> vector<512x128xf32>
    %c1_i32_17 = arith.constant 1 : i32
    %35 = tpu.dynamic_rotate %13 by %c1_i32_17 dim 1 : vector<512x128xf32>, i32 -> vector<512x128xf32>
    %36 = arith.select %33, %34, %35 : vector<512x128xi1>, vector<512x128xf32>
    %37 = arith.maximumf %13, %36 : vector<512x128xf32>
    %38 = arith.subf %13, %37 : vector<512x128xf32>
    %39 = math.exp %38 : vector<512x128xf32>
    %40 = arith.subf %36, %37 : vector<512x128xf32>
    %41 = math.exp %40 : vector<512x128xf32>
    %42 = arith.addf %39, %41 : vector<512x128xf32>
    %43 = tpu.reciprocal %42 {approx = true} : vector<512x128xf32> -> vector<512x128xf32>
    %44 = arith.mulf %39, %43 : vector<512x128xf32>
    %c0_18 = arith.constant 0 : index
    %c0_19 = arith.constant 0 : index
    %45 = vector.load %arg7[%c0_18, %c0_19] : memref<512x128xf32, #tpu.memory_space<vmem>>, vector<512x128xf32>
    tpu.vector_store %arg7[%c0_18, %c0_19], %44 {strides = array<i32>} : memref<512x128xf32, #tpu.memory_space<vmem>>, vector<512x128xf32>,
    return
  }
  func.func @transform_0(%arg0: i32) -> (i32, i32) {
    %c0_i32 = arith.constant 0 : i32
    %c0_i32_0 = arith.constant 0 : i32
    return %arg0, %c0_i32 : i32, i32
  }
  func.func @transform_1(%arg0: i32) -> (i32, i32) {
    %c0_i32 = arith.constant 0 : i32
    %c0_i32_0 = arith.constant 0 : i32
    %c0_i32_1 = arith.constant 0 : i32
    return %c0_i32, %c0_i32_0 : i32, i32
  }
  func.func @transform_2(%arg0: i32) -> (i32, i32) {
    %c0_i32 = arith.constant 0 : i32
    %c0_i32_0 = arith.constant 0 : i32
    %c0_i32_1 = arith.constant 0 : i32
    return %c0_i32, %c0_i32_0 : i32, i32
  }
  func.func @transform_3(%arg0: i32) -> (i32, i32) {
    %c0_i32 = arith.constant 0 : i32
    %c0_i32_0 = arith.constant 0 : i32
    %c0_i32_1 = arith.constant 0 : i32
    return %c0_i32, %c0_i32_0 : i32, i32
  }
  func.func @transform_4(%arg0: i32) -> (i32, i32) {
    %c0_i32 = arith.constant 0 : i32
    %c0_i32_0 = arith.constant 0 : i32
    %c0_i32_1 = arith.constant 0 : i32
    return %c0_i32, %c0_i32_0 : i32, i32
  }
  func.func @transform_5(%arg0: i32) -> (i32, i32) {
    %c0_i32 = arith.constant 0 : i32
    %c0_i32_0 = arith.constant 0 : i32
    return %arg0, %c0_i32 : i32, i32
  }
  func.func @transform_6(%arg0: i32) -> (i32, i32) {
    %c0_i32 = arith.constant 0 : i32
    %c0_i32_0 = arith.constant 0 : i32
    return %arg0, %c0_i32 : i32, i32
  }
}

</mosaic_0001>

<bundles_post_ra>
// kernel: tpu_custom_call.1
= control target key start
LH: loop header
LB: loop body
LE: loop exit
PB: predicated region body
PF: predicated region fallthrough
CT: control target
= control target key end

     0   :  { %12 = vsyncpa [#allocation3], 0  ;;  %v4392_v2 = vmov 0   ;;  %vm476_vm0 = vcmask 1043456   ;;  %vm379_vm1 = vcmask 588800   ;;  %s6360_s0 = inlined_call_operand.vmem [shape: bf16[512,72], index: 0, kind: input, shape index: {}]   ;;  %s6361_s1 = inlined_call_operand.vmem [shape: bf16[72,512], index: 1, kind: input, shape index: {}]   ;;  %s6362_s2 = inlined_call_operand.vmem [shape: f32[1,512], index: 2, kind: input, shape index: {}]   ;;  %s6363_s3 = inlined_call_operand.vmem [shape: bf16[512,128], index: 3, kind: input, shape index: {}]   ;;  %s6364_s4 = inlined_call_operand.vmem [shape: f32[1,128], index: 4, kind: input, shape index: {}]   ;;  %s6365_s5 = inlined_call_operand.hbm [shape: f32[512,128], index: 5, kind: output, shape index: {0}]   ;;  %s6366_s6 = inlined_call_operand.hbm [shape: f32[512,128], index: 6, kind: output, shape index: {1}]  }
   0x1   :  { %v3841_v0 = vld [vmem:[%s6361_s1 + $0x4] ss:$16 sps:$4 sm:$0xff]   ;;  %v3843_v1 = vld [vmem:[%s6361_s1 + $0xc] ss:$16 sps:$4 sm:$0xff]   ;;  %521 = vmatprep.mubr.bf16.mxu0 %v4392_v2  ;;  %874 = vmatprep.mubr.bf16.mxu1 %v4392_v2  ;;  %v3845_v3 = vld [vmem:[%s6361_s1] ss:$16 sps:$4 sm:$0xff]  }
   0x2   :  { %489 = vmatprep.subr.bf16.mxu0 %v3841_v0  ;;  %v3846_v4 = vld [vmem:[%s6361_s1 + $0x8] ss:$16 sps:$4 sm:$0xff]   ;;  %842 = vmatprep.subr.bf16.mxu1 %v3843_v1  ;;  %v3847_v5 = vld [vmem:[%s6361_s1 + $0x24] ss:$16 sps:$4 sm:$0xff]   ;;  %v3849_v6 = vld [vmem:[%s6361_s1 + $0x2c] ss:$16 sps:$4 sm:$0xff]  }
   0x3   :  { %490 = vmatpush1.bf16.msra.mxu0 %v3845_v3  ;;  %843 = vmatpush1.bf16.msra.mxu1 %v3846_v4  ;;  %v3851_v7 = vld [vmem:[%s6361_s1 + $0x20] ss:$16 sps:$4 sm:$0xff]   ;;  %v3852_v8 = vld [vmem:[%s6361_s1 + $0x28] ss:$16 sps:$4 sm:$0xff]   ;;  %v3853_v9 = vld [vmem:[%s6361_s1 + $0x44] ss:$16 sps:$4 sm:$0xff]  }
   0x4   :  { %491 = vmatprep.subr.bf16.mxu0 %v3847_v5  ;;  %844 = vmatprep.subr.bf16.mxu1 %v3849_v6  ;;  %v3855_v10 = vld [vmem:[%s6361_s1 + $0x4c] ss:$16 sps:$4 sm:$0xff]   ;;  %v3857_v11 = vld [vmem:[%s6361_s1 + $0x40] ss:$16 sps:$4 sm:$0xff]   ;;  %v3858_v12 = vld [vmem:[%s6361_s1 + $0x48] ss:$16 sps:$4 sm:$0xff]  }
   0x5   :  { %v3859_v13 = vld [vmem:[%s6361_s1 + $0x64] ss:$16 sps:$4 sm:$0xff]   ;;  %v3861_v14 = vld [vmem:[%s6361_s1 + $0x6c] ss:$16 sps:$4 sm:$0xff]   ;;  %v3863_v15 = vld [vmem:[%s6361_s1 + $0x60] ss:$16 sps:$4 sm:$0xff]  }
   0x6   :  { %v105_v16 = vld [vmem:[%s6361_s1 + $0x80] sm:$0xff]  ;;  %v106_v17 = vld [vmem:[%s6361_s1 + $0x88] sm:$0xff]  ;;  %v3878_v31 = vld [vmem:[%s6363_s3 + $0x10] sm:$0xff]  }
   0x7   :  { %492 = vmatpush1.bf16.msra.mxu0 %v3851_v7  ;;  %845 = vmatpush1.bf16.msra.mxu1 %v3852_v8  ;;  %v3864_v18 = vld [vmem:[%s6361_s1 + $0x68] ss:$16 sps:$4 sm:$0xff]   ;;  %v3604_v19 = vcombine.high %v105_v16, %v105_v16  ;;  %v3606_v20 = vcombine.high %v106_v17, %v106_v17  ;;  %v3603_v21 = vcombine.low %v105_v16, %v105_v16  ;;  %v3869_v25 = vld [vmem:[%s6360_s0] sm:$0xff]   ;;  %v3879_v32 = vld [vmem:[%s6363_s3 + $0x90] sm:$0xff]  }
   0x8   :  { %493 = vmatprep.subr.bf16.mxu0 %v3853_v9  ;;  %846 = vmatprep.subr.bf16.mxu1 %v3855_v10  ;;  %v3605_v22 = vcombine.low %v106_v17, %v106_v17  ;;  %v3870_v26 = vld [vmem:[%s6363_s3] sm:$0xff]   ;;  %v3874_v28 = vld [vmem:[%s6363_s3 + $0x8] sm:$0xff]   ;;  %v3882_v33 = vld [vmem:[%s6363_s3 + $0x18] sm:$0xff]  }
   0x9   :  { %v478_v23 = vsel %vm476_vm0, %v3603_v21, 0  ;;  %v3871_v27 = vld [vmem:[%s6363_s3 + $0x80] sm:$0xff]   ;;  %v3875_v29 = vld [vmem:[%s6363_s3 + $0x88] sm:$0xff]   ;;  %v3883_v34 = vld [vmem:[%s6363_s3 + $0x98] sm:$0xff]  }
   0xa   :  { %v484_v24 = vsel %vm476_vm0, %v3605_v22, 0  ;;  %v3872_v30 = vld [vmem:[%s6360_s0 + $0x8] sm:$0xff]   ;;  %v3873_v35 = vld [vmem:[%s6360_s0 + $0x10] sm:$0xff]   ;;  %v3886_v36 = vld [vmem:[%s6363_s3 + $0x20] sm:$0xff]  }
   0xb   :  { %494 = vmatpush1.bf16.msra.mxu0 %v3857_v11  ;;  %847 = vmatpush1.bf16.msra.mxu1 %v3858_v12  ;;  %v3887_v37 = vld [vmem:[%s6363_s3 + $0xa0] sm:$0xff]   ;;  %v3890_v38 = vld [vmem:[%s6363_s3 + $0x28] sm:$0xff]   ;;  %v3876_v40 = vld [vmem:[%s6360_s0 + $0x18] sm:$0xff]  }
   0xc   :  { %495 = vmatprep.subr.bf16.mxu0 %v3859_v13  ;;  %848 = vmatprep.subr.bf16.mxu1 %v3861_v14  ;;  %v3891_v39 = vld [vmem:[%s6363_s3 + $0xa8] sm:$0xff]   ;;  %v3894_v41 = vld [vmem:[%s6363_s3 + $0x30] sm:$0xff]   ;;  %v3898_v43 = vld [vmem:[%s6363_s3 + $0x38] sm:$0xff]  }
   0xd   :  { %v3895_v42 = vld [vmem:[%s6363_s3 + $0xb0] sm:$0xff]   ;;  %v3899_v44 = vld [vmem:[%s6363_s3 + $0xb8] sm:$0xff]   ;;  %v3877_v45 = vld [vmem:[%s6360_s0 + $0x20] sm:$0xff]  }
   0xe   :  { %v3902_v46 = vld [vmem:[%s6363_s3 + $0x40] sm:$0xff]   ;;  %v3906_v48 = vld [vmem:[%s6363_s3 + $0x48] sm:$0xff]   ;;  %v3910_v51 = vld [vmem:[%s6363_s3 + $0x50] sm:$0xff]  }
   0xf   :  { %496 = vmatpush1.bf16.msra.mxu0 %v3863_v15  ;;  %849 = vmatpush1.bf16.msra.mxu1 %v3864_v18  ;;  %v3903_v47 = vld [vmem:[%s6363_s3 + $0xc0] sm:$0xff]   ;;  %v3907_v49 = vld [vmem:[%s6363_s3 + $0xc8] sm:$0xff]   ;;  %v3911_v52 = vld [vmem:[%s6363_s3 + $0xd0] sm:$0xff]  }
  0x10   :  { %3607 = vmatprep.subr.msk.bf16.mxu0 %vm476_vm0, %v3604_v19  ;;  %3640 = vmatprep.subr.msk.bf16.mxu1 %vm476_vm0, %v3606_v20  ;;  %v3880_v50 = vld [vmem:[%s6360_s0 + $0x28] sm:$0xff]   ;;  %v3881_v53 = vld [vmem:[%s6360_s0 + $0x30] sm:$0xff]  }
  0x13   :  { %498 = vmatpush1.bf16.msra.mxu0 %v478_v23  ;;  %851 = vmatpush1.bf16.msra.mxu1 %v484_v24 }
  0x14   :  { %1842 = vmatprep.subr.bf16.mxu1 %v4392_v2  ;;  %2131 = vmatprep.subr.bf16.mxu0 %v4392_v2 }
  0x16   :  { %3608 = vmatmul.mubr.msk.bf16.vlgmr.msra.gmra.mrb[0].mxu0 %vm379_vm1, %v3869_v25  ;;  %3641 = vmatmul.mubr.msk.bf16.vlgmr.msra.gmra.mrb[0].mxu1 %vm379_vm1, %v3869_v25 }
  0x17   :  { %1843 = vmatpush1.bf16.msra.mxu1 %v3870_v26  ;;  %2132 = vmatpush1.bf16.msra.mxu0 %v3871_v27 }
  0x18   :  { %531 = vmatprep.mubr.bf16.mxu0 %v4392_v2  ;;  %884 = vmatprep.mubr.bf16.mxu1 %v4392_v2 }
  0x19   :  { %1844 = vmatprep.subr.bf16.mxu1 %v4392_v2  ;;  %2133 = vmatprep.subr.bf16.mxu0 %v4392_v2 }
  0x1b   :  { %1845 = vmatpush1.bf16.msra.mxu1 %v3874_v28  ;;  %2134 = vmatpush1.bf16.msra.mxu0 %v3875_v29 }
  0x1c   :  { %1846 = vmatprep.subr.bf16.mxu1 %v4392_v2  ;;  %2135 = vmatprep.subr.bf16.mxu0 %v4392_v2 }
  0x1e   :  { %3609 = vmatmul.mubr.msk.bf16.gmra.mrb[4].mxu0 %vm379_vm1, %v3872_v30  ;;  %3642 = vmatmul.mubr.msk.bf16.gmra.mrb[4].mxu1 %vm379_vm1, %v3872_v30 }
  0x1f   :  { %541 = vmatprep.mubr.bf16.mxu0 %v4392_v2  ;;  %894 = vmatprep.mubr.bf16.mxu1 %v4392_v2 }
  0x20   :  { %1847 = vmatpush1.bf16.msra.mxu1 %v3878_v31  ;;  %2136 = vmatpush1.bf16.msra.mxu0 %v3879_v32 }
  0x21   :  { %1848 = vmatprep.subr.bf16.mxu1 %v4392_v2  ;;  %2137 = vmatprep.subr.bf16.mxu0 %v4392_v2 }
  0x24   :  { %1849 = vmatpush1.bf16.msra.mxu1 %v3882_v33  ;;  %2138 = vmatpush1.bf16.msra.mxu0 %v3883_v34 }
  0x25   :  { %1850 = vmatprep.subr.bf16.mxu1 %v4392_v2  ;;  %2139 = vmatprep.subr.bf16.mxu0 %v4392_v2 }
  0x26   :  { %3610 = vmatmul.mubr.msk.bf16.gmra.mrb[8].mxu0 %vm379_vm1, %v3873_v35  ;;  %3643 = vmatmul.mubr.msk.bf16.gmra.mrb[8].mxu1 %vm379_vm1, %v3873_v35 }
  0x27   :  { %551 = vmatprep.mubr.bf16.mxu0 %v4392_v2  ;;  %904 = vmatprep.mubr.bf16.mxu1 %v4392_v2 }
  0x28   :  { %1851 = vmatpush1.bf16.msra.mxu1 %v3886_v36  ;;  %2140 = vmatpush1.bf16.msra.mxu0 %v3887_v37 }
  0x29   :  { %1852 = vmatprep.subr.bf16.mxu1 %v4392_v2  ;;  %2141 = vmatprep.subr.bf16.mxu0 %v4392_v2 }
  0x2c   :  { %1853 = vmatpush1.bf16.msra.mxu1 %v3890_v38  ;;  %2142 = vmatpush1.bf16.msra.mxu0 %v3891_v39 }
  0x2d   :  { %1854 = vmatprep.subr.bf16.mxu1 %v4392_v2  ;;  %2143 = vmatprep.subr.bf16.mxu0 %v4392_v2 }
  0x2e   :  { %3611 = vmatmul.mubr.msk.bf16.gmra.mrb[12].mxu0 %vm379_vm1, %v3876_v40  ;;  %3644 = vmatmul.mubr.msk.bf16.gmra.mrb[12].mxu1 %vm379_vm1, %v3876_v40 }
  0x2f   :  { %561 = vmatprep.mubr.bf16.mxu0 %v4392_v2  ;;  %914 = vmatprep.mubr.bf16.mxu1 %v4392_v2 }
  0x30   :  { %1855 = vmatpush1.bf16.msra.mxu1 %v3894_v41  ;;  %2144 = vmatpush1.bf16.msra.mxu0 %v3895_v42 }
  0x31   :  { %1856 = vmatprep.subr.bf16.mxu1 %v4392_v2  ;;  %2145 = vmatprep.subr.bf16.mxu0 %v4392_v2 }
  0x34   :  { %1857 = vmatpush1.bf16.msra.mxu1 %v3898_v43  ;;  %2146 = vmatpush1.bf16.msra.mxu0 %v3899_v44 }
  0x35   :  { %1858 = vmatprep.subr.bf16.mxu1 %v4392_v2  ;;  %2147 = vmatprep.subr.bf16.mxu0 %v4392_v2 }
  0x36   :  { %3612 = vmatmul.mubr.msk.bf16.gmra.mrb[16].mxu0 %vm379_vm1, %v3877_v45  ;;  %3645 = vmatmul.mubr.msk.bf16.gmra.mrb[16].mxu1 %vm379_vm1, %v3877_v45 }
  0x37   :  { %571 = vmatprep.mubr.bf16.mxu0 %v4392_v2  ;;  %924 = vmatprep.mubr.bf16.mxu1 %v4392_v2 }
  0x38   :  { %1859 = vmatpush1.bf16.msra.mxu1 %v3902_v46  ;;  %2148 = vmatpush1.bf16.msra.mxu0 %v3903_v47 }
  0x39   :  { %1860 = vmatprep.subr.bf16.mxu1 %v4392_v2  ;;  %2149 = vmatprep.subr.bf16.mxu0 %v4392_v2 }
  0x3c   :  { %1861 = vmatpush1.bf16.msra.mxu1 %v3906_v48  ;;  %2150 = vmatpush1.bf16.msra.mxu0 %v3907_v49 }
  0x3d   :  { %1862 = vmatprep.subr.bf16.mxu1 %v4392_v2  ;;  %2151 = vmatprep.subr.bf16.mxu0 %v4392_v2 }
  0x3e   :  { %3613 = vmatmul.mubr.msk.bf16.gmra.mrb[20].mxu0 %vm379_vm1, %v3880_v50  ;;  %3646 = vmatmul.mubr.msk.bf16.gmra.mrb[20].mxu1 %vm379_vm1, %v3880_v50 }
  0x3f   :  { %581 = vmatprep.mubr.bf16.mxu0 %v4392_v2  ;;  %934 = vmatprep.mubr.bf16.mxu1 %v4392_v2 }
  0x40   :  { %1863 = vmatpush1.bf16.msra.mxu1 %v3910_v51  ;;  %2152 = vmatpush1.bf16.msra.mxu0 %v3911_v52 }
  0x41   :  { %1864 = vmatprep.subr.bf16.mxu1 %v4392_v2  ;;  %2153 = vmatprep.subr.bf16.mxu0 %v4392_v2 }
  0x42   :  { %13 = vsyncpa [#allocation5], 0  ;;  %v3914_v54 = vld [vmem:[%s6363_s3 + $0x58] sm:$0xff]   ;;  %v3885_v57 = vld [vmem:[%s6360_s0 + $0x40] sm:$0xff]   ;;  %v109_v20 = vlaneseq  ;;  %s4393_s12 = smov 127   ;;  %s4394_s1 = smov 1  }
  0x43   :  { %v3915_v55 = vld [vmem:[%s6363_s3 + $0xd8] sm:$0xff]   ;;  %v3918_v58 = vld [vmem:[%s6363_s3 + $0x60] sm:$0xff]   ;;  %v3888_v60 = vld [vmem:[%s6360_s0 + $0x48] sm:$0xff]  }
  0x44   :  { %1865 = vmatpush1.bf16.msra.mxu1 %v3914_v54  ;;  %2154 = vmatpush1.bf16.msra.mxu0 %v3915_v55  ;;  %v3884_v56 = vld [vmem:[%s6360_s0 + $0x38] sm:$0xff]   ;;  %v3919_v59 = vld [vmem:[%s6363_s3 + $0xe0] sm:$0xff]   ;;  %v3889_v61 = vld [vmem:[%s6360_s0 + $0x50] sm:$0xff]   ;;  %v110_v21 = vshrl.u32 %v109_v20, 7 }
  0x45   :  { %1866 = vmatprep.subr.bf16.mxu1 %v4392_v2  ;;  %2155 = vmatprep.subr.bf16.mxu0 %v4392_v2  ;;  %v3922_v62 = vld [vmem:[%s6363_s3 + $0x68] sm:$0xff]   ;;  %v3892_v63 = vld [vmem:[%s6360_s0 + $0x58] sm:$0xff]   ;;  %v3893_v1 = vld [vmem:[%s6360_s0 + $0x60] sm:$0xff]  }
  0x46   :  { %3614 = vmatmul.mubr.msk.bf16.gmra.mrb[24].mxu0 %vm379_vm1, %v3881_v53  ;;  %3647 = vmatmul.mubr.msk.bf16.gmra.mrb[24].mxu1 %vm379_vm1, %v3881_v53  ;;  %v3923_v0 = vld [vmem:[%s6363_s3 + $0xe8] sm:$0xff]   ;;  %v3926_v3 = vld [vmem:[%s6363_s3 + $0x70] sm:$0xff]   ;;  %v3930_v7 = vld [vmem:[%s6363_s3 + $0x78] sm:$0xff]   ;;  %v111_v23 = vsub.s32 0, %v110_v21  ;;  %v119_v24 = vsub.s32 2, %v110_v21  ;;  %v115_v26 = vsub.s32 1, %v110_v21 }
  0x47   :  { %591 = vmatprep.mubr.bf16.mxu0 %v4392_v2  ;;  %944 = vmatprep.mubr.bf16.mxu1 %v4392_v2  ;;  %v3896_v4 = vld [vmem:[%s6360_s0 + $0x68] sm:$0xff]   ;;  %v3927_v5 = vld [vmem:[%s6363_s3 + $0xf0] sm:$0xff]   ;;  %v3900_v8 = vld [vmem:[%s6360_s0 + $0x78] sm:$0xff]   ;;  %v123_v27 = vsub.s32 3, %v110_v21 }
  0x48   :  { %1867 = vmatpush1.bf16.msra.mxu1 %v3918_v58  ;;  %2156 = vmatpush1.bf16.msra.mxu0 %v3919_v59  ;;  %v3897_v6 = vld [vmem:[%s6360_s0 + $0x70] sm:$0xff]   ;;  %v3931_v9 = vld [vmem:[%s6363_s3 + $0xf8] sm:$0xff]   ;;  %v3901_v10 = vld [vmem:[%s6360_s0 + $0x80] sm:$0xff]  }
  0x49   :  { %1868 = vmatprep.subr.bf16.mxu1 %v4392_v2  ;;  %2157 = vmatprep.subr.bf16.mxu0 %v4392_v2  ;;  %v3904_v11 = vld [vmem:[%s6360_s0 + $0x88] sm:$0xff]   ;;  %v3905_v12 = vld [vmem:[%s6360_s0 + $0x90] sm:$0xff]   ;;  %v3908_v13 = vld [vmem:[%s6360_s0 + $0x98] sm:$0xff]  }
  0x4a   :  { %v3909_v14 = vld [vmem:[%s6360_s0 + $0xa0] sm:$0xff]   ;;  %v3912_v15 = vld [vmem:[%s6360_s0 + $0xa8] sm:$0xff]   ;;  %v3913_v16 = vld [vmem:[%s6360_s0 + $0xb0] sm:$0xff]  }
  0x4b   :  { %v3916_v17 = vld [vmem:[%s6360_s0 + $0xb8] sm:$0xff]   ;;  %v3917_v18 = vld [vmem:[%s6360_s0 + $0xc0] sm:$0xff]   ;;  %v3920_v19 = vld [vmem:[%s6360_s0 + $0xc8] sm:$0xff]  }
  0x4c   :  { %1869 = vmatpush1.bf16.msra.mxu1 %v3922_v62  ;;  %2158 = vmatpush1.bf16.msra.mxu0 %v3923_v0  ;;  %v3921_v22 = vld [vmem:[%s6360_s0 + $0xd0] sm:$0xff]   ;;  %v107_v25 = vld [vmem:[%s6362_s2] sm:$0xf]  ;;  %v3924_v38 = vld [vmem:[%s6360_s0 + $0xd8] sm:$0xff]  }
  0x4d   :  { %1870 = vmatprep.subr.bf16.mxu1 %v4392_v2  ;;  %2159 = vmatprep.subr.bf16.mxu0 %v4392_v2  ;;  %v4809_v28 = vrot.slane %v107_v25, %v111_v23  ;;  %v4811_v29 = vrot.slane %v107_v25, %v119_v24  ;;  %v4813_v30 = vrot.slane %v107_v25, %v115_v26 }
  0x4e   :  { %3615 = vmatmul.mubr.msk.bf16.gmra.mrb[28].mxu0 %vm379_vm1, %v3884_v56  ;;  %3648 = vmatmul.mubr.msk.bf16.gmra.mrb[28].mxu1 %vm379_vm1, %v3884_v56  ;;  %v4815_v31 = vrot.slane %v107_v25, %v123_v27 }
  0x4f   :  { %601 = vmatprep.mubr.bf16.mxu0 %v4392_v2  ;;  %954 = vmatprep.mubr.bf16.mxu1 %v4392_v2 }
  0x50   :  { %1871 = vmatpush1.bf16.msra.mxu1 %v3926_v3  ;;  %2160 = vmatpush1.bf16.msra.mxu0 %v3927_v5 }
  0x51   :  { %1872 = vmatprep.subr.bf16.mxu1 %v4392_v2  ;;  %2161 = vmatprep.subr.bf16.mxu0 %v4392_v2 }
  0x54   :  { %1873 = vmatpush1.bf16.msra.mxu1 %v3930_v7  ;;  %2162 = vmatpush1.bf16.msra.mxu0 %v3931_v9 }
  0x56   :  { %3616 = vmatmul.mubr.msk.bf16.gmra.mrb[32].mxu0 %vm379_vm1, %v3885_v57  ;;  %3649 = vmatmul.mubr.msk.bf16.gmra.mrb[32].mxu1 %vm379_vm1, %v3885_v57 }
  0x57   :  { %611 = vmatprep.mubr.bf16.mxu0 %v4392_v2  ;;  %964 = vmatprep.mubr.bf16.mxu1 %v4392_v2 }
  0x5e   :  { %3617 = vmatmul.mubr.msk.bf16.gmra.mrb[36].mxu0 %vm379_vm1, %v3888_v60  ;;  %3650 = vmatmul.mubr.msk.bf16.gmra.mrb[36].mxu1 %vm379_vm1, %v3888_v60 }
  0x5f   :  { %621 = vmatprep.mubr.bf16.mxu0 %v4392_v2  ;;  %974 = vmatprep.mubr.bf16.mxu1 %v4392_v2 }
  0x66   :  { %3618 = vmatmul.mubr.msk.bf16.gmra.mrb[40].mxu0 %vm379_vm1, %v3889_v61  ;;  %3651 = vmatmul.mubr.msk.bf16.gmra.mrb[40].mxu1 %vm379_vm1, %v3889_v61 }
  0x67   :  { %631 = vmatprep.mubr.bf16.mxu0 %v4392_v2  ;;  %984 = vmatprep.mubr.bf16.mxu1 %v4392_v2 }
  0x6e   :  { %3619 = vmatmul.mubr.msk.bf16.gmra.mrb[44].mxu0 %vm379_vm1, %v3892_v63  ;;  %3652 = vmatmul.mubr.msk.bf16.gmra.mrb[44].mxu1 %vm379_vm1, %v3892_v63 }
  0x6f   :  { %641 = vmatprep.mubr.bf16.mxu0 %v4392_v2  ;;  %994 = vmatprep.mubr.bf16.mxu1 %v4392_v2 }
  0x76   :  { %3620 = vmatmul.mubr.msk.bf16.gmra.mrb[48].mxu0 %vm379_vm1, %v3893_v1  ;;  %3653 = vmatmul.mubr.msk.bf16.gmra.mrb[48].mxu1 %vm379_vm1, %v3893_v1 }
  0x77   :  { %651 = vmatprep.mubr.bf16.mxu0 %v4392_v2  ;;  %1004 = vmatprep.mubr.bf16.mxu1 %v4392_v2 }
  0x7e   :  { %3621 = vmatmul.mubr.msk.bf16.gmra.mrb[52].mxu0 %vm379_vm1, %v3896_v4  ;;  %3654 = vmatmul.mubr.msk.bf16.gmra.mrb[52].mxu1 %vm379_vm1, %v3896_v4  ;;  %v3925_v4 = vld [vmem:[%s6360_s0 + $0xe0] sm:$0xff]  }
  0x7f   :  { %661 = vmatprep.mubr.bf16.mxu0 %v4392_v2  ;;  %1014 = vmatprep.mubr.bf16.mxu1 %v4392_v2 }
  0x86   :  { %3622 = vmatmul.mubr.msk.bf16.gmra.mrb[56].mxu0 %vm379_vm1, %v3897_v6  ;;  %3655 = vmatmul.mubr.msk.bf16.gmra.mrb[56].mxu1 %vm379_vm1, %v3897_v6 }
  0x87   :  { %671 = vmatprep.mubr.bf16.mxu0 %v4392_v2  ;;  %1024 = vmatprep.mubr.bf16.mxu1 %v4392_v2 }
  0x8e   :  { %3623 = vmatmul.mubr.msk.bf16.gmra.mrb[60].mxu0 %vm379_vm1, %v3900_v8  ;;  %3656 = vmatmul.mubr.msk.bf16.gmra.mrb[60].mxu1 %vm379_vm1, %v3900_v8 }
  0x8f   :  { %681 = vmatprep.mubr.bf16.mxu0 %v4392_v2  ;;  %1034 = vmatprep.mubr.bf16.mxu1 %v4392_v2 }
  0x96   :  { %3624 = vmatmul.mubr.msk.bf16.gmra.mrb[64].mxu0 %vm379_vm1, %v3901_v10  ;;  %3657 = vmatmul.mubr.msk.bf16.gmra.mrb[64].mxu1 %vm379_vm1, %v3901_v10 }
  0x97   :  { %691 = vmatprep.mubr.bf16.mxu0 %v4392_v2  ;;  %1044 = vmatprep.mubr.bf16.mxu1 %v4392_v2 }
  0x9e   :  { %3625 = vmatmul.mubr.msk.bf16.gmra.mrb[68].mxu0 %vm379_vm1, %v3904_v11  ;;  %3658 = vmatmul.mubr.msk.bf16.gmra.mrb[68].mxu1 %vm379_vm1, %v3904_v11 }
  0x9f   :  { %701 = vmatprep.mubr.bf16.mxu0 %v4392_v2  ;;  %1054 = vmatprep.mubr.bf16.mxu1 %v4392_v2 }
  0xa6   :  { %3626 = vmatmul.mubr.msk.bf16.gmra.mrb[72].mxu0 %vm379_vm1, %v3905_v12  ;;  %3659 = vmatmul.mubr.msk.bf16.gmra.mrb[72].mxu1 %vm379_vm1, %v3905_v12 }
  0xa7   :  { %711 = vmatprep.mubr.bf16.mxu0 %v4392_v2  ;;  %1064 = vmatprep.mubr.bf16.mxu1 %v4392_v2 }
  0xae   :  { %3627 = vmatmul.mubr.msk.bf16.gmra.mrb[76].mxu0 %vm379_vm1, %v3908_v13  ;;  %3660 = vmatmul.mubr.msk.bf16.gmra.mrb[76].mxu1 %vm379_vm1, %v3908_v13 }
  0xaf   :  { %721 = vmatprep.mubr.bf16.mxu0 %v4392_v2  ;;  %1074 = vmatprep.mubr.bf16.mxu1 %v4392_v2 }
  0xb6   :  { %3628 = vmatmul.mubr.msk.bf16.gmra.mrb[80].mxu0 %vm379_vm1, %v3909_v14  ;;  %3661 = vmatmul.mubr.msk.bf16.gmra.mrb[80].mxu1 %vm379_vm1, %v3909_v14 }
  0xb7   :  { %731 = vmatprep.mubr.bf16.mxu0 %v4392_v2  ;;  %1084 = vmatprep.mubr.bf16.mxu1 %v4392_v2 }
  0xbe   :  { %3629 = vmatmul.mubr.msk.bf16.gmra.mrb[84].mxu0 %vm379_vm1, %v3912_v15  ;;  %3662 = vmatmul.mubr.msk.bf16.gmra.mrb[84].mxu1 %vm379_vm1, %v3912_v15 }
  0xbf   :  { %741 = vmatprep.mubr.bf16.mxu0 %v4392_v2  ;;  %1094 = vmatprep.mubr.bf16.mxu1 %v4392_v2 }
  0xc6   :  { %3630 = vmatmul.mubr.msk.bf16.gmra.mrb[88].mxu0 %vm379_vm1, %v3913_v16  ;;  %3663 = vmatmul.mubr.msk.bf16.gmra.mrb[88].mxu1 %vm379_vm1, %v3913_v16 }
  0xc7   :  { %751 = vmatprep.mubr.bf16.mxu0 %v4392_v2  ;;  %1104 = vmatprep.mubr.bf16.mxu1 %v4392_v2 }
  0xce   :  { %3631 = vmatmul.mubr.msk.bf16.gmra.mrb[92].mxu0 %vm379_vm1, %v3916_v17  ;;  %3664 = vmatmul.mubr.msk.bf16.gmra.mrb[92].mxu1 %vm379_vm1, %v3916_v17 }
  0xcf   :  { %761 = vmatprep.mubr.bf16.mxu0 %v4392_v2  ;;  %1114 = vmatprep.mubr.bf16.mxu1 %v4392_v2 }
  0xd6   :  { %3632 = vmatmul.mubr.msk.bf16.gmra.mrb[96].mxu0 %vm379_vm1, %v3917_v18  ;;  %3665 = vmatmul.mubr.msk.bf16.gmra.mrb[96].mxu1 %vm379_vm1, %v3917_v18 }
  0xd7   :  { %771 = vmatprep.mubr.bf16.mxu0 %v4392_v2  ;;  %1124 = vmatprep.mubr.bf16.mxu1 %v4392_v2 }
  0xde   :  { %3633 = vmatmul.mubr.msk.bf16.gmra.mrb[100].mxu0 %vm379_vm1, %v3920_v19  ;;  %3666 = vmatmul.mubr.msk.bf16.gmra.mrb[100].mxu1 %vm379_vm1, %v3920_v19 }
  0xdf   :  { %781 = vmatprep.mubr.bf16.mxu0 %v4392_v2  ;;  %1134 = vmatprep.mubr.bf16.mxu1 %v4392_v2 }
  0xe6   :  { %3634 = vmatmul.mubr.msk.bf16.gmra.mrb[104].mxu0 %vm379_vm1, %v3921_v22  ;;  %3667 = vmatmul.mubr.msk.bf16.gmra.mrb[104].mxu1 %vm379_vm1, %v3921_v22 }
  0xe7   :  { %791 = vmatprep.mubr.bf16.mxu0 %v4392_v2  ;;  %1144 = vmatprep.mubr.bf16.mxu1 %v4392_v2 }
  0xe9   :  { %v523_v32 = vpop.f32.mrb[0].mxu0  ;;  %v876_v33 = vpop.f32.mrb[0].mxu1 }
  0xea   :  { %v524_v34 = vadd.f32 %v523_v32, %v4809_v28  ;;  %v877_v35 = vadd.f32 %v876_v33, %v4811_v29  ;;  %v525_v36 = vpop.f32.mrb[1].mxu0  ;;  %v878_v37 = vpop.f32.mrb[1].mxu1 }
  0xeb   :  { %v526_v39 = vadd.f32 %v525_v36, %v4813_v30  ;;  %v879_v40 = vadd.f32 %v878_v37, %v4815_v31  ;;  %v527_v41 = vpop.f32.mrb[2].mxu0  ;;  %v880_v42 = vpop.f32.mrb[2].mxu1 }
  0xec   :  { %v1195_v43 = vmax.f32 %v524_v34, 0.0  ;;  %v528_v44 = vadd.f32 %v527_v41, %v4809_v28  ;;  %v881_v45 = vadd.f32 %v880_v42, %v4811_v29  ;;  %v529_v46 = vpop.f32.mrb[3].mxu0  ;;  %v882_v47 = vpop.f32.mrb[3].mxu1  ;;  %v1197_v51 = vmax.f32 %v877_v35, 0.0 }
  0xed   :  { %v1196_v48 = vmax.f32 %v526_v39, 0.0  ;;  %v530_v49 = vadd.f32 %v529_v46, %v4813_v30  ;;  %v883_v50 = vadd.f32 %v882_v47, %v4815_v31  ;;  %v1198_v54 = vmax.f32 %v879_v40, 0.0 }
  0xee   :  { %v1199_v52 = vmax.f32 %v528_v44, 0.0  ;;  %v1201_v53 = vmax.f32 %v881_v45, 0.0  ;;  %3635 = vmatmul.mubr.msk.bf16.gmra.mrb[108].mxu0 %vm379_vm1, %v3924_v38  ;;  %3668 = vmatmul.mubr.msk.bf16.gmra.mrb[108].mxu1 %vm379_vm1, %v3924_v38  ;;  %v3928_v38 = vld [vmem:[%s6360_s0 + $0xe8] sm:$0xff]  }
  0xef   :  { %v1200_v55 = vmax.f32 %v530_v49, 0.0  ;;  %v1202_v56 = vmax.f32 %v883_v50, 0.0  ;;  %801 = vmatprep.mubr.bf16.mxu0 %v4392_v2  ;;  %1154 = vmatprep.mubr.bf16.mxu1 %v4392_v2 }
  0xf0   :  { %v4834_v57 = vpack.c.bf16 %v1199_v52, %v1195_v43  ;;  %v4836_v58 = vpack.c.bf16 %v1201_v53, %v1197_v51 }
  0xf1   :  { %v4838_v59 = vpack.c.bf16 %v1200_v55, %v1196_v48  ;;  %v4840_v60 = vpack.c.bf16 %v1202_v56, %v1198_v54  ;;  %v533_v61 = vpop.f32.mrb[4].mxu0  ;;  %v886_v62 = vpop.f32.mrb[4].mxu1 }
  0xf2   :  { %v534_v63 = vadd.f32 %v533_v61, %v4809_v28  ;;  %v887_v0 = vadd.f32 %v886_v62, %v4811_v29  ;;  %v535_v1 = vpop.f32.mrb[5].mxu0  ;;  %v888_v3 = vpop.f32.mrb[5].mxu1 }
  0xf3   :  { %v536_v5 = vadd.f32 %v535_v1, %v4813_v30  ;;  %v889_v6 = vadd.f32 %v888_v3, %v4815_v31  ;;  %v537_v7 = vpop.f32.mrb[6].mxu0  ;;  %v890_v8 = vpop.f32.mrb[6].mxu1 }
  0xf4   :  { %v1203_v9 = vmax.f32 %v534_v63, 0.0  ;;  %v538_v10 = vadd.f32 %v537_v7, %v4809_v28  ;;  %v891_v11 = vadd.f32 %v890_v8, %v4811_v29  ;;  %v539_v12 = vpop.f32.mrb[7].mxu0  ;;  %v892_v13 = vpop.f32.mrb[7].mxu1  ;;  %v1205_v17 = vmax.f32 %v887_v0, 0.0  ;;  %v3929_v8 = vld [vmem:[%s6360_s0 + $0xf0] sm:$0xff]  }
  0xf5   :  { %v1204_v14 = vmax.f32 %v536_v5, 0.0  ;;  %v540_v15 = vadd.f32 %v539_v12, %v4813_v30  ;;  %v893_v16 = vadd.f32 %v892_v13, %v4815_v31  ;;  %v1206_v21 = vmax.f32 %v889_v6, 0.0 }
  0xf6   :  { %v1207_v18 = vmax.f32 %v538_v10, 0.0  ;;  %v1209_v19 = vmax.f32 %v891_v11, 0.0  ;;  %3636 = vmatmul.mubr.msk.bf16.gmra.mrb[112].mxu0 %vm379_vm1, %v3925_v4  ;;  %3669 = vmatmul.mubr.msk.bf16.gmra.mrb[112].mxu1 %vm379_vm1, %v3925_v4 }
  0xf7   :  { %v1208_v22 = vmax.f32 %v540_v15, 0.0  ;;  %v1210_v23 = vmax.f32 %v893_v16, 0.0  ;;  %811 = vmatprep.mubr.bf16.mxu0 %v4392_v2  ;;  %1164 = vmatprep.mubr.bf16.mxu1 %v4392_v2 }
  0xf8   :  { %v4857_v24 = vpack.c.bf16 %v1207_v18, %v1203_v9  ;;  %v4859_v25 = vpack.c.bf16 %v1209_v19, %v1205_v17 }
  0xf9   :  { %v4861_v26 = vpack.c.bf16 %v1208_v22, %v1204_v14  ;;  %v4863_v27 = vpack.c.bf16 %v1210_v23, %v1206_v21  ;;  %v543_v32 = vpop.f32.mrb[8].mxu0  ;;  %v896_v33 = vpop.f32.mrb[8].mxu1 }
  0xfa   :  { %v544_v34 = vadd.f32 %v543_v32, %v4809_v28  ;;  %v897_v35 = vadd.f32 %v896_v33, %v4811_v29  ;;  %v545_v36 = vpop.f32.mrb[9].mxu0  ;;  %v898_v37 = vpop.f32.mrb[9].mxu1 }
  0xfb   :  { %v546_v39 = vadd.f32 %v545_v36, %v4813_v30  ;;  %v899_v40 = vadd.f32 %v898_v37, %v4815_v31  ;;  %v547_v41 = vpop.f32.mrb[10].mxu0  ;;  %v900_v42 = vpop.f32.mrb[10].mxu1 }
  0xfc   :  { %v1211_v43 = vmax.f32 %v544_v34, 0.0  ;;  %v548_v44 = vadd.f32 %v547_v41, %v4809_v28  ;;  %v901_v45 = vadd.f32 %v900_v42, %v4811_v29  ;;  %v549_v46 = vpop.f32.mrb[11].mxu0  ;;  %v902_v47 = vpop.f32.mrb[11].mxu1  ;;  %v1213_v51 = vmax.f32 %v897_v35, 0.0 }
  0xfd   :  { %v1212_v48 = vmax.f32 %v546_v39, 0.0  ;;  %v550_v49 = vadd.f32 %v549_v46, %v4813_v30  ;;  %v903_v50 = vadd.f32 %v902_v47, %v4815_v31  ;;  %v1214_v54 = vmax.f32 %v899_v40, 0.0 }
  0xfe   :  { %v1215_v52 = vmax.f32 %v548_v44, 0.0  ;;  %v1217_v53 = vmax.f32 %v901_v45, 0.0  ;;  %3637 = vmatmul.mubr.msk.bf16.gmra.mrb[116].mxu0 %vm379_vm1, %v3928_v38  ;;  %3670 = vmatmul.mubr.msk.bf16.gmra.mrb[116].mxu1 %vm379_vm1, %v3928_v38 }
  0xff   :  { %v1216_v55 = vmax.f32 %v550_v49, 0.0  ;;  %v1218_v56 = vmax.f32 %v903_v50, 0.0  ;;  %821 = vmatprep.mubr.bf16.mxu0 %v4392_v2  ;;  %1174 = vmatprep.mubr.bf16.mxu1 %v4392_v2 }
 0x100   :  { %v4880_v61 = vpack.c.bf16 %v1215_v52, %v1211_v43  ;;  %v4882_v62 = vpack.c.bf16 %v1217_v53, %v1213_v51 }
 0x101   :  { %v4884_v63 = vpack.c.bf16 %v1216_v55, %v1212_v48  ;;  %v4886_v0 = vpack.c.bf16 %v1218_v56, %v1214_v54  ;;  %v553_v1 = vpop.f32.mrb[12].mxu0  ;;  %v906_v3 = vpop.f32.mrb[12].mxu1 }
 0x102   :  { %v554_v4 = vadd.f32 %v553_v1, %v4809_v28  ;;  %v907_v5 = vadd.f32 %v906_v3, %v4811_v29  ;;  %v555_v6 = vpop.f32.mrb[13].mxu0  ;;  %v908_v7 = vpop.f32.mrb[13].mxu1 }
 0x103   :  { %v556_v9 = vadd.f32 %v555_v6, %v4813_v30  ;;  %v909_v10 = vadd.f32 %v908_v7, %v4815_v31  ;;  %v557_v11 = vpop.f32.mrb[14].mxu0  ;;  %v910_v12 = vpop.f32.mrb[14].mxu1 }
 0x104   :  { %v1219_v13 = vmax.f32 %v554_v4, 0.0  ;;  %v558_v14 = vadd.f32 %v557_v11, %v4809_v28  ;;  %v911_v15 = vadd.f32 %v910_v12, %v4811_v29  ;;  %v559_v16 = vpop.f32.mrb[15].mxu0  ;;  %v912_v17 = vpop.f32.mrb[15].mxu1  ;;  %v1221_v22 = vmax.f32 %v907_v5, 0.0 }
 0x105   :  { %v1220_v18 = vmax.f32 %v556_v9, 0.0  ;;  %v560_v19 = vadd.f32 %v559_v16, %v4813_v30  ;;  %v913_v21 = vadd.f32 %v912_v17, %v4815_v31  ;;  %v1222_v33 = vmax.f32 %v909_v10, 0.0 }
 0x106   :  { %v1223_v23 = vmax.f32 %v558_v14, 0.0  ;;  %v1225_v32 = vmax.f32 %v911_v15, 0.0  ;;  %3638 = vmatmul.mubr.msk.bf16.gmra.mrb[120].mxu0 %vm379_vm1, %v3929_v8  ;;  %3671 = vmatmul.mubr.msk.bf16.gmra.mrb[120].mxu1 %vm379_vm1, %v3929_v8 }
 0x107   :  { %v1224_v34 = vmax.f32 %v560_v19, 0.0  ;;  %v1226_v35 = vmax.f32 %v913_v21, 0.0  ;;  %831 = vmatprep.mubr.bf16.mxu0 %v4392_v2  ;;  %1184 = vmatprep.mubr.bf16.mxu1 %v4392_v2  ;;  %v3932_v2 = vld [vmem:[%s6360_s0 + $0xf8] sm:$0xff]  }
 0x108   :  { %v4903_v36 = vpack.c.bf16 %v1223_v23, %v1219_v13  ;;  %v4905_v37 = vpack.c.bf16 %v1225_v32, %v1221_v22 }
 0x109   :  { %v4907_v38 = vpack.c.bf16 %v1224_v34, %v1220_v18  ;;  %v4909_v39 = vpack.c.bf16 %v1226_v35, %v1222_v33  ;;  %v563_v40 = vpop.f32.mrb[16].mxu0  ;;  %v916_v41 = vpop.f32.mrb[16].mxu1 }
 0x10a   :  { %v564_v42 = vadd.f32 %v563_v40, %v4809_v28  ;;  %v917_v43 = vadd.f32 %v916_v41, %v4811_v29  ;;  %v565_v44 = vpop.f32.mrb[17].mxu0  ;;  %v918_v45 = vpop.f32.mrb[17].mxu1 }
 0x10b   :  { %v566_v46 = vadd.f32 %v565_v44, %v4813_v30  ;;  %v919_v47 = vadd.f32 %v918_v45, %v4815_v31  ;;  %v567_v48 = vpop.f32.mrb[18].mxu0  ;;  %v920_v49 = vpop.f32.mrb[18].mxu1 }
 0x10c   :  { %v1227_v50 = vmax.f32 %v564_v42, 0.0  ;;  %v568_v51 = vadd.f32 %v567_v48, %v4809_v28  ;;  %v921_v52 = vadd.f32 %v920_v49, %v4811_v29  ;;  %v569_v53 = vpop.f32.mrb[19].mxu0  ;;  %v922_v54 = vpop.f32.mrb[19].mxu1  ;;  %v1229_v3 = vmax.f32 %v917_v43, 0.0 }
 0x10d   :  { %v1228_v55 = vmax.f32 %v566_v46, 0.0  ;;  %v570_v56 = vadd.f32 %v569_v53, %v4813_v30  ;;  %v923_v1 = vadd.f32 %v922_v54, %v4815_v31  ;;  %v1230_v6 = vmax.f32 %v919_v47, 0.0 }
 0x10e   :  { %v1231_v4 = vmax.f32 %v568_v51, 0.0  ;;  %v1233_v5 = vmax.f32 %v921_v52, 0.0  ;;  %3639 = vmatmul.mubr.msk.bf16.gmra.mrb[124].mxu0 %vm379_vm1, %v3932_v2  ;;  %3672 = vmatmul.mubr.msk.bf16.gmra.mrb[124].mxu1 %vm379_vm1, %v3932_v2 }
 0x10f   :  { %v1232_v7 = vmax.f32 %v570_v56, 0.0  ;;  %v1234_v8 = vmax.f32 %v923_v1, 0.0  ;;  %1874 = vmatprep.mubr.bf16.mxu1 %v4838_v59  ;;  %2163 = vmatprep.mubr.bf16.mxu0 %v4840_v60 }
 0x110   :  { %v4926_v9 = vpack.c.bf16 %v1231_v4, %v1227_v50  ;;  %v4928_v10 = vpack.c.bf16 %v1233_v5, %v1229_v3 }
 0x111   :  { %v4930_v11 = vpack.c.bf16 %v1232_v7, %v1228_v55  ;;  %v4932_v12 = vpack.c.bf16 %v1234_v8, %v1230_v6  ;;  %v573_v13 = vpop.f32.mrb[20].mxu0  ;;  %v926_v14 = vpop.f32.mrb[20].mxu1 }
 0x112   :  { %v574_v15 = vadd.f32 %v573_v13, %v4809_v28  ;;  %v927_v16 = vadd.f32 %v926_v14, %v4811_v29  ;;  %v575_v17 = vpop.f32.mrb[21].mxu0  ;;  %v928_v18 = vpop.f32.mrb[21].mxu1 }
 0x113   :  { %v576_v59 = vadd.f32 %v575_v17, %v4813_v30  ;;  %v929_v60 = vadd.f32 %v928_v18, %v4815_v31  ;;  %v577_v19 = vpop.f32.mrb[22].mxu0  ;;  %v930_v21 = vpop.f32.mrb[22].mxu1 }
 0x114   :  { %v1235_v22 = vmax.f32 %v574_v15, 0.0  ;;  %v578_v23 = vadd.f32 %v577_v19, %v4809_v28  ;;  %v931_v32 = vadd.f32 %v930_v21, %v4811_v29  ;;  %v579_v33 = vpop.f32.mrb[23].mxu0  ;;  %v932_v34 = vpop.f32.mrb[23].mxu1  ;;  %v1237_v42 = vmax.f32 %v927_v16, 0.0 }
 0x115   :  { %v1236_v35 = vmax.f32 %v576_v59, 0.0  ;;  %v580_v40 = vadd.f32 %v579_v33, %v4813_v30  ;;  %v933_v41 = vadd.f32 %v932_v34, %v4815_v31  ;;  %v1238_v45 = vmax.f32 %v929_v60, 0.0 }
 0x116   :  { %v1239_v43 = vmax.f32 %v578_v23, 0.0  ;;  %v1241_v44 = vmax.f32 %v931_v32, 0.0  ;;  %1875 = vmatmul.mubr.bf16.vlgmr.msra.gmra.mrb[128].mxu1 %v4834_v57  ;;  %2164 = vmatmul.mubr.bf16.vlgmr.msra.gmra.mrb[128].mxu0 %v4836_v58 }
 0x117   :  { %v1240_v2 = vmax.f32 %v580_v40, 0.0  ;;  %v1242_v46 = vmax.f32 %v933_v41, 0.0  ;;  %1882 = vmatprep.mubr.bf16.mxu1 %v4861_v26  ;;  %2171 = vmatprep.mubr.bf16.mxu0 %v4863_v27 }
 0x118   :  { %v4946_v47 = vpack.c.bf16 %v1239_v43, %v1235_v22  ;;  %v4948_v48 = vpack.c.bf16 %v1241_v44, %v1237_v42 }
 0x119   :  { %v4950_v49 = vpack.c.bf16 %v1240_v2, %v1236_v35  ;;  %v4952_v50 = vpack.c.bf16 %v1242_v46, %v1238_v45  ;;  %v583_v51 = vpop.f32.mrb[24].mxu0  ;;  %v936_v52 = vpop.f32.mrb[24].mxu1 }
 0x11a   :  { %v584_v57 = vadd.f32 %v583_v51, %v4809_v28  ;;  %v937_v58 = vadd.f32 %v936_v52, %v4811_v29  ;;  %v585_v53 = vpop.f32.mrb[25].mxu0  ;;  %v938_v54 = vpop.f32.mrb[25].mxu1 }
 0x11b   :  { %v586_v26 = vadd.f32 %v585_v53, %v4813_v30  ;;  %v939_v27 = vadd.f32 %v938_v54, %v4815_v31  ;;  %v587_v55 = vpop.f32.mrb[26].mxu0  ;;  %v940_v56 = vpop.f32.mrb[26].mxu1 }
 0x11c   :  { %v1243_v1 = vmax.f32 %v584_v57, 0.0  ;;  %v588_v3 = vadd.f32 %v587_v55, %v4809_v28  ;;  %v941_v4 = vadd.f32 %v940_v56, %v4811_v29  ;;  %v589_v5 = vpop.f32.mrb[27].mxu0  ;;  %v942_v6 = vpop.f32.mrb[27].mxu1  ;;  %v1245_v14 = vmax.f32 %v937_v58, 0.0 }
 0x11d   :  { %v1244_v7 = vmax.f32 %v586_v26, 0.0  ;;  %v590_v8 = vadd.f32 %v589_v5, %v4813_v30  ;;  %v943_v13 = vadd.f32 %v942_v6, %v4815_v31  ;;  %v1246_v17 = vmax.f32 %v939_v27, 0.0 }
 0x11e   :  { %v1247_v15 = vmax.f32 %v588_v3, 0.0  ;;  %v1249_v16 = vmax.f32 %v941_v4, 0.0  ;;  %1883 = vmatmul.mubr.bf16.gmra.mrb[132].mxu1 %v4857_v24  ;;  %2172 = vmatmul.mubr.bf16.gmra.mrb[132].mxu0 %v4859_v25 }
 0x11f   :  { %v1248_v18 = vmax.f32 %v590_v8, 0.0  ;;  %v1250_v59 = vmax.f32 %v943_v13, 0.0  ;;  %1890 = vmatprep.mubr.bf16.mxu1 %v4884_v63  ;;  %2179 = vmatprep.mubr.bf16.mxu0 %v4886_v0 }
 0x120   :  { %v4966_v60 = vpack.c.bf16 %v1247_v15, %v1243_v1  ;;  %v4968_v19 = vpack.c.bf16 %v1249_v16, %v1245_v14 }
 0x121   :  { %v4970_v21 = vpack.c.bf16 %v1248_v18, %v1244_v7  ;;  %v4972_v22 = vpack.c.bf16 %v1250_v59, %v1246_v17  ;;  %v593_v23 = vpop.f32.mrb[28].mxu0  ;;  %v946_v32 = vpop.f32.mrb[28].mxu1 }
 0x122   :  { %v594_v24 = vadd.f32 %v593_v23, %v4809_v28  ;;  %v947_v25 = vadd.f32 %v946_v32, %v4811_v29  ;;  %v595_v33 = vpop.f32.mrb[29].mxu0  ;;  %v948_v34 = vpop.f32.mrb[29].mxu1 }
 0x123   :  { %v596_v63 = vadd.f32 %v595_v33, %v4813_v30  ;;  %v949_v0 = vadd.f32 %v948_v34, %v4815_v31  ;;  %v597_v35 = vpop.f32.mrb[30].mxu0  ;;  %v950_v40 = vpop.f32.mrb[30].mxu1 }
 0x124   :  { %v1251_v41 = vmax.f32 %v594_v24, 0.0  ;;  %v598_v42 = vadd.f32 %v597_v35, %v4809_v28  ;;  %v951_v43 = vadd.f32 %v950_v40, %v4811_v29  ;;  %v599_v44 = vpop.f32.mrb[31].mxu0  ;;  %v952_v45 = vpop.f32.mrb[31].mxu1  ;;  %v1253_v52 = vmax.f32 %v947_v25, 0.0 }
 0x125   :  { %v1252_v2 = vmax.f32 %v596_v63, 0.0  ;;  %v600_v46 = vadd.f32 %v599_v44, %v4813_v30  ;;  %v953_v51 = vadd.f32 %v952_v45, %v4815_v31  ;;  %v1254_v53 = vmax.f32 %v949_v0, 0.0 }
 0x126   :  { %v1255_v57 = vmax.f32 %v598_v42, 0.0  ;;  %v1257_v58 = vmax.f32 %v951_v43, 0.0  ;;  %1891 = vmatmul.mubr.bf16.gmra.mrb[136].mxu1 %v4880_v61  ;;  %2180 = vmatmul.mubr.bf16.gmra.mrb[136].mxu0 %v4882_v62 }
 0x127   :  { %v1256_v54 = vmax.f32 %v600_v46, 0.0  ;;  %v1258_v26 = vmax.f32 %v953_v51, 0.0  ;;  %1898 = vmatprep.mubr.bf16.mxu1 %v4907_v38  ;;  %2187 = vmatprep.mubr.bf16.mxu0 %v4909_v39 }
 0x128   :  { %v4986_v27 = vpack.c.bf16 %v1255_v57, %v1251_v41  ;;  %v4988_v55 = vpack.c.bf16 %v1257_v58, %v1253_v52 }
 0x129   :  { %v4990_v56 = vpack.c.bf16 %v1256_v54, %v1252_v2  ;;  %v4992_v1 = vpack.c.bf16 %v1258_v26, %v1254_v53  ;;  %v603_v3 = vpop.f32.mrb[32].mxu0  ;;  %v956_v4 = vpop.f32.mrb[32].mxu1 }
 0x12a   :  { %v604_v61 = vadd.f32 %v603_v3, %v4809_v28  ;;  %v957_v62 = vadd.f32 %v956_v4, %v4811_v29  ;;  %v605_v5 = vpop.f32.mrb[33].mxu0  ;;  %v958_v6 = vpop.f32.mrb[33].mxu1 }
 0x12b   :  { %v606_v38 = vadd.f32 %v605_v5, %v4813_v30  ;;  %v959_v39 = vadd.f32 %v958_v6, %v4815_v31  ;;  %v607_v7 = vpop.f32.mrb[34].mxu0  ;;  %v960_v8 = vpop.f32.mrb[34].mxu1 }
 0x12c   :  { %v1259_v13 = vmax.f32 %v604_v61, 0.0  ;;  %v608_v14 = vadd.f32 %v607_v7, %v4809_v28  ;;  %v961_v15 = vadd.f32 %v960_v8, %v4811_v29  ;;  %v609_v16 = vpop.f32.mrb[35].mxu0  ;;  %v962_v17 = vpop.f32.mrb[35].mxu1  ;;  %v1261_v32 = vmax.f32 %v957_v62, 0.0 }
 0x12d   :  { %v1260_v18 = vmax.f32 %v606_v38, 0.0  ;;  %v610_v59 = vadd.f32 %v609_v16, %v4813_v30  ;;  %v963_v23 = vadd.f32 %v962_v17, %v4815_v31  ;;  %v1262_v33 = vmax.f32 %v959_v39, 0.0 }
 0x12e   :  { %v1263_v24 = vmax.f32 %v608_v14, 0.0  ;;  %v1265_v25 = vmax.f32 %v961_v15, 0.0  ;;  %1899 = vmatmul.mubr.bf16.gmra.mrb[140].mxu1 %v4903_v36  ;;  %2188 = vmatmul.mubr.bf16.gmra.mrb[140].mxu0 %v4905_v37 }
 0x12f   :  { %v1264_v34 = vmax.f32 %v610_v59, 0.0  ;;  %v1266_v63 = vmax.f32 %v963_v23, 0.0  ;;  %1906 = vmatprep.mubr.bf16.mxu1 %v4930_v11  ;;  %2195 = vmatprep.mubr.bf16.mxu0 %v4932_v12 }
 0x130   :  { %v5006_v0 = vpack.c.bf16 %v1263_v24, %v1259_v13  ;;  %v5008_v35 = vpack.c.bf16 %v1265_v25, %v1261_v32 }
 0x131   :  { %v5010_v40 = vpack.c.bf16 %v1264_v34, %v1260_v18  ;;  %v5012_v41 = vpack.c.bf16 %v1266_v63, %v1262_v33  ;;  %v613_v42 = vpop.f32.mrb[36].mxu0  ;;  %v966_v43 = vpop.f32.mrb[36].mxu1 }
 0x132   :  { %v614_v36 = vadd.f32 %v613_v42, %v4809_v28  ;;  %v967_v37 = vadd.f32 %v966_v43, %v4811_v29  ;;  %v615_v44 = vpop.f32.mrb[37].mxu0  ;;  %v968_v45 = vpop.f32.mrb[37].mxu1 }
 0x133   :  { %v616_v11 = vadd.f32 %v615_v44, %v4813_v30  ;;  %v969_v12 = vadd.f32 %v968_v45, %v4815_v31  ;;  %v617_v2 = vpop.f32.mrb[38].mxu0  ;;  %v970_v46 = vpop.f32.mrb[38].mxu1 }
 0x134   :  { %v1267_v51 = vmax.f32 %v614_v36, 0.0  ;;  %v618_v52 = vadd.f32 %v617_v2, %v4809_v28  ;;  %v971_v57 = vadd.f32 %v970_v46, %v4811_v29  ;;  %v619_v58 = vpop.f32.mrb[39].mxu0  ;;  %v972_v53 = vpop.f32.mrb[39].mxu1  ;;  %v1269_v4 = vmax.f32 %v967_v37, 0.0 }
 0x135   :  { %v1268_v54 = vmax.f32 %v616_v11, 0.0  ;;  %v620_v26 = vadd.f32 %v619_v58, %v4813_v30  ;;  %v973_v3 = vadd.f32 %v972_v53, %v4815_v31  ;;  %v1270_v5 = vmax.f32 %v969_v12, 0.0 }
 0x136   :  { %v1271_v61 = vmax.f32 %v618_v52, 0.0  ;;  %v1273_v62 = vmax.f32 %v971_v57, 0.0  ;;  %1907 = vmatmul.mubr.bf16.gmra.mrb[144].mxu1 %v4926_v9  ;;  %2196 = vmatmul.mubr.bf16.gmra.mrb[144].mxu0 %v4928_v10 }
 0x137   :  { %v1272_v6 = vmax.f32 %v620_v26, 0.0  ;;  %v1274_v38 = vmax.f32 %v973_v3, 0.0  ;;  %1914 = vmatprep.mubr.bf16.mxu1 %v4950_v49  ;;  %2203 = vmatprep.mubr.bf16.mxu0 %v4952_v50 }
 0x138   :  { %v5026_v39 = vpack.c.bf16 %v1271_v61, %v1267_v51  ;;  %v5028_v7 = vpack.c.bf16 %v1273_v62, %v1269_v4 }
 0x139   :  { %v5030_v8 = vpack.c.bf16 %v1272_v6, %v1268_v54  ;;  %v5032_v13 = vpack.c.bf16 %v1274_v38, %v1270_v5  ;;  %v623_v14 = vpop.f32.mrb[40].mxu0  ;;  %v976_v15 = vpop.f32.mrb[40].mxu1 }
 0x13a   :  { %v624_v9 = vadd.f32 %v623_v14, %v4809_v28  ;;  %v977_v10 = vadd.f32 %v976_v15, %v4811_v29  ;;  %v625_v16 = vpop.f32.mrb[41].mxu0  ;;  %v978_v17 = vpop.f32.mrb[41].mxu1 }
 0x13b   :  { %v626_v49 = vadd.f32 %v625_v16, %v4813_v30  ;;  %v979_v50 = vadd.f32 %v978_v17, %v4815_v31  ;;  %v627_v18 = vpop.f32.mrb[42].mxu0  ;;  %v980_v59 = vpop.f32.mrb[42].mxu1 }
 0x13c   :  { %v1275_v23 = vmax.f32 %v624_v9, 0.0  ;;  %v628_v32 = vadd.f32 %v627_v18, %v4809_v28  ;;  %v981_v24 = vadd.f32 %v980_v59, %v4811_v29  ;;  %v629_v25 = vpop.f32.mrb[43].mxu0  ;;  %v982_v33 = vpop.f32.mrb[43].mxu1  ;;  %v1277_v43 = vmax.f32 %v977_v10, 0.0 }
 0x13d   :  { %v1276_v34 = vmax.f32 %v626_v49, 0.0  ;;  %v630_v63 = vadd.f32 %v629_v25, %v4813_v30  ;;  %v983_v42 = vadd.f32 %v982_v33, %v4815_v31  ;;  %v1278_v44 = vmax.f32 %v979_v50, 0.0 }
 0x13e   :  { %v1279_v36 = vmax.f32 %v628_v32, 0.0  ;;  %v1281_v37 = vmax.f32 %v981_v24, 0.0  ;;  %1915 = vmatmul.mubr.bf16.gmra.mrb[148].mxu1 %v4946_v47  ;;  %2204 = vmatmul.mubr.bf16.gmra.mrb[148].mxu0 %v4948_v48 }
 0x13f   :  { %v1280_v45 = vmax.f32 %v630_v63, 0.0  ;;  %v1282_v11 = vmax.f32 %v983_v42, 0.0  ;;  %1922 = vmatprep.mubr.bf16.mxu1 %v4970_v21  ;;  %2211 = vmatprep.mubr.bf16.mxu0 %v4972_v22 }
 0x140   :  { %v5046_v12 = vpack.c.bf16 %v1279_v36, %v1275_v23  ;;  %v5048_v2 = vpack.c.bf16 %v1281_v37, %v1277_v43 }
 0x141   :  { %v5050_v46 = vpack.c.bf16 %v1280_v45, %v1276_v34  ;;  %v5052_v51 = vpack.c.bf16 %v1282_v11, %v1278_v44  ;;  %v633_v52 = vpop.f32.mrb[44].mxu0  ;;  %v986_v57 = vpop.f32.mrb[44].mxu1 }
 0x142   :  { %v634_v47 = vadd.f32 %v633_v52, %v4809_v28  ;;  %v987_v48 = vadd.f32 %v986_v57, %v4811_v29  ;;  %v635_v58 = vpop.f32.mrb[45].mxu0  ;;  %v988_v53 = vpop.f32.mrb[45].mxu1 }
 0x143   :  { %v636_v21 = vadd.f32 %v635_v58, %v4813_v30  ;;  %v989_v22 = vadd.f32 %v988_v53, %v4815_v31  ;;  %v637_v54 = vpop.f32.mrb[46].mxu0  ;;  %v990_v26 = vpop.f32.mrb[46].mxu1 }
 0x144   :  { %v1283_v3 = vmax.f32 %v634_v47, 0.0  ;;  %v638_v4 = vadd.f32 %v637_v54, %v4809_v28  ;;  %v991_v61 = vadd.f32 %v990_v26, %v4811_v29  ;;  %v639_v62 = vpop.f32.mrb[47].mxu0  ;;  %v992_v5 = vpop.f32.mrb[47].mxu1  ;;  %v1285_v15 = vmax.f32 %v987_v48, 0.0 }
 0x145   :  { %v1284_v6 = vmax.f32 %v636_v21, 0.0  ;;  %v640_v38 = vadd.f32 %v639_v62, %v4813_v30  ;;  %v993_v14 = vadd.f32 %v992_v5, %v4815_v31  ;;  %v1286_v16 = vmax.f32 %v989_v22, 0.0 }
 0x146   :  { %v1287_v9 = vmax.f32 %v638_v4, 0.0  ;;  %v1289_v10 = vmax.f32 %v991_v61, 0.0  ;;  %1923 = vmatmul.mubr.bf16.gmra.mrb[152].mxu1 %v4966_v60  ;;  %2212 = vmatmul.mubr.bf16.gmra.mrb[152].mxu0 %v4968_v19 }
 0x147   :  { %v1288_v17 = vmax.f32 %v640_v38, 0.0  ;;  %v1290_v49 = vmax.f32 %v993_v14, 0.0  ;;  %1930 = vmatprep.mubr.bf16.mxu1 %v4990_v56  ;;  %2219 = vmatprep.mubr.bf16.mxu0 %v4992_v1 }
 0x148   :  { %v5066_v50 = vpack.c.bf16 %v1287_v9, %v1283_v3  ;;  %v5068_v18 = vpack.c.bf16 %v1289_v10, %v1285_v15 }
 0x149   :  { %v5070_v59 = vpack.c.bf16 %v1288_v17, %v1284_v6  ;;  %v5072_v23 = vpack.c.bf16 %v1290_v49, %v1286_v16  ;;  %v643_v32 = vpop.f32.mrb[48].mxu0  ;;  %v996_v24 = vpop.f32.mrb[48].mxu1 }
 0x14a   :  { %v644_v60 = vadd.f32 %v643_v32, %v4809_v28  ;;  %v997_v19 = vadd.f32 %v996_v24, %v4811_v29  ;;  %v645_v25 = vpop.f32.mrb[49].mxu0  ;;  %v998_v33 = vpop.f32.mrb[49].mxu1 }
 0x14b   :  { %v646_v56 = vadd.f32 %v645_v25, %v4813_v30  ;;  %v999_v1 = vadd.f32 %v998_v33, %v4815_v31  ;;  %v647_v34 = vpop.f32.mrb[50].mxu0  ;;  %v1000_v63 = vpop.f32.mrb[50].mxu1 }
 0x14c   :  { %v1291_v42 = vmax.f32 %v644_v60, 0.0  ;;  %v648_v43 = vadd.f32 %v647_v34, %v4809_v28  ;;  %v1001_v36 = vadd.f32 %v1000_v63, %v4811_v29  ;;  %v649_v37 = vpop.f32.mrb[51].mxu0  ;;  %v1002_v44 = vpop.f32.mrb[51].mxu1  ;;  %v1293_v57 = vmax.f32 %v997_v19, 0.0 }
 0x14d   :  { %v1292_v45 = vmax.f32 %v646_v56, 0.0  ;;  %v650_v11 = vadd.f32 %v649_v37, %v4813_v30  ;;  %v1003_v52 = vadd.f32 %v1002_v44, %v4815_v31  ;;  %v1294_v58 = vmax.f32 %v999_v1, 0.0 }
 0x14e   :  { %v1295_v47 = vmax.f32 %v648_v43, 0.0  ;;  %v1297_v48 = vmax.f32 %v1001_v36, 0.0  ;;  %1931 = vmatmul.mubr.bf16.gmra.mrb[156].mxu1 %v4986_v27  ;;  %2220 = vmatmul.mubr.bf16.gmra.mrb[156].mxu0 %v4988_v55 }
 0x14f   :  { %v1296_v53 = vmax.f32 %v650_v11, 0.0  ;;  %v1298_v21 = vmax.f32 %v1003_v52, 0.0  ;;  %1938 = vmatprep.mubr.bf16.mxu1 %v5010_v40  ;;  %2227 = vmatprep.mubr.bf16.mxu0 %v5012_v41 }
 0x150   :  { %v5086_v22 = vpack.c.bf16 %v1295_v47, %v1291_v42  ;;  %v5088_v54 = vpack.c.bf16 %v1297_v48, %v1293_v57 }
 0x151   :  { %v5090_v26 = vpack.c.bf16 %v1296_v53, %v1292_v45  ;;  %v5092_v3 = vpack.c.bf16 %v1298_v21, %v1294_v58  ;;  %v653_v4 = vpop.f32.mrb[52].mxu0  ;;  %v1006_v61 = vpop.f32.mrb[52].mxu1 }
 0x152   :  { %v654_v27 = vadd.f32 %v653_v4, %v4809_v28  ;;  %v1007_v55 = vadd.f32 %v1006_v61, %v4811_v29  ;;  %v655_v62 = vpop.f32.mrb[53].mxu0  ;;  %v1008_v5 = vpop.f32.mrb[53].mxu1 }
 0x153   :  { %v656_v40 = vadd.f32 %v655_v62, %v4813_v30  ;;  %v1009_v41 = vadd.f32 %v1008_v5, %v4815_v31  ;;  %v657_v6 = vpop.f32.mrb[54].mxu0  ;;  %v1010_v38 = vpop.f32.mrb[54].mxu1 }
 0x154   :  { %v1299_v14 = vmax.f32 %v654_v27, 0.0  ;;  %v658_v15 = vadd.f32 %v657_v6, %v4809_v28  ;;  %v1011_v9 = vadd.f32 %v1010_v38, %v4811_v29  ;;  %v659_v10 = vpop.f32.mrb[55].mxu0  ;;  %v1012_v16 = vpop.f32.mrb[55].mxu1  ;;  %v1301_v24 = vmax.f32 %v1007_v55, 0.0 }
 0x155   :  { %v1300_v17 = vmax.f32 %v656_v40, 0.0  ;;  %v660_v49 = vadd.f32 %v659_v10, %v4813_v30  ;;  %v1013_v32 = vadd.f32 %v1012_v16, %v4815_v31  ;;  %v1302_v25 = vmax.f32 %v1009_v41, 0.0 }
 0x156   :  { %v1303_v60 = vmax.f32 %v658_v15, 0.0  ;;  %v1305_v19 = vmax.f32 %v1011_v9, 0.0  ;;  %1939 = vmatmul.mubr.bf16.gmra.mrb[160].mxu1 %v5006_v0  ;;  %2228 = vmatmul.mubr.bf16.gmra.mrb[160].mxu0 %v5008_v35 }
 0x157   :  { %v1304_v33 = vmax.f32 %v660_v49, 0.0  ;;  %v1306_v56 = vmax.f32 %v1013_v32, 0.0  ;;  %1946 = vmatprep.mubr.bf16.mxu1 %v5030_v8  ;;  %2235 = vmatprep.mubr.bf16.mxu0 %v5032_v13 }
 0x158   :  { %v5106_v1 = vpack.c.bf16 %v1303_v60, %v1299_v14  ;;  %v5108_v34 = vpack.c.bf16 %v1305_v19, %v1301_v24 }
 0x159   :  { %v5110_v63 = vpack.c.bf16 %v1304_v33, %v1300_v17  ;;  %v5112_v42 = vpack.c.bf16 %v1306_v56, %v1302_v25  ;;  %v663_v43 = vpop.f32.mrb[56].mxu0  ;;  %v1016_v36 = vpop.f32.mrb[56].mxu1 }
 0x15a   :  { %v664_v0 = vadd.f32 %v663_v43, %v4809_v28  ;;  %v1017_v35 = vadd.f32 %v1016_v36, %v4811_v29  ;;  %v665_v37 = vpop.f32.mrb[57].mxu0  ;;  %v1018_v44 = vpop.f32.mrb[57].mxu1 }
 0x15b   :  { %v666_v8 = vadd.f32 %v665_v37, %v4813_v30  ;;  %v1019_v13 = vadd.f32 %v1018_v44, %v4815_v31  ;;  %v667_v45 = vpop.f32.mrb[58].mxu0  ;;  %v1020_v11 = vpop.f32.mrb[58].mxu1 }
 0x15c   :  { %v1307_v52 = vmax.f32 %v664_v0, 0.0  ;;  %v668_v57 = vadd.f32 %v667_v45, %v4809_v28  ;;  %v1021_v47 = vadd.f32 %v1020_v11, %v4811_v29  ;;  %v669_v48 = vpop.f32.mrb[59].mxu0  ;;  %v1022_v58 = vpop.f32.mrb[59].mxu1  ;;  %v1309_v61 = vmax.f32 %v1017_v35, 0.0 }
 0x15d   :  { %v1308_v53 = vmax.f32 %v666_v8, 0.0  ;;  %v670_v21 = vadd.f32 %v669_v48, %v4813_v30  ;;  %v1023_v4 = vadd.f32 %v1022_v58, %v4815_v31  ;;  %v1310_v62 = vmax.f32 %v1019_v13, 0.0 }
 0x15e   :  { %v1311_v27 = vmax.f32 %v668_v57, 0.0  ;;  %v1313_v55 = vmax.f32 %v1021_v47, 0.0  ;;  %1947 = vmatmul.mubr.bf16.gmra.mrb[164].mxu1 %v5026_v39  ;;  %2236 = vmatmul.mubr.bf16.gmra.mrb[164].mxu0 %v5028_v7 }
 0x15f   :  { %v1312_v5 = vmax.f32 %v670_v21, 0.0  ;;  %v1314_v40 = vmax.f32 %v1023_v4, 0.0  ;;  %1954 = vmatprep.mubr.bf16.mxu1 %v5050_v46  ;;  %2243 = vmatprep.mubr.bf16.mxu0 %v5052_v51 }
 0x160   :  { %v5126_v41 = vpack.c.bf16 %v1311_v27, %v1307_v52  ;;  %v5128_v6 = vpack.c.bf16 %v1313_v55, %v1309_v61 }
 0x161   :  { %v5130_v38 = vpack.c.bf16 %v1312_v5, %v1308_v53  ;;  %v5132_v14 = vpack.c.bf16 %v1314_v40, %v1310_v62  ;;  %v673_v15 = vpop.f32.mrb[60].mxu0  ;;  %v1026_v9 = vpop.f32.mrb[60].mxu1 }
 0x162   :  { %v674_v39 = vadd.f32 %v673_v15, %v4809_v28  ;;  %v1027_v7 = vadd.f32 %v1026_v9, %v4811_v29  ;;  %v675_v10 = vpop.f32.mrb[61].mxu0  ;;  %v1028_v16 = vpop.f32.mrb[61].mxu1 }
 0x163   :  { %v676_v46 = vadd.f32 %v675_v10, %v4813_v30  ;;  %v1029_v51 = vadd.f32 %v1028_v16, %v4815_v31  ;;  %v677_v17 = vpop.f32.mrb[62].mxu0  ;;  %v1030_v49 = vpop.f32.mrb[62].mxu1 }
 0x164   :  { %v1315_v32 = vmax.f32 %v674_v39, 0.0  ;;  %v678_v24 = vadd.f32 %v677_v17, %v4809_v28  ;;  %v1031_v60 = vadd.f32 %v1030_v49, %v4811_v29  ;;  %v679_v19 = vpop.f32.mrb[63].mxu0  ;;  %v1032_v25 = vpop.f32.mrb[63].mxu1  ;;  %v1317_v36 = vmax.f32 %v1027_v7, 0.0 }
 0x165   :  { %v1316_v33 = vmax.f32 %v676_v46, 0.0  ;;  %v680_v56 = vadd.f32 %v679_v19, %v4813_v30  ;;  %v1033_v43 = vadd.f32 %v1032_v25, %v4815_v31  ;;  %v1318_v37 = vmax.f32 %v1029_v51, 0.0 }
 0x166   :  { %v1319_v0 = vmax.f32 %v678_v24, 0.0  ;;  %v1321_v35 = vmax.f32 %v1031_v60, 0.0  ;;  %1955 = vmatmul.mubr.bf16.gmra.mrb[168].mxu1 %v5046_v12  ;;  %2244 = vmatmul.mubr.bf16.gmra.mrb[168].mxu0 %v5048_v2 }
 0x167   :  { %v1320_v44 = vmax.f32 %v680_v56, 0.0  ;;  %v1322_v8 = vmax.f32 %v1033_v43, 0.0  ;;  %1962 = vmatprep.mubr.bf16.mxu1 %v5070_v59  ;;  %2251 = vmatprep.mubr.bf16.mxu0 %v5072_v23 }
 0x168   :  { %v5146_v13 = vpack.c.bf16 %v1319_v0, %v1315_v32  ;;  %v5148_v45 = vpack.c.bf16 %v1321_v35, %v1317_v36 }
 0x169   :  { %v5150_v11 = vpack.c.bf16 %v1320_v44, %v1316_v33  ;;  %v5152_v52 = vpack.c.bf16 %v1322_v8, %v1318_v37  ;;  %v683_v57 = vpop.f32.mrb[64].mxu0  ;;  %v1036_v47 = vpop.f32.mrb[64].mxu1 }
 0x16a   :  { %v684_v12 = vadd.f32 %v683_v57, %v4809_v28  ;;  %v1037_v2 = vadd.f32 %v1036_v47, %v4811_v29  ;;  %v685_v48 = vpop.f32.mrb[65].mxu0  ;;  %v1038_v58 = vpop.f32.mrb[65].mxu1 }
 0x16b   :  { %v686_v59 = vadd.f32 %v685_v48, %v4813_v30  ;;  %v1039_v23 = vadd.f32 %v1038_v58, %v4815_v31  ;;  %v687_v53 = vpop.f32.mrb[66].mxu0  ;;  %v1040_v21 = vpop.f32.mrb[66].mxu1 }
 0x16c   :  { %v1323_v4 = vmax.f32 %v684_v12, 0.0  ;;  %v688_v61 = vadd.f32 %v687_v53, %v4809_v28  ;;  %v1041_v27 = vadd.f32 %v1040_v21, %v4811_v29  ;;  %v689_v55 = vpop.f32.mrb[67].mxu0  ;;  %v1042_v62 = vpop.f32.mrb[67].mxu1  ;;  %v1325_v9 = vmax.f32 %v1037_v2, 0.0 }
 0x16d   :  { %v1324_v5 = vmax.f32 %v686_v59, 0.0  ;;  %v690_v40 = vadd.f32 %v689_v55, %v4813_v30  ;;  %v1043_v15 = vadd.f32 %v1042_v62, %v4815_v31  ;;  %v1326_v10 = vmax.f32 %v1039_v23, 0.0 }
 0x16e   :  { %v1327_v39 = vmax.f32 %v688_v61, 0.0  ;;  %v1329_v7 = vmax.f32 %v1041_v27, 0.0  ;;  %1963 = vmatmul.mubr.bf16.gmra.mrb[172].mxu1 %v5066_v50  ;;  %2252 = vmatmul.mubr.bf16.gmra.mrb[172].mxu0 %v5068_v18 }
 0x16f   :  { %v1328_v16 = vmax.f32 %v690_v40, 0.0  ;;  %v1330_v46 = vmax.f32 %v1043_v15, 0.0  ;;  %1970 = vmatprep.mubr.bf16.mxu1 %v5090_v26  ;;  %2259 = vmatprep.mubr.bf16.mxu0 %v5092_v3 }
 0x170   :  { %v5166_v51 = vpack.c.bf16 %v1327_v39, %v1323_v4  ;;  %v5168_v17 = vpack.c.bf16 %v1329_v7, %v1325_v9 }
 0x171   :  { %v5170_v49 = vpack.c.bf16 %v1328_v16, %v1324_v5  ;;  %v5172_v32 = vpack.c.bf16 %v1330_v46, %v1326_v10  ;;  %v693_v24 = vpop.f32.mrb[68].mxu0  ;;  %v1046_v60 = vpop.f32.mrb[68].mxu1 }
 0x172   :  { %v694_v50 = vadd.f32 %v693_v24, %v4809_v28  ;;  %v1047_v18 = vadd.f32 %v1046_v60, %v4811_v29  ;;  %v695_v19 = vpop.f32.mrb[69].mxu0  ;;  %v1048_v25 = vpop.f32.mrb[69].mxu1 }
 0x173   :  { %v696_v26 = vadd.f32 %v695_v19, %v4813_v30  ;;  %v1049_v3 = vadd.f32 %v1048_v25, %v4815_v31  ;;  %v697_v33 = vpop.f32.mrb[70].mxu0  ;;  %v1050_v56 = vpop.f32.mrb[70].mxu1 }
 0x174   :  { %v1331_v43 = vmax.f32 %v694_v50, 0.0  ;;  %v698_v36 = vadd.f32 %v697_v33, %v4809_v28  ;;  %v1051_v0 = vadd.f32 %v1050_v56, %v4811_v29  ;;  %v699_v35 = vpop.f32.mrb[71].mxu0  ;;  %v1052_v37 = vpop.f32.mrb[71].mxu1  ;;  %v1333_v47 = vmax.f32 %v1047_v18, 0.0 }
 0x175   :  { %v1332_v44 = vmax.f32 %v696_v26, 0.0  ;;  %v700_v8 = vadd.f32 %v699_v35, %v4813_v30  ;;  %v1053_v57 = vadd.f32 %v1052_v37, %v4815_v31  ;;  %v1334_v48 = vmax.f32 %v1049_v3, 0.0 }
 0x176   :  { %v1335_v12 = vmax.f32 %v698_v36, 0.0  ;;  %v1337_v2 = vmax.f32 %v1051_v0, 0.0  ;;  %1971 = vmatmul.mubr.bf16.gmra.mrb[176].mxu1 %v5086_v22  ;;  %2260 = vmatmul.mubr.bf16.gmra.mrb[176].mxu0 %v5088_v54 }
 0x177   :  { %v1336_v58 = vmax.f32 %v700_v8, 0.0  ;;  %v1338_v59 = vmax.f32 %v1053_v57, 0.0  ;;  %1978 = vmatprep.mubr.bf16.mxu1 %v5110_v63  ;;  %2267 = vmatprep.mubr.bf16.mxu0 %v5112_v42 }
 0x178   :  { %v5186_v23 = vpack.c.bf16 %v1335_v12, %v1331_v43  ;;  %v5188_v53 = vpack.c.bf16 %v1337_v2, %v1333_v47 }
 0x179   :  { %v5190_v21 = vpack.c.bf16 %v1336_v58, %v1332_v44  ;;  %v5192_v4 = vpack.c.bf16 %v1338_v59, %v1334_v48  ;;  %v703_v61 = vpop.f32.mrb[72].mxu0  ;;  %v1056_v27 = vpop.f32.mrb[72].mxu1 }
 0x17a   :  { %v704_v22 = vadd.f32 %v703_v61, %v4809_v28  ;;  %v1057_v54 = vadd.f32 %v1056_v27, %v4811_v29  ;;  %v705_v55 = vpop.f32.mrb[73].mxu0  ;;  %v1058_v62 = vpop.f32.mrb[73].mxu1 }
 0x17b   :  { %v706_v63 = vadd.f32 %v705_v55, %v4813_v30  ;;  %v1059_v42 = vadd.f32 %v1058_v62, %v4815_v31  ;;  %v707_v5 = vpop.f32.mrb[74].mxu0  ;;  %v1060_v40 = vpop.f32.mrb[74].mxu1 }
 0x17c   :  { %v1339_v15 = vmax.f32 %v704_v22, 0.0  ;;  %v708_v9 = vadd.f32 %v707_v5, %v4809_v28  ;;  %v1061_v39 = vadd.f32 %v1060_v40, %v4811_v29  ;;  %v709_v7 = vpop.f32.mrb[75].mxu0  ;;  %v1062_v10 = vpop.f32.mrb[75].mxu1  ;;  %v1341_v60 = vmax.f32 %v1057_v54, 0.0 }
 0x17d   :  { %v1340_v16 = vmax.f32 %v706_v63, 0.0  ;;  %v710_v46 = vadd.f32 %v709_v7, %v4813_v30  ;;  %v1063_v24 = vadd.f32 %v1062_v10, %v4815_v31  ;;  %v1342_v19 = vmax.f32 %v1059_v42, 0.0 }
 0x17e   :  { %v1343_v50 = vmax.f32 %v708_v9, 0.0  ;;  %v1345_v18 = vmax.f32 %v1061_v39, 0.0  ;;  %1979 = vmatmul.mubr.bf16.gmra.mrb[180].mxu1 %v5106_v1  ;;  %2268 = vmatmul.mubr.bf16.gmra.mrb[180].mxu0 %v5108_v34 }
 0x17f   :  { %v1344_v25 = vmax.f32 %v710_v46, 0.0  ;;  %v1346_v26 = vmax.f32 %v1063_v24, 0.0  ;;  %1986 = vmatprep.mubr.bf16.mxu1 %v5130_v38  ;;  %2275 = vmatprep.mubr.bf16.mxu0 %v5132_v14 }
 0x180   :  { %v5206_v3 = vpack.c.bf16 %v1343_v50, %v1339_v15  ;;  %v5208_v33 = vpack.c.bf16 %v1345_v18, %v1341_v60 }
 0x181   :  { %v5210_v56 = vpack.c.bf16 %v1344_v25, %v1340_v16  ;;  %v5212_v43 = vpack.c.bf16 %v1346_v26, %v1342_v19  ;;  %v713_v36 = vpop.f32.mrb[76].mxu0  ;;  %v1066_v0 = vpop.f32.mrb[76].mxu1 }
 0x182   :  { %v714_v1 = vadd.f32 %v713_v36, %v4809_v28  ;;  %v1067_v34 = vadd.f32 %v1066_v0, %v4811_v29  ;;  %v715_v35 = vpop.f32.mrb[77].mxu0  ;;  %v1068_v37 = vpop.f32.mrb[77].mxu1 }
 0x183   :  { %v716_v38 = vadd.f32 %v715_v35, %v4813_v30  ;;  %v1069_v14 = vadd.f32 %v1068_v37, %v4815_v31  ;;  %v717_v44 = vpop.f32.mrb[78].mxu0  ;;  %v1070_v8 = vpop.f32.mrb[78].mxu1 }
 0x184   :  { %v1347_v57 = vmax.f32 %v714_v1, 0.0  ;;  %v718_v47 = vadd.f32 %v717_v44, %v4809_v28  ;;  %v1071_v12 = vadd.f32 %v1070_v8, %v4811_v29  ;;  %v719_v2 = vpop.f32.mrb[79].mxu0  ;;  %v1072_v48 = vpop.f32.mrb[79].mxu1  ;;  %v1349_v27 = vmax.f32 %v1067_v34, 0.0 }
 0x185   :  { %v1348_v58 = vmax.f32 %v716_v38, 0.0  ;;  %v720_v59 = vadd.f32 %v719_v2, %v4813_v30  ;;  %v1073_v61 = vadd.f32 %v1072_v48, %v4815_v31  ;;  %v1350_v55 = vmax.f32 %v1069_v14, 0.0 }
 0x186   :  { %v1351_v22 = vmax.f32 %v718_v47, 0.0  ;;  %v1353_v54 = vmax.f32 %v1071_v12, 0.0  ;;  %1987 = vmatmul.mubr.bf16.gmra.mrb[184].mxu1 %v5126_v41  ;;  %2276 = vmatmul.mubr.bf16.gmra.mrb[184].mxu0 %v5128_v6 }
 0x187   :  { %v1352_v62 = vmax.f32 %v720_v59, 0.0  ;;  %v1354_v63 = vmax.f32 %v1073_v61, 0.0  ;;  %1994 = vmatprep.mubr.bf16.mxu1 %v5150_v11  ;;  %2283 = vmatprep.mubr.bf16.mxu0 %v5152_v52 }
 0x188   :  { %v5226_v42 = vpack.c.bf16 %v1351_v22, %v1347_v57  ;;  %v5228_v5 = vpack.c.bf16 %v1353_v54, %v1349_v27 }
 0x189   :  { %v5230_v40 = vpack.c.bf16 %v1352_v62, %v1348_v58  ;;  %v5232_v15 = vpack.c.bf16 %v1354_v63, %v1350_v55  ;;  %v723_v9 = vpop.f32.mrb[80].mxu0  ;;  %v1076_v39 = vpop.f32.mrb[80].mxu1 }
 0x18a   :  { %v724_v41 = vadd.f32 %v723_v9, %v4809_v28  ;;  %v1077_v6 = vadd.f32 %v1076_v39, %v4811_v29  ;;  %v725_v7 = vpop.f32.mrb[81].mxu0  ;;  %v1078_v10 = vpop.f32.mrb[81].mxu1 }
 0x18b   :  { %v726_v11 = vadd.f32 %v725_v7, %v4813_v30  ;;  %v1079_v52 = vadd.f32 %v1078_v10, %v4815_v31  ;;  %v727_v16 = vpop.f32.mrb[82].mxu0  ;;  %v1080_v46 = vpop.f32.mrb[82].mxu1 }
 0x18c   :  { %v1355_v24 = vmax.f32 %v724_v41, 0.0  ;;  %v728_v60 = vadd.f32 %v727_v16, %v4809_v28  ;;  %v1081_v50 = vadd.f32 %v1080_v46, %v4811_v29  ;;  %v729_v18 = vpop.f32.mrb[83].mxu0  ;;  %v1082_v19 = vpop.f32.mrb[83].mxu1  ;;  %v1357_v0 = vmax.f32 %v1077_v6, 0.0 }
 0x18d   :  { %v1356_v25 = vmax.f32 %v726_v11, 0.0  ;;  %v730_v26 = vadd.f32 %v729_v18, %v4813_v30  ;;  %v1083_v36 = vadd.f32 %v1082_v19, %v4815_v31  ;;  %v1358_v35 = vmax.f32 %v1079_v52, 0.0 }
 0x18e   :  { %v1359_v1 = vmax.f32 %v728_v60, 0.0  ;;  %v1361_v34 = vmax.f32 %v1081_v50, 0.0  ;;  %1995 = vmatmul.mubr.bf16.gmra.mrb[188].mxu1 %v5146_v13  ;;  %2284 = vmatmul.mubr.bf16.gmra.mrb[188].mxu0 %v5148_v45 }
 0x18f   :  { %v1360_v37 = vmax.f32 %v730_v26, 0.0  ;;  %v1362_v38 = vmax.f32 %v1083_v36, 0.0  ;;  %2002 = vmatprep.mubr.bf16.mxu1 %v5170_v49  ;;  %2291 = vmatprep.mubr.bf16.mxu0 %v5172_v32 }
 0x190   :  { %v5246_v14 = vpack.c.bf16 %v1359_v1, %v1355_v24  ;;  %v5248_v44 = vpack.c.bf16 %v1361_v34, %v1357_v0 }
 0x191   :  { %v5250_v8 = vpack.c.bf16 %v1360_v37, %v1356_v25  ;;  %v5252_v57 = vpack.c.bf16 %v1362_v38, %v1358_v35  ;;  %v733_v47 = vpop.f32.mrb[84].mxu0  ;;  %v1086_v12 = vpop.f32.mrb[84].mxu1 }
 0x192   :  { %v734_v13 = vadd.f32 %v733_v47, %v4809_v28  ;;  %v1087_v45 = vadd.f32 %v1086_v12, %v4811_v29  ;;  %v735_v2 = vpop.f32.mrb[85].mxu0  ;;  %v1088_v48 = vpop.f32.mrb[85].mxu1 }
 0x193   :  { %v736_v49 = vadd.f32 %v735_v2, %v4813_v30  ;;  %v1089_v32 = vadd.f32 %v1088_v48, %v4815_v31  ;;  %v737_v58 = vpop.f32.mrb[86].mxu0  ;;  %v1090_v59 = vpop.f32.mrb[86].mxu1 }
 0x194   :  { %v1363_v61 = vmax.f32 %v734_v13, 0.0  ;;  %v738_v27 = vadd.f32 %v737_v58, %v4809_v28  ;;  %v1091_v22 = vadd.f32 %v1090_v59, %v4811_v29  ;;  %v739_v54 = vpop.f32.mrb[87].mxu0  ;;  %v1092_v55 = vpop.f32.mrb[87].mxu1  ;;  %v1365_v39 = vmax.f32 %v1087_v45, 0.0 }
 0x195   :  { %v1364_v62 = vmax.f32 %v736_v49, 0.0  ;;  %v740_v63 = vadd.f32 %v739_v54, %v4813_v30  ;;  %v1093_v9 = vadd.f32 %v1092_v55, %v4815_v31  ;;  %v1366_v7 = vmax.f32 %v1089_v32, 0.0 }
 0x196   :  { %v1367_v41 = vmax.f32 %v738_v27, 0.0  ;;  %v1369_v6 = vmax.f32 %v1091_v22, 0.0  ;;  %2003 = vmatmul.mubr.bf16.gmra.mrb[192].mxu1 %v5166_v51  ;;  %2292 = vmatmul.mubr.bf16.gmra.mrb[192].mxu0 %v5168_v17 }
 0x197   :  { %v1368_v10 = vmax.f32 %v740_v63, 0.0  ;;  %v1370_v11 = vmax.f32 %v1093_v9, 0.0  ;;  %2010 = vmatprep.mubr.bf16.mxu1 %v5190_v21  ;;  %2299 = vmatprep.mubr.bf16.mxu0 %v5192_v4 }
 0x198   :  { %v5266_v52 = vpack.c.bf16 %v1367_v41, %v1363_v61  ;;  %v5268_v16 = vpack.c.bf16 %v1369_v6, %v1365_v39 }
 0x199   :  { %v5270_v46 = vpack.c.bf16 %v1368_v10, %v1364_v62  ;;  %v5272_v24 = vpack.c.bf16 %v1370_v11, %v1366_v7  ;;  %v743_v60 = vpop.f32.mrb[88].mxu0  ;;  %v1096_v50 = vpop.f32.mrb[88].mxu1 }
 0x19a   :  { %v744_v51 = vadd.f32 %v743_v60, %v4809_v28  ;;  %v1097_v17 = vadd.f32 %v1096_v50, %v4811_v29  ;;  %v745_v18 = vpop.f32.mrb[89].mxu0  ;;  %v1098_v19 = vpop.f32.mrb[89].mxu1 }
 0x19b   :  { %v746_v21 = vadd.f32 %v745_v18, %v4813_v30  ;;  %v1099_v4 = vadd.f32 %v1098_v19, %v4815_v31  ;;  %v747_v25 = vpop.f32.mrb[90].mxu0  ;;  %v1100_v26 = vpop.f32.mrb[90].mxu1 }
 0x19c   :  { %v1371_v36 = vmax.f32 %v744_v51, 0.0  ;;  %v748_v0 = vadd.f32 %v747_v25, %v4809_v28  ;;  %v1101_v1 = vadd.f32 %v1100_v26, %v4811_v29  ;;  %v749_v34 = vpop.f32.mrb[91].mxu0  ;;  %v1102_v35 = vpop.f32.mrb[91].mxu1  ;;  %v1373_v12 = vmax.f32 %v1097_v17, 0.0 }
 0x19d   :  { %v1372_v37 = vmax.f32 %v746_v21, 0.0  ;;  %v750_v38 = vadd.f32 %v749_v34, %v4813_v30  ;;  %v1103_v47 = vadd.f32 %v1102_v35, %v4815_v31  ;;  %v1374_v2 = vmax.f32 %v1099_v4, 0.0 }
 0x19e   :  { %v1375_v13 = vmax.f32 %v748_v0, 0.0  ;;  %v1377_v45 = vmax.f32 %v1101_v1, 0.0  ;;  %2011 = vmatmul.mubr.bf16.gmra.mrb[196].mxu1 %v5186_v23  ;;  %2300 = vmatmul.mubr.bf16.gmra.mrb[196].mxu0 %v5188_v53 }
 0x19f   :  { %v1376_v48 = vmax.f32 %v750_v38, 0.0  ;;  %v1378_v49 = vmax.f32 %v1103_v47, 0.0  ;;  %2018 = vmatprep.mubr.bf16.mxu1 %v5210_v56  ;;  %2307 = vmatprep.mubr.bf16.mxu0 %v5212_v43 }
 0x1a0   :  { %v5286_v32 = vpack.c.bf16 %v1375_v13, %v1371_v36  ;;  %v5288_v58 = vpack.c.bf16 %v1377_v45, %v1373_v12 }
 0x1a1   :  { %v5290_v59 = vpack.c.bf16 %v1376_v48, %v1372_v37  ;;  %v5292_v61 = vpack.c.bf16 %v1378_v49, %v1374_v2  ;;  %v753_v27 = vpop.f32.mrb[92].mxu0  ;;  %v1106_v22 = vpop.f32.mrb[92].mxu1 }
 0x1a2   :  { %v754_v23 = vadd.f32 %v753_v27, %v4809_v28  ;;  %v1107_v53 = vadd.f32 %v1106_v22, %v4811_v29  ;;  %v755_v54 = vpop.f32.mrb[93].mxu0  ;;  %v1108_v55 = vpop.f32.mrb[93].mxu1 }
 0x1a3   :  { %v756_v56 = vadd.f32 %v755_v54, %v4813_v30  ;;  %v1109_v43 = vadd.f32 %v1108_v55, %v4815_v31  ;;  %v757_v62 = vpop.f32.mrb[94].mxu0  ;;  %v1110_v63 = vpop.f32.mrb[94].mxu1 }
 0x1a4   :  { %v1379_v9 = vmax.f32 %v754_v23, 0.0  ;;  %v758_v39 = vadd.f32 %v757_v62, %v4809_v28  ;;  %v1111_v41 = vadd.f32 %v1110_v63, %v4811_v29  ;;  %v759_v6 = vpop.f32.mrb[95].mxu0  ;;  %v1112_v7 = vpop.f32.mrb[95].mxu1  ;;  %v1381_v50 = vmax.f32 %v1107_v53, 0.0 }
 0x1a5   :  { %v1380_v10 = vmax.f32 %v756_v56, 0.0  ;;  %v760_v11 = vadd.f32 %v759_v6, %v4813_v30  ;;  %v1113_v60 = vadd.f32 %v1112_v7, %v4815_v31  ;;  %v1382_v18 = vmax.f32 %v1109_v43, 0.0 }
 0x1a6   :  { %v1383_v51 = vmax.f32 %v758_v39, 0.0  ;;  %v1385_v17 = vmax.f32 %v1111_v41, 0.0  ;;  %2019 = vmatmul.mubr.bf16.gmra.mrb[200].mxu1 %v5206_v3  ;;  %2308 = vmatmul.mubr.bf16.gmra.mrb[200].mxu0 %v5208_v33 }
 0x1a7   :  { %v1384_v19 = vmax.f32 %v760_v11, 0.0  ;;  %v1386_v21 = vmax.f32 %v1113_v60, 0.0  ;;  %2026 = vmatprep.mubr.bf16.mxu1 %v5230_v40  ;;  %2315 = vmatprep.mubr.bf16.mxu0 %v5232_v15 }
 0x1a8   :  { %v5306_v4 = vpack.c.bf16 %v1383_v51, %v1379_v9  ;;  %v5308_v25 = vpack.c.bf16 %v1385_v17, %v1381_v50 }
 0x1a9   :  { %v5310_v26 = vpack.c.bf16 %v1384_v19, %v1380_v10  ;;  %v5312_v36 = vpack.c.bf16 %v1386_v21, %v1382_v18  ;;  %v763_v0 = vpop.f32.mrb[96].mxu0  ;;  %v1116_v1 = vpop.f32.mrb[96].mxu1 }
 0x1aa   :  { %v764_v3 = vadd.f32 %v763_v0, %v4809_v28  ;;  %v1117_v33 = vadd.f32 %v1116_v1, %v4811_v29  ;;  %v765_v34 = vpop.f32.mrb[97].mxu0  ;;  %v1118_v35 = vpop.f32.mrb[97].mxu1 }
 0x1ab   :  { %v766_v40 = vadd.f32 %v765_v34, %v4813_v30  ;;  %v1119_v15 = vadd.f32 %v1118_v35, %v4815_v31  ;;  %v767_v37 = vpop.f32.mrb[98].mxu0  ;;  %v1120_v38 = vpop.f32.mrb[98].mxu1 }
 0x1ac   :  { %v1387_v47 = vmax.f32 %v764_v3, 0.0  ;;  %v768_v12 = vadd.f32 %v767_v37, %v4809_v28  ;;  %v1121_v13 = vadd.f32 %v1120_v38, %v4811_v29  ;;  %v769_v45 = vpop.f32.mrb[99].mxu0  ;;  %v1122_v2 = vpop.f32.mrb[99].mxu1  ;;  %v1389_v22 = vmax.f32 %v1117_v33, 0.0 }
 0x1ad   :  { %v1388_v48 = vmax.f32 %v766_v40, 0.0  ;;  %v770_v49 = vadd.f32 %v769_v45, %v4813_v30  ;;  %v1123_v27 = vadd.f32 %v1122_v2, %v4815_v31  ;;  %v1390_v54 = vmax.f32 %v1119_v15, 0.0 }
 0x1ae   :  { %v1391_v23 = vmax.f32 %v768_v12, 0.0  ;;  %v1393_v53 = vmax.f32 %v1121_v13, 0.0  ;;  %2027 = vmatmul.mubr.bf16.gmra.mrb[204].mxu1 %v5226_v42  ;;  %2316 = vmatmul.mubr.bf16.gmra.mrb[204].mxu0 %v5228_v5 }
 0x1af   :  { %v1392_v55 = vmax.f32 %v770_v49, 0.0  ;;  %v1394_v56 = vmax.f32 %v1123_v27, 0.0  ;;  %2034 = vmatprep.mubr.bf16.mxu1 %v5250_v8  ;;  %2323 = vmatprep.mubr.bf16.mxu0 %v5252_v57 }
 0x1b0   :  { %v5326_v43 = vpack.c.bf16 %v1391_v23, %v1387_v47  ;;  %v5328_v62 = vpack.c.bf16 %v1393_v53, %v1389_v22 }
 0x1b1   :  { %v5330_v63 = vpack.c.bf16 %v1392_v55, %v1388_v48  ;;  %v5332_v9 = vpack.c.bf16 %v1394_v56, %v1390_v54  ;;  %v773_v39 = vpop.f32.mrb[100].mxu0  ;;  %v1126_v41 = vpop.f32.mrb[100].mxu1 }
 0x1b2   :  { %v774_v42 = vadd.f32 %v773_v39, %v4809_v28  ;;  %v1127_v5 = vadd.f32 %v1126_v41, %v4811_v29  ;;  %v775_v6 = vpop.f32.mrb[101].mxu0  ;;  %v1128_v7 = vpop.f32.mrb[101].mxu1 }
 0x1b3   :  { %v776_v8 = vadd.f32 %v775_v6, %v4813_v30  ;;  %v1129_v57 = vadd.f32 %v1128_v7, %v4815_v31  ;;  %v777_v10 = vpop.f32.mrb[102].mxu0  ;;  %v1130_v11 = vpop.f32.mrb[102].mxu1 }
 0x1b4   :  { %v1395_v60 = vmax.f32 %v774_v42, 0.0  ;;  %v778_v50 = vadd.f32 %v777_v10, %v4809_v28  ;;  %v1131_v51 = vadd.f32 %v1130_v11, %v4811_v29  ;;  %v779_v17 = vpop.f32.mrb[103].mxu0  ;;  %v1132_v18 = vpop.f32.mrb[103].mxu1  ;;  %v1397_v1 = vmax.f32 %v1127_v5, 0.0 }
 0x1b5   :  { %v1396_v19 = vmax.f32 %v776_v8, 0.0  ;;  %v780_v21 = vadd.f32 %v779_v17, %v4813_v30  ;;  %v1133_v0 = vadd.f32 %v1132_v18, %v4815_v31  ;;  %v1398_v34 = vmax.f32 %v1129_v57, 0.0 }
 0x1b6   :  { %v1399_v3 = vmax.f32 %v778_v50, 0.0  ;;  %v1401_v33 = vmax.f32 %v1131_v51, 0.0  ;;  %2035 = vmatmul.mubr.bf16.gmra.mrb[208].mxu1 %v5246_v14  ;;  %2324 = vmatmul.mubr.bf16.gmra.mrb[208].mxu0 %v5248_v44 }
 0x1b7   :  { %v1400_v35 = vmax.f32 %v780_v21, 0.0  ;;  %v1402_v40 = vmax.f32 %v1133_v0, 0.0  ;;  %2042 = vmatprep.mubr.bf16.mxu1 %v5270_v46  ;;  %2331 = vmatprep.mubr.bf16.mxu0 %v5272_v24 }
 0x1b8   :  { %v5346_v15 = vpack.c.bf16 %v1399_v3, %v1395_v60  ;;  %v5348_v37 = vpack.c.bf16 %v1401_v33, %v1397_v1 }
 0x1b9   :  { %v5350_v38 = vpack.c.bf16 %v1400_v35, %v1396_v19  ;;  %v5352_v47 = vpack.c.bf16 %v1402_v40, %v1398_v34  ;;  %v783_v12 = vpop.f32.mrb[104].mxu0  ;;  %v1136_v13 = vpop.f32.mrb[104].mxu1 }
 0x1ba   :  { %v784_v14 = vadd.f32 %v783_v12, %v4809_v28  ;;  %v1137_v44 = vadd.f32 %v1136_v13, %v4811_v29  ;;  %v785_v45 = vpop.f32.mrb[105].mxu0  ;;  %v1138_v2 = vpop.f32.mrb[105].mxu1 }
 0x1bb   :  { %v786_v46 = vadd.f32 %v785_v45, %v4813_v30  ;;  %v1139_v24 = vadd.f32 %v1138_v2, %v4815_v31  ;;  %v787_v48 = vpop.f32.mrb[106].mxu0  ;;  %v1140_v49 = vpop.f32.mrb[106].mxu1 }
 0x1bc   :  { %v1403_v27 = vmax.f32 %v784_v14, 0.0  ;;  %v788_v22 = vadd.f32 %v787_v48, %v4809_v28  ;;  %v1141_v23 = vadd.f32 %v1140_v49, %v4811_v29  ;;  %v789_v53 = vpop.f32.mrb[107].mxu0  ;;  %v1142_v54 = vpop.f32.mrb[107].mxu1  ;;  %v1405_v41 = vmax.f32 %v1137_v44, 0.0 }
 0x1bd   :  { %v1404_v55 = vmax.f32 %v786_v46, 0.0  ;;  %v790_v56 = vadd.f32 %v789_v53, %v4813_v30  ;;  %v1143_v39 = vadd.f32 %v1142_v54, %v4815_v31  ;;  %v1406_v6 = vmax.f32 %v1139_v24, 0.0 }
 0x1be   :  { %v1407_v42 = vmax.f32 %v788_v22, 0.0  ;;  %v1409_v5 = vmax.f32 %v1141_v23, 0.0  ;;  %2043 = vmatmul.mubr.bf16.gmra.mrb[212].mxu1 %v5266_v52  ;;  %2332 = vmatmul.mubr.bf16.gmra.mrb[212].mxu0 %v5268_v16 }
 0x1bf   :  { %v1408_v7 = vmax.f32 %v790_v56, 0.0  ;;  %v1410_v8 = vmax.f32 %v1143_v39, 0.0  ;;  %2050 = vmatprep.mubr.bf16.mxu1 %v5290_v59  ;;  %2339 = vmatprep.mubr.bf16.mxu0 %v5292_v61 }
 0x1c0   :  { %v5366_v57 = vpack.c.bf16 %v1407_v42, %v1403_v27  ;;  %v5368_v10 = vpack.c.bf16 %v1409_v5, %v1405_v41 }
 0x1c1   :  { %v5370_v11 = vpack.c.bf16 %v1408_v7, %v1404_v55  ;;  %v5372_v60 = vpack.c.bf16 %v1410_v8, %v1406_v6  ;;  %v793_v50 = vpop.f32.mrb[108].mxu0  ;;  %v1146_v51 = vpop.f32.mrb[108].mxu1 }
 0x1c2   :  { %v794_v52 = vadd.f32 %v793_v50, %v4809_v28  ;;  %v1147_v16 = vadd.f32 %v1146_v51, %v4811_v29  ;;  %v795_v17 = vpop.f32.mrb[109].mxu0  ;;  %v1148_v18 = vpop.f32.mrb[109].mxu1 }
 0x1c3   :  { %v796_v59 = vadd.f32 %v795_v17, %v4813_v30  ;;  %v1149_v61 = vadd.f32 %v1148_v18, %v4815_v31  ;;  %v797_v19 = vpop.f32.mrb[110].mxu0  ;;  %v1150_v21 = vpop.f32.mrb[110].mxu1 }
 0x1c4   :  { %v1411_v0 = vmax.f32 %v794_v52, 0.0  ;;  %v798_v1 = vadd.f32 %v797_v19, %v4809_v28  ;;  %v1151_v3 = vadd.f32 %v1150_v21, %v4811_v29  ;;  %v799_v33 = vpop.f32.mrb[111].mxu0  ;;  %v1152_v34 = vpop.f32.mrb[111].mxu1  ;;  %v1413_v13 = vmax.f32 %v1147_v16, 0.0 }
 0x1c5   :  { %v1412_v35 = vmax.f32 %v796_v59, 0.0  ;;  %v800_v40 = vadd.f32 %v799_v33, %v4813_v30  ;;  %v1153_v12 = vadd.f32 %v1152_v34, %v4815_v31  ;;  %v1414_v45 = vmax.f32 %v1149_v61, 0.0 }
 0x1c6   :  { %v1415_v14 = vmax.f32 %v798_v1, 0.0  ;;  %v1417_v44 = vmax.f32 %v1151_v3, 0.0  ;;  %2051 = vmatmul.mubr.bf16.gmra.mrb[216].mxu1 %v5286_v32  ;;  %2340 = vmatmul.mubr.bf16.gmra.mrb[216].mxu0 %v5288_v58 }
 0x1c7   :  { %v1416_v2 = vmax.f32 %v800_v40, 0.0  ;;  %v1418_v46 = vmax.f32 %v1153_v12, 0.0  ;;  %2058 = vmatprep.mubr.bf16.mxu1 %v5310_v26  ;;  %2347 = vmatprep.mubr.bf16.mxu0 %v5312_v36 }
 0x1c8   :  { %v5386_v24 = vpack.c.bf16 %v1415_v14, %v1411_v0  ;;  %v5388_v48 = vpack.c.bf16 %v1417_v44, %v1413_v13 }
 0x1c9   :  { %v5390_v49 = vpack.c.bf16 %v1416_v2, %v1412_v35  ;;  %v5392_v27 = vpack.c.bf16 %v1418_v46, %v1414_v45  ;;  %v803_v22 = vpop.f32.mrb[112].mxu0  ;;  %v1156_v23 = vpop.f32.mrb[112].mxu1 }
 0x1ca   :  { %v804_v32 = vadd.f32 %v803_v22, %v4809_v28  ;;  %v1157_v58 = vadd.f32 %v1156_v23, %v4811_v29  ;;  %v805_v53 = vpop.f32.mrb[113].mxu0  ;;  %v1158_v54 = vpop.f32.mrb[113].mxu1 }
 0x1cb   :  { %v806_v26 = vadd.f32 %v805_v53, %v4813_v30  ;;  %v1159_v36 = vadd.f32 %v1158_v54, %v4815_v31  ;;  %v807_v55 = vpop.f32.mrb[114].mxu0  ;;  %v1160_v56 = vpop.f32.mrb[114].mxu1 }
 0x1cc   :  { %v1419_v39 = vmax.f32 %v804_v32, 0.0  ;;  %v808_v41 = vadd.f32 %v807_v55, %v4809_v28  ;;  %v1161_v42 = vadd.f32 %v1160_v56, %v4811_v29  ;;  %v809_v5 = vpop.f32.mrb[115].mxu0  ;;  %v1162_v6 = vpop.f32.mrb[115].mxu1  ;;  %v1421_v51 = vmax.f32 %v1157_v58, 0.0 }
 0x1cd   :  { %v1420_v7 = vmax.f32 %v806_v26, 0.0  ;;  %v810_v8 = vadd.f32 %v809_v5, %v4813_v30  ;;  %v1163_v50 = vadd.f32 %v1162_v6, %v4815_v31  ;;  %v1422_v17 = vmax.f32 %v1159_v36, 0.0 }
 0x1ce   :  { %v1423_v52 = vmax.f32 %v808_v41, 0.0  ;;  %v1425_v16 = vmax.f32 %v1161_v42, 0.0  ;;  %2059 = vmatmul.mubr.bf16.gmra.mrb[220].mxu1 %v5306_v4  ;;  %2348 = vmatmul.mubr.bf16.gmra.mrb[220].mxu0 %v5308_v25 }
 0x1cf   :  { %v1424_v18 = vmax.f32 %v810_v8, 0.0  ;;  %v1426_v59 = vmax.f32 %v1163_v50, 0.0  ;;  %2066 = vmatprep.mubr.bf16.mxu1 %v5330_v63  ;;  %2355 = vmatprep.mubr.bf16.mxu0 %v5332_v9 }
 0x1d0   :  { %v5406_v61 = vpack.c.bf16 %v1423_v52, %v1419_v39  ;;  %v5408_v19 = vpack.c.bf16 %v1425_v16, %v1421_v51 }
 0x1d1   :  { %v5410_v21 = vpack.c.bf16 %v1424_v18, %v1420_v7  ;;  %v5412_v0 = vpack.c.bf16 %v1426_v59, %v1422_v17  ;;  %v813_v1 = vpop.f32.mrb[116].mxu0  ;;  %v1166_v3 = vpop.f32.mrb[116].mxu1 }
 0x1d2   :  { %v814_v4 = vadd.f32 %v813_v1, %v4809_v28  ;;  %v1167_v25 = vadd.f32 %v1166_v3, %v4811_v29  ;;  %v815_v33 = vpop.f32.mrb[117].mxu0  ;;  %v1168_v34 = vpop.f32.mrb[117].mxu1 }
 0x1d3   :  { %v816_v63 = vadd.f32 %v815_v33, %v4813_v30  ;;  %v1169_v9 = vadd.f32 %v1168_v34, %v4815_v31  ;;  %v817_v35 = vpop.f32.mrb[118].mxu0  ;;  %v1170_v40 = vpop.f32.mrb[118].mxu1 }
 0x1d4   :  { %v1427_v12 = vmax.f32 %v814_v4, 0.0  ;;  %v818_v13 = vadd.f32 %v817_v35, %v4809_v28  ;;  %v1171_v14 = vadd.f32 %v1170_v40, %v4811_v29  ;;  %v819_v44 = vpop.f32.mrb[119].mxu0  ;;  %v1172_v45 = vpop.f32.mrb[119].mxu1  ;;  %v1429_v23 = vmax.f32 %v1167_v25, 0.0 }
 0x1d5   :  { %v1428_v2 = vmax.f32 %v816_v63, 0.0  ;;  %v820_v46 = vadd.f32 %v819_v44, %v4813_v30  ;;  %v1173_v22 = vadd.f32 %v1172_v45, %v4815_v31  ;;  %v1430_v53 = vmax.f32 %v1169_v9, 0.0 }
 0x1d6   :  { %v1431_v32 = vmax.f32 %v818_v13, 0.0  ;;  %v1433_v58 = vmax.f32 %v1171_v14, 0.0  ;;  %2067 = vmatmul.mubr.bf16.gmra.mrb[224].mxu1 %v5326_v43  ;;  %2356 = vmatmul.mubr.bf16.gmra.mrb[224].mxu0 %v5328_v62 }
 0x1d7   :  { %v1432_v54 = vmax.f32 %v820_v46, 0.0  ;;  %v1434_v26 = vmax.f32 %v1173_v22, 0.0  ;;  %2074 = vmatprep.mubr.bf16.mxu1 %v5350_v38  ;;  %2363 = vmatprep.mubr.bf16.mxu0 %v5352_v47 }
 0x1d8   :  { %v5426_v36 = vpack.c.bf16 %v1431_v32, %v1427_v12  ;;  %v5428_v55 = vpack.c.bf16 %v1433_v58, %v1429_v23 }
 0x1d9   :  { %v5430_v56 = vpack.c.bf16 %v1432_v54, %v1428_v2  ;;  %v5432_v39 = vpack.c.bf16 %v1434_v26, %v1430_v53  ;;  %v823_v41 = vpop.f32.mrb[120].mxu0  ;;  %v1176_v42 = vpop.f32.mrb[120].mxu1 }
 0x1da   :  { %v824_v43 = vadd.f32 %v823_v41, %v4809_v28  ;;  %v1177_v62 = vadd.f32 %v1176_v42, %v4811_v29  ;;  %v825_v5 = vpop.f32.mrb[121].mxu0  ;;  %v1178_v6 = vpop.f32.mrb[121].mxu1 }
 0x1db   :  { %v826_v38 = vadd.f32 %v825_v5, %v4813_v30  ;;  %v1179_v47 = vadd.f32 %v1178_v6, %v4815_v31  ;;  %v827_v7 = vpop.f32.mrb[122].mxu0  ;;  %v1180_v8 = vpop.f32.mrb[122].mxu1 }
 0x1dc   :  { %v1435_v50 = vmax.f32 %v824_v43, 0.0  ;;  %v828_v51 = vadd.f32 %v827_v7, %v4809_v28  ;;  %v1181_v52 = vadd.f32 %v1180_v8, %v4811_v29  ;;  %v829_v16 = vpop.f32.mrb[123].mxu0  ;;  %v1182_v17 = vpop.f32.mrb[123].mxu1  ;;  %v1437_v3 = vmax.f32 %v1177_v62, 0.0 }
 0x1dd   :  { %v1436_v18 = vmax.f32 %v826_v38, 0.0  ;;  %v830_v59 = vadd.f32 %v829_v16, %v4813_v30  ;;  %v1183_v1 = vadd.f32 %v1182_v17, %v4815_v31  ;;  %v1438_v33 = vmax.f32 %v1179_v47, 0.0 }
 0x1de   :  { %v1439_v4 = vmax.f32 %v828_v51, 0.0  ;;  %v1441_v25 = vmax.f32 %v1181_v52, 0.0  ;;  %2075 = vmatmul.mubr.bf16.gmra.mrb[228].mxu1 %v5346_v15  ;;  %2364 = vmatmul.mubr.bf16.gmra.mrb[228].mxu0 %v5348_v37 }
 0x1df   :  { %v1440_v34 = vmax.f32 %v830_v59, 0.0  ;;  %v1442_v63 = vmax.f32 %v1183_v1, 0.0  ;;  %2082 = vmatprep.mubr.bf16.mxu1 %v5370_v11  ;;  %2371 = vmatprep.mubr.bf16.mxu0 %v5372_v60 }
 0x1e0   :  { %v5446_v9 = vpack.c.bf16 %v1439_v4, %v1435_v50  ;;  %v5448_v35 = vpack.c.bf16 %v1441_v25, %v1437_v3 }
 0x1e1   :  { %v5450_v40 = vpack.c.bf16 %v1440_v34, %v1436_v18  ;;  %v5452_v12 = vpack.c.bf16 %v1442_v63, %v1438_v33  ;;  %v833_v13 = vpop.f32.mrb[124].mxu0  ;;  %v1186_v14 = vpop.f32.mrb[124].mxu1 }
 0x1e2   :  { %v834_v15 = vadd.f32 %v833_v13, %v4809_v28  ;;  %v1187_v37 = vadd.f32 %v1186_v14, %v4811_v29  ;;  %v835_v44 = vpop.f32.mrb[125].mxu0  ;;  %v1188_v45 = vpop.f32.mrb[125].mxu1 }
 0x1e3   :  { %v836_v11 = vadd.f32 %v835_v44, %v4813_v30  ;;  %v1189_v60 = vadd.f32 %v1188_v45, %v4815_v31  ;;  %v837_v2 = vpop.f32.mrb[126].mxu0  ;;  %v1190_v46 = vpop.f32.mrb[126].mxu1 }
 0x1e4   :  { %v1443_v22 = vmax.f32 %v834_v15, 0.0  ;;  %v838_v23 = vadd.f32 %v837_v2, %v4809_v28  ;;  %v1191_v32 = vadd.f32 %v1190_v46, %v4811_v29  ;;  %v839_v58 = vpop.f32.mrb[127].mxu0  ;;  %v1192_v53 = vpop.f32.mrb[127].mxu1  ;;  %v1445_v42 = vmax.f32 %v1187_v37, 0.0  ;;  %v5469_v28 = vld [vmem:[%s6364_s4] ss:$0 sm:$0xff] }
 0x1e5   :  { %v1444_v54 = vmax.f32 %v836_v11, 0.0  ;;  %v840_v26 = vadd.f32 %v839_v58, %v4813_v30  ;;  %v1193_v41 = vadd.f32 %v1192_v53, %v4815_v31  ;;  %v1446_v5 = vmax.f32 %v1189_v60, 0.0 }
 0x1e6   :  { %v1447_v43 = vmax.f32 %v838_v23, 0.0  ;;  %v1449_v62 = vmax.f32 %v1191_v32, 0.0  ;;  %2083 = vmatmul.mubr.bf16.gmra.mrb[232].mxu1 %v5366_v57  ;;  %2372 = vmatmul.mubr.bf16.gmra.mrb[232].mxu0 %v5368_v10 }
 0x1e7   :  { %v1448_v6 = vmax.f32 %v840_v26, 0.0  ;;  %v1450_v38 = vmax.f32 %v1193_v41, 0.0  ;;  %2090 = vmatprep.mubr.bf16.mxu1 %v5390_v49  ;;  %2379 = vmatprep.mubr.bf16.mxu0 %v5392_v27 }
 0x1e8   :  { %v5471_v29 = vpack.c.bf16 %v1447_v43, %v1443_v22  ;;  %v5473_v30 = vpack.c.bf16 %v1449_v62, %v1445_v42 }
 0x1e9   :  { %v5475_v31 = vpack.c.bf16 %v1448_v6, %v1444_v54  ;;  %v5477_v57 = vpack.c.bf16 %v1450_v38, %v1446_v5  ;;  %v1876_v10 = vpop.f32.mrb[128].mxu1  ;;  %v2165_v47 = vpop.f32.mrb[128].mxu0 }
 0x1ea   :  { %v1877_v7 = vadd.f32 %v5469_v28, %v1876_v10  ;;  %v1878_v49 = vpop.f32.mrb[129].mxu1  ;;  %v2167_v8 = vpop.f32.mrb[129].mxu0 }
 0x1eb   :  { %v1879_v27 = vpop.f32.mrb[130].mxu1  ;;  %v2168_v50 = vpop.f32.mrb[130].mxu0 }
 0x1ec   :  { %v5480_v51 = vadd.f32 %v2165_v47, %v1877_v7  ;;  %v1880_v52 = vadd.f32 %v5469_v28, %v1879_v27  ;;  %v1881_v16 = vpop.f32.mrb[131].mxu1  ;;  %v2170_v17 = vpop.f32.mrb[131].mxu0 }
 0x1ee   :  { %2420 = vst [vmem:[#allocation2] sm:$0xff] %v5480_v51  ;;  %v5484_v18 = vadd.f32 %v2168_v50, %v1880_v52  ;;  %2091 = vmatmul.mubr.bf16.gmra.mrb[236].mxu1 %v5386_v24  ;;  %2380 = vmatmul.mubr.bf16.gmra.mrb[236].mxu0 %v5388_v48 }
 0x1ef   :  { %2499 = vrot.lane.b32.xlu0 %v5480_v51, %s4393_s12  ;;  %2098 = vmatprep.mubr.bf16.mxu1 %v5410_v21 }
 0x1f0   :  { %2421 = vst [vmem:[#allocation2 + $0x8] sm:$0xff] %v5484_v18  ;;  %2387 = vmatprep.mubr.bf16.mxu0 %v5412_v0  ;;  %2629 = vrot.lane.b32.xlu1 %v5484_v18, %s4394_s1 }
 0x1f1   :  { %v1884_v59 = vpop.f32.mrb[132].mxu1  ;;  %v2173_v1 = vpop.f32.mrb[132].mxu0 }
 0x1f2   :  { %v1885_v24 = vadd.f32 %v5469_v28, %v1884_v59  ;;  %v1886_v3 = vpop.f32.mrb[133].mxu1  ;;  %v2175_v48 = vpop.f32.mrb[133].mxu0 }
 0x1f3   :  { %2627 = vrot.lane.b32.xlu0 %v5480_v51, %s4394_s1  ;;  %v1887_v4 = vpop.f32.mrb[134].mxu1  ;;  %v2176_v25 = vpop.f32.mrb[134].mxu0 }
 0x1f4   :  { %v5498_v21 = vadd.f32 %v2173_v1, %v1885_v24  ;;  %v1888_v33 = vadd.f32 %v5469_v28, %v1887_v4  ;;  %v1889_v0 = vpop.f32.mrb[135].mxu1  ;;  %v2178_v34 = vpop.f32.mrb[135].mxu0 }
 0x1f6   :  { %2422 = vst [vmem:[#allocation2 + $0x10] sm:$0xff] %v5498_v21  ;;  %v5502_v63 = vadd.f32 %v2176_v25, %v1888_v33  ;;  %2099 = vmatmul.mubr.bf16.gmra.mrb[240].mxu1 %v5406_v61  ;;  %2388 = vmatmul.mubr.bf16.gmra.mrb[240].mxu0 %v5408_v19 }
 0x1f7   :  { %2503 = vrot.lane.b32.xlu1 %v5498_v21, %s4393_s12  ;;  %2501 = vrot.lane.b32.xlu0 %v5484_v18, %s4393_s12 }
 0x1f8   :  { %2423 = vst [vmem:[#allocation2 + $0x18] sm:$0xff] %v5502_v63  ;;  %2106 = vmatprep.mubr.bf16.mxu1 %v5430_v56  ;;  %2395 = vmatprep.mubr.bf16.mxu0 %v5432_v39 }
 0x1f9   :  { %v1892_v13 = vpop.f32.mrb[136].mxu1  ;;  %v2181_v14 = vpop.f32.mrb[136].mxu0 }
 0x1fa   :  { %v1893_v15 = vadd.f32 %v5469_v28, %v1892_v13  ;;  %v1894_v37 = vpop.f32.mrb[137].mxu1  ;;  %v2183_v61 = vpop.f32.mrb[137].mxu0 }
 0x1fb   :  { %2505 = vrot.lane.b32.xlu1 %v5502_v63, %s4393_s12  ;;  %2631 = vrot.lane.b32.xlu0 %v5498_v21, %s4394_s1  ;;  %v1895_v19 = vpop.f32.mrb[138].mxu1  ;;  %v2184_v44 = vpop.f32.mrb[138].mxu0 }
 0x1fc   :  { %v5518_v45 = vadd.f32 %v2181_v14, %v1893_v15  ;;  %v1896_v56 = vadd.f32 %v5469_v28, %v1895_v19  ;;  %v1897_v11 = vpop.f32.mrb[139].mxu1  ;;  %v2186_v39 = vpop.f32.mrb[139].mxu0 }
 0x1fe   :  { %2424 = vst [vmem:[#allocation2 + $0x20] sm:$0xff] %v5518_v45  ;;  %v5522_v60 = vadd.f32 %v2184_v44, %v1896_v56  ;;  %2107 = vmatmul.mubr.bf16.gmra.mrb[244].mxu1 %v5426_v36  ;;  %2396 = vmatmul.mubr.bf16.gmra.mrb[244].mxu0 %v5428_v55 }
 0x1ff   :  { %2633 = vrot.lane.b32.xlu1 %v5502_v63, %s4394_s1  ;;  %2507 = vrot.lane.b32.xlu0 %v5518_v45, %s4393_s12 }
 0x200   :  { %2425 = vst [vmem:[#allocation2 + $0x28] sm:$0xff] %v5522_v60  ;;  %2114 = vmatprep.mubr.bf16.mxu1 %v5450_v40  ;;  %2403 = vmatprep.mubr.bf16.mxu0 %v5452_v12 }
 0x201   :  { %v1900_v2 = vpop.f32.mrb[140].mxu1  ;;  %v2189_v46 = vpop.f32.mrb[140].mxu0 }
 0x202   :  { %v1901_v22 = vadd.f32 %v5469_v28, %v1900_v2  ;;  %v1902_v23 = vpop.f32.mrb[141].mxu1  ;;  %v2191_v36 = vpop.f32.mrb[141].mxu0 }
 0x203   :  { %2509 = vrot.lane.b32.xlu1 %v5522_v60, %s4393_s12  ;;  %2635 = vrot.lane.b32.xlu0 %v5518_v45, %s4394_s1  ;;  %v1903_v55 = vpop.f32.mrb[142].mxu1  ;;  %v2192_v32 = vpop.f32.mrb[142].mxu0 }
 0x204   :  { %v5538_v58 = vadd.f32 %v2189_v46, %v1901_v22  ;;  %v1904_v40 = vadd.f32 %v5469_v28, %v1903_v55  ;;  %v1905_v53 = vpop.f32.mrb[143].mxu1  ;;  %v2194_v12 = vpop.f32.mrb[143].mxu0 }
 0x206   :  { %2426 = vst [vmem:[#allocation2 + $0x30] sm:$0xff] %v5538_v58  ;;  %v5542_v54 = vadd.f32 %v2192_v32, %v1904_v40  ;;  %2115 = vmatmul.mubr.bf16.gmra.mrb[248].mxu1 %v5446_v9  ;;  %2404 = vmatmul.mubr.bf16.gmra.mrb[248].mxu0 %v5448_v35 }
 0x207   :  { %2637 = vrot.lane.b32.xlu1 %v5522_v60, %s4394_s1  ;;  %2511 = vrot.lane.b32.xlu0 %v5538_v58, %s4393_s12 }
 0x208   :  { %2427 = vst [vmem:[#allocation2 + $0x38] sm:$0xff] %v5542_v54  ;;  %2122 = vmatprep.mubr.bf16.mxu1 %v5475_v31  ;;  %2411 = vmatprep.mubr.bf16.mxu0 %v5477_v57 }
 0x209   :  { %v1908_v26 = vpop.f32.mrb[144].mxu1  ;;  %v2197_v41 = vpop.f32.mrb[144].mxu0 }
 0x20a   :  { %v1909_v42 = vadd.f32 %v5469_v28, %v1908_v26  ;;  %v1910_v43 = vpop.f32.mrb[145].mxu1  ;;  %v2199_v9 = vpop.f32.mrb[145].mxu0 }
 0x20b   :  { %2513 = vrot.lane.b32.xlu1 %v5542_v54, %s4393_s12  ;;  %2639 = vrot.lane.b32.xlu0 %v5538_v58, %s4394_s1  ;;  %v1911_v35 = vpop.f32.mrb[146].mxu1  ;;  %v2200_v62 = vpop.f32.mrb[146].mxu0 }
 0x20c   :  { %v5558_v5 = vadd.f32 %v2197_v41, %v1909_v42  ;;  %v1912_v6 = vadd.f32 %v5469_v28, %v1911_v35  ;;  %v1913_v38 = vpop.f32.mrb[147].mxu1  ;;  %v2202_v31 = vpop.f32.mrb[147].mxu0 }
 0x20e   :  { %2428 = vst [vmem:[#allocation2 + $0x40] sm:$0xff] %v5558_v5  ;;  %v5562_v57 = vadd.f32 %v2200_v62, %v1912_v6  ;;  %2123 = vmatmul.mubr.bf16.gmra.mrb[252].mxu1 %v5471_v29  ;;  %2412 = vmatmul.mubr.bf16.gmra.mrb[252].mxu0 %v5473_v30 }
 0x20f   :  { %2641 = vrot.lane.b32.xlu1 %v5542_v54, %s4394_s1  ;;  %2515 = vrot.lane.b32.xlu0 %v5558_v5, %s4393_s12 }
 0x210   :  { %2429 = vst [vmem:[#allocation2 + $0x48] sm:$0xff] %v5562_v57 }
 0x211   :  { %v1916_v10 = vpop.f32.mrb[148].mxu1  ;;  %v2205_v47 = vpop.f32.mrb[148].mxu0 }
 0x212   :  { %v1917_v7 = vadd.f32 %v5469_v28, %v1916_v10  ;;  %v1918_v49 = vpop.f32.mrb[149].mxu1  ;;  %v2207_v8 = vpop.f32.mrb[149].mxu0 }
 0x213   :  { %2517 = vrot.lane.b32.xlu1 %v5562_v57, %s4393_s12  ;;  %2643 = vrot.lane.b32.xlu0 %v5558_v5, %s4394_s1  ;;  %v1919_v29 = vpop.f32.mrb[150].mxu1  ;;  %v2208_v30 = vpop.f32.mrb[150].mxu0 }
 0x214   :  { %v5576_v27 = vadd.f32 %v2205_v47, %v1917_v7  ;;  %v1920_v50 = vadd.f32 %v5469_v28, %v1919_v29  ;;  %v1921_v52 = vpop.f32.mrb[151].mxu1  ;;  %v2210_v16 = vpop.f32.mrb[151].mxu0 }
 0x216   :  { %2430 = vst [vmem:[#allocation2 + $0x50] sm:$0xff] %v5576_v27  ;;  %v5580_v17 = vadd.f32 %v2208_v30, %v1920_v50 }
 0x217   :  { %2645 = vrot.lane.b32.xlu1 %v5562_v57, %s4394_s1  ;;  %2519 = vrot.lane.b32.xlu0 %v5576_v27, %s4393_s12 }
 0x218   :  { %2431 = vst [vmem:[#allocation2 + $0x58] sm:$0xff] %v5580_v17 }
 0x219   :  { %v1924_v59 = vpop.f32.mrb[152].mxu1  ;;  %v2213_v1 = vpop.f32.mrb[152].mxu0 }
 0x21a   :  { %v1925_v24 = vadd.f32 %v5469_v28, %v1924_v59  ;;  %v1926_v3 = vpop.f32.mrb[153].mxu1  ;;  %v2215_v48 = vpop.f32.mrb[153].mxu0 }
 0x21b   :  { %2521 = vrot.lane.b32.xlu1 %v5580_v17, %s4393_s12  ;;  %2647 = vrot.lane.b32.xlu0 %v5576_v27, %s4394_s1  ;;  %v1927_v4 = vpop.f32.mrb[154].mxu1  ;;  %v2216_v25 = vpop.f32.mrb[154].mxu0 }
 0x21c   :  { %v5592_v33 = vadd.f32 %v2213_v1, %v1925_v24  ;;  %v1928_v0 = vadd.f32 %v5469_v28, %v1927_v4  ;;  %v1929_v34 = vpop.f32.mrb[155].mxu1  ;;  %v2218_v13 = vpop.f32.mrb[155].mxu0 }
 0x21e   :  { %2432 = vst [vmem:[#allocation2 + $0x60] sm:$0xff] %v5592_v33  ;;  %v5596_v14 = vadd.f32 %v2216_v25, %v1928_v0 }
 0x21f   :  { %2649 = vrot.lane.b32.xlu1 %v5580_v17, %s4394_s1  ;;  %2523 = vrot.lane.b32.xlu0 %v5592_v33, %s4393_s12 }
 0x220   :  { %2433 = vst [vmem:[#allocation2 + $0x68] sm:$0xff] %v5596_v14 }
 0x221   :  { %v1932_v15 = vpop.f32.mrb[156].mxu1  ;;  %v2221_v37 = vpop.f32.mrb[156].mxu0 }
 0x222   :  { %v1933_v61 = vadd.f32 %v5469_v28, %v1932_v15  ;;  %v1934_v19 = vpop.f32.mrb[157].mxu1  ;;  %v2223_v44 = vpop.f32.mrb[157].mxu0 }
 0x223   :  { %2525 = vrot.lane.b32.xlu1 %v5596_v14, %s4393_s12  ;;  %2651 = vrot.lane.b32.xlu0 %v5592_v33, %s4394_s1  ;;  %v1935_v56 = vpop.f32.mrb[158].mxu1  ;;  %v2224_v11 = vpop.f32.mrb[158].mxu0 }
 0x224   :  { %v5608_v39 = vadd.f32 %v2221_v37, %v1933_v61  ;;  %v1936_v2 = vadd.f32 %v5469_v28, %v1935_v56  ;;  %v1937_v46 = vpop.f32.mrb[159].mxu1  ;;  %v2226_v22 = vpop.f32.mrb[159].mxu0 }
 0x226   :  { %2434 = vst [vmem:[#allocation2 + $0x70] sm:$0xff] %v5608_v39  ;;  %v5612_v23 = vadd.f32 %v2224_v11, %v1936_v2 }
 0x227   :  { %2653 = vrot.lane.b32.xlu1 %v5596_v14, %s4394_s1  ;;  %2527 = vrot.lane.b32.xlu0 %v5608_v39, %s4393_s12 }
 0x228   :  { %2435 = vst [vmem:[#allocation2 + $0x78] sm:$0xff] %v5612_v23 }
 0x229   :  { %v1940_v36 = vpop.f32.mrb[160].mxu1  ;;  %v2229_v55 = vpop.f32.mrb[160].mxu0 }
 0x22a   :  { %v1941_v32 = vadd.f32 %v5469_v28, %v1940_v36  ;;  %v1942_v40 = vpop.f32.mrb[161].mxu1  ;;  %v2231_v53 = vpop.f32.mrb[161].mxu0 }
 0x22b   :  { %2529 = vrot.lane.b32.xlu1 %v5612_v23, %s4393_s12  ;;  %2655 = vrot.lane.b32.xlu0 %v5608_v39, %s4394_s1  ;;  %v1943_v12 = vpop.f32.mrb[162].mxu1  ;;  %v2232_v26 = vpop.f32.mrb[162].mxu0 }
 0x22c   :  { %v2230_v41 = vadd.f32 %v2229_v55, %v1941_v32  ;;  %v1944_v42 = vadd.f32 %v5469_v28, %v1943_v12  ;;  %v1945_v43 = vpop.f32.mrb[163].mxu1  ;;  %v2234_v9 = vpop.f32.mrb[163].mxu0 }
 0x22e   :  { %2436 = vst [vmem:[#allocation2 + $0x80] sm:$0xff] %v2230_v41  ;;  %v2233_v35 = vadd.f32 %v2232_v26, %v1944_v42 }
 0x22f   :  { %2657 = vrot.lane.b32.xlu1 %v5612_v23, %s4394_s1  ;;  %2531 = vrot.lane.b32.xlu0 %v2230_v41, %s4393_s12 }
 0x230   :  { %2437 = vst [vmem:[#allocation2 + $0x88] sm:$0xff] %v2233_v35 }
 0x231   :  { %v1948_v62 = vpop.f32.mrb[164].mxu1  ;;  %v2237_v6 = vpop.f32.mrb[164].mxu0 }
 0x232   :  { %v1949_v38 = vadd.f32 %v5469_v28, %v1948_v62  ;;  %v1950_v31 = vpop.f32.mrb[165].mxu1  ;;  %v2239_v10 = vpop.f32.mrb[165].mxu0 }
 0x233   :  { %2533 = vrot.lane.b32.xlu1 %v2233_v35, %s4393_s12  ;;  %2659 = vrot.lane.b32.xlu0 %v2230_v41, %s4394_s1  ;;  %v1951_v47 = vpop.f32.mrb[166].mxu1  ;;  %v2240_v7 = vpop.f32.mrb[166].mxu0 }
 0x234   :  { %v2238_v49 = vadd.f32 %v2237_v6, %v1949_v38  ;;  %v1952_v8 = vadd.f32 %v5469_v28, %v1951_v47  ;;  %v1953_v29 = vpop.f32.mrb[167].mxu1  ;;  %v2242_v30 = vpop.f32.mrb[167].mxu0 }
 0x236   :  { %2438 = vst [vmem:[#allocation2 + $0x90] sm:$0xff] %v2238_v49  ;;  %v2241_v50 = vadd.f32 %v2240_v7, %v1952_v8 }
 0x237   :  { %2661 = vrot.lane.b32.xlu1 %v2233_v35, %s4394_s1  ;;  %2535 = vrot.lane.b32.xlu0 %v2238_v49, %s4393_s12 }
 0x238   :  { %2439 = vst [vmem:[#allocation2 + $0x98] sm:$0xff] %v2241_v50 }
 0x239   :  { %v1956_v52 = vpop.f32.mrb[168].mxu1  ;;  %v2245_v16 = vpop.f32.mrb[168].mxu0 }
 0x23a   :  { %v1957_v59 = vadd.f32 %v5469_v28, %v1956_v52  ;;  %v1958_v1 = vpop.f32.mrb[169].mxu1  ;;  %v2247_v24 = vpop.f32.mrb[169].mxu0 }
 0x23b   :  { %2537 = vrot.lane.b32.xlu1 %v2241_v50, %s4393_s12  ;;  %2663 = vrot.lane.b32.xlu0 %v2238_v49, %s4394_s1  ;;  %v1959_v3 = vpop.f32.mrb[170].mxu1  ;;  %v2248_v48 = vpop.f32.mrb[170].mxu0 }
 0x23c   :  { %v2246_v4 = vadd.f32 %v2245_v16, %v1957_v59  ;;  %v1960_v25 = vadd.f32 %v5469_v28, %v1959_v3  ;;  %v1961_v0 = vpop.f32.mrb[171].mxu1  ;;  %v2250_v34 = vpop.f32.mrb[171].mxu0 }
 0x23d   :  { %v2485_v0 = vand.u32 127, %v109_v20 }
 0x23e   :  { %2440 = vst [vmem:[#allocation2 + $0xa0] sm:$0xff] %v2246_v4  ;;  %v2249_v13 = vadd.f32 %v2248_v48, %v1960_v25 }
 0x23f   :  { %2665 = vrot.lane.b32.xlu1 %v2241_v50, %s4394_s1  ;;  %2539 = vrot.lane.b32.xlu0 %v2246_v4, %s4393_s12 }
 0x240   :  { %2441 = vst [vmem:[#allocation2 + $0xa8] sm:$0xff] %v2249_v13 }
 0x241   :  { %v1964_v15 = vpop.f32.mrb[172].mxu1  ;;  %v2253_v37 = vpop.f32.mrb[172].mxu0 }
 0x242   :  { %v1965_v61 = vadd.f32 %v5469_v28, %v1964_v15  ;;  %v1966_v19 = vpop.f32.mrb[173].mxu1  ;;  %v2255_v44 = vpop.f32.mrb[173].mxu0 }
 0x243   :  { %2541 = vrot.lane.b32.xlu1 %v2249_v13, %s4393_s12  ;;  %2667 = vrot.lane.b32.xlu0 %v2246_v4, %s4394_s1  ;;  %v1967_v56 = vpop.f32.mrb[174].mxu1  ;;  %v2256_v11 = vpop.f32.mrb[174].mxu0  ;;  %v2490_v19 = vand.u32 1, %v2485_v0 }
 0x244   :  { %v2254_v2 = vadd.f32 %v2253_v37, %v1965_v61  ;;  %v1968_v46 = vadd.f32 %v5469_v28, %v1967_v56  ;;  %v1969_v22 = vpop.f32.mrb[175].mxu1  ;;  %v2258_v36 = vpop.f32.mrb[175].mxu0 }
 0x245   :  { %vm5668_vm2 = vcmp.eq.s32.totalorder %v2490_v19, 0 }
 0x246   :  { %2442 = vst [vmem:[#allocation2 + $0xb0] sm:$0xff] %v2254_v2  ;;  %v2257_v55 = vadd.f32 %v2256_v11, %v1968_v46 }
 0x247   :  { %2669 = vrot.lane.b32.xlu1 %v2249_v13, %s4394_s1  ;;  %2543 = vrot.lane.b32.xlu0 %v2254_v2, %s4393_s12 }
 0x248   :  { %2443 = vst [vmem:[#allocation2 + $0xb8] sm:$0xff] %v2257_v55 }
 0x249   :  { %v1972_v32 = vpop.f32.mrb[176].mxu1  ;;  %v2261_v40 = vpop.f32.mrb[176].mxu0 }
 0x24a   :  { %v1973_v53 = vadd.f32 %v5469_v28, %v1972_v32  ;;  %v1974_v12 = vpop.f32.mrb[177].mxu1  ;;  %v2263_v26 = vpop.f32.mrb[177].mxu0 }
 0x24b   :  { %2545 = vrot.lane.b32.xlu1 %v2257_v55, %s4393_s12  ;;  %2671 = vrot.lane.b32.xlu0 %v2254_v2, %s4394_s1  ;;  %v1975_v41 = vpop.f32.mrb[178].mxu1  ;;  %v2264_v42 = vpop.f32.mrb[178].mxu0 }
 0x24c   :  { %v2262_v43 = vadd.f32 %v2261_v40, %v1973_v53  ;;  %v1976_v9 = vadd.f32 %v5469_v28, %v1975_v41  ;;  %v1977_v35 = vpop.f32.mrb[179].mxu1  ;;  %v2266_v62 = vpop.f32.mrb[179].mxu0 }
 0x24e   :  { %2444 = vst [vmem:[#allocation2 + $0xc0] sm:$0xff] %v2262_v43  ;;  %v2265_v6 = vadd.f32 %v2264_v42, %v1976_v9 }
 0x24f   :  { %2673 = vrot.lane.b32.xlu1 %v2257_v55, %s4394_s1  ;;  %2547 = vrot.lane.b32.xlu0 %v2262_v43, %s4393_s12 }
 0x250   :  { %2445 = vst [vmem:[#allocation2 + $0xc8] sm:$0xff] %v2265_v6 }
 0x251   :  { %v1980_v38 = vpop.f32.mrb[180].mxu1  ;;  %v2269_v31 = vpop.f32.mrb[180].mxu0 }
 0x252   :  { %v1981_v10 = vadd.f32 %v5469_v28, %v1980_v38  ;;  %v1982_v47 = vpop.f32.mrb[181].mxu1  ;;  %v2271_v7 = vpop.f32.mrb[181].mxu0 }
 0x253   :  { %2549 = vrot.lane.b32.xlu1 %v2265_v6, %s4393_s12  ;;  %2675 = vrot.lane.b32.xlu0 %v2262_v43, %s4394_s1  ;;  %v1983_v49 = vpop.f32.mrb[182].mxu1  ;;  %v2272_v8 = vpop.f32.mrb[182].mxu0 }
 0x254   :  { %v2270_v29 = vadd.f32 %v2269_v31, %v1981_v10  ;;  %v1984_v30 = vadd.f32 %v5469_v28, %v1983_v49  ;;  %v1985_v50 = vpop.f32.mrb[183].mxu1  ;;  %v2274_v52 = vpop.f32.mrb[183].mxu0 }
 0x256   :  { %2446 = vst [vmem:[#allocation2 + $0xd0] sm:$0xff] %v2270_v29  ;;  %v2273_v16 = vadd.f32 %v2272_v8, %v1984_v30 }
 0x257   :  { %2677 = vrot.lane.b32.xlu1 %v2265_v6, %s4394_s1  ;;  %2551 = vrot.lane.b32.xlu0 %v2270_v29, %s4393_s12 }
 0x258   :  { %2447 = vst [vmem:[#allocation2 + $0xd8] sm:$0xff] %v2273_v16 }
 0x259   :  { %v1988_v59 = vpop.f32.mrb[184].mxu1  ;;  %v2277_v1 = vpop.f32.mrb[184].mxu0 }
 0x25a   :  { %v1989_v24 = vadd.f32 %v5469_v28, %v1988_v59  ;;  %v1990_v3 = vpop.f32.mrb[185].mxu1  ;;  %v2279_v48 = vpop.f32.mrb[185].mxu0 }
 0x25b   :  { %2553 = vrot.lane.b32.xlu1 %v2273_v16, %s4393_s12  ;;  %2679 = vrot.lane.b32.xlu0 %v2270_v29, %s4394_s1  ;;  %v1991_v4 = vpop.f32.mrb[186].mxu1  ;;  %v2280_v25 = vpop.f32.mrb[186].mxu0 }
 0x25c   :  { %v2278_v34 = vadd.f32 %v2277_v1, %v1989_v24  ;;  %v1992_v13 = vadd.f32 %v5469_v28, %v1991_v4  ;;  %v1993_v15 = vpop.f32.mrb[187].mxu1  ;;  %v2282_v37 = vpop.f32.mrb[187].mxu0 }
 0x25e   :  { %2448 = vst [vmem:[#allocation2 + $0xe0] sm:$0xff] %v2278_v34  ;;  %v2281_v61 = vadd.f32 %v2280_v25, %v1992_v13 }
 0x25f   :  { %2681 = vrot.lane.b32.xlu1 %v2273_v16, %s4394_s1  ;;  %2555 = vrot.lane.b32.xlu0 %v2278_v34, %s4393_s12 }
 0x260   :  { %2449 = vst [vmem:[#allocation2 + $0xe8] sm:$0xff] %v2281_v61 }
 0x261   :  { %v2500_v44 = vpop.permute.xlu0 %2499  ;;  %v1996_v56 = vpop.f32.mrb[188].mxu1 }
 0x262   :  { %v1997_v11 = vadd.f32 %v5469_v28, %v1996_v56  ;;  %v2285_v2 = vpop.f32.mrb[188].mxu0  ;;  %v1998_v46 = vpop.f32.mrb[189].mxu1 }
 0x263   :  { %v2287_v20 = vpop.f32.mrb[189].mxu0  ;;  %2557 = vrot.lane.b32.xlu1 %v2281_v61, %s4393_s12  ;;  %v2630_v22 = vpop.permute.xlu1 %2629  ;;  %2683 = vrot.lane.b32.xlu0 %v2278_v34, %s4394_s1 }
 0x264   :  { %v2286_v36 = vadd.f32 %v2285_v2, %v1997_v11  ;;  %v1999_v55 = vpop.f32.mrb[190].mxu1  ;;  %v2288_v32 = vpop.f32.mrb[190].mxu0 }
 0x265   :  { %v2000_v53 = vadd.f32 %v5469_v28, %v1999_v55  ;;  %v2001_v12 = vpop.f32.mrb[191].mxu1  ;;  %v2290_v26 = vpop.f32.mrb[191].mxu0 }
 0x266   :  { %2450 = vst [vmem:[#allocation2 + $0xf0] sm:$0xff] %v2286_v36  ;;  %v2628_v41 = vpop.permute.xlu0 %2627 }
 0x267   :  { %v2289_v42 = vadd.f32 %v2288_v32, %v2000_v53  ;;  %v2755_v43 = vsel %vm5668_vm2, %v2500_v44, %v2628_v41  ;;  %2685 = vrot.lane.b32.xlu1 %v2281_v61, %s4394_s1  ;;  %2559 = vrot.lane.b32.xlu0 %v2286_v36, %s4393_s12 }
 0x268   :  { %v2819_v9 = vmax.f32 %v5480_v51, %v2755_v43 }
 0x269   :  { %2451 = vst [vmem:[#allocation2 + $0xf8] sm:$0xff] %v2289_v42  ;;  %v2504_v35 = vpop.permute.xlu1 %2503  ;;  %v2004_v62 = vpop.f32.mrb[192].mxu1 }
 0x26a   :  { %v2883_v6 = vsub.f32 %v5480_v51, %v2819_v9  ;;  %v3075_v38 = vsub.f32 %v2755_v43, %v2819_v9  ;;  %v2502_v31 = vpop.permute.xlu0 %2501  ;;  %v2005_v10 = vadd.f32 %v5469_v28, %v2004_v62  ;;  %v2293_v47 = vpop.f32.mrb[192].mxu0 }
 0x26b   :  { %v2756_v7 = vsel %vm5668_vm2, %v2502_v31, %v2630_v22  ;;  %v2006_v49 = vpop.f32.mrb[193].mxu1  ;;  %v2295_v8 = vpop.f32.mrb[193].mxu0  ;;  %2561 = vrot.lane.b32.xlu1 %v2289_v42, %s4393_s12  ;;  %2687 = vrot.lane.b32.xlu0 %v2286_v36, %s4394_s1 }
 0x26c   :  { %v2947_v29 = vmul.f32 1.442695, %v2883_v6  ;;  %v3139_v30 = vmul.f32 1.442695, %v3075_v38  ;;  %v2820_v50 = vmax.f32 %v5484_v18, %v2756_v7  ;;  %v2294_v52 = vadd.f32 %v2293_v47, %v2005_v10  ;;  %v2007_v51 = vpop.f32.mrb[194].mxu1  ;;  %v2296_v16 = vpop.f32.mrb[194].mxu0 }
 0x26d   :  { %v2008_v59 = vadd.f32 %v5469_v28, %v2007_v51  ;;  %v2009_v1 = vpop.f32.mrb[195].mxu1  ;;  %v2298_v24 = vpop.f32.mrb[195].mxu0 }
 0x26e   :  { %3933 = vpow2.f32 %v2947_v29  ;;  %v2884_v3 = vsub.f32 %v5484_v18, %v2820_v50  ;;  %v3076_v48 = vsub.f32 %v2756_v7, %v2820_v50  ;;  %2452 = vst [vmem:[#allocation2 + $0x100] sm:$0xff] %v2294_v52  ;;  %v2506_v4 = vpop.permute.xlu1 %2505  ;;  %v2632_v25 = vpop.permute.xlu0 %2631 }
 0x26f   :  { %3935 = vpow2.f32 %v3139_v30  ;;  %v2297_v0 = vadd.f32 %v2296_v16, %v2008_v59  ;;  %v2757_v34 = vsel %vm5668_vm2, %v2504_v35, %v2632_v25  ;;  %2689 = vrot.lane.b32.xlu1 %v2289_v42, %s4394_s1  ;;  %2563 = vrot.lane.b32.xlu0 %v2294_v52, %s4393_s12 }
 0x270   :  { %v2949_v13 = vmul.f32 1.442695, %v2884_v3  ;;  %v3141_v15 = vmul.f32 1.442695, %v3076_v48  ;;  %v2821_v37 = vmax.f32 %v5498_v21, %v2757_v34 }
 0x271   :  { %2453 = vst [vmem:[#allocation2 + $0x108] sm:$0xff] %v2297_v0  ;;  %v2012_v61 = vpop.f32.mrb[196].mxu1  ;;  %v2301_v18 = vpop.f32.mrb[196].mxu0 }
 0x272   :  { %3937 = vpow2.f32 %v2949_v13  ;;  %v2885_v19 = vsub.f32 %v5498_v21, %v2821_v37  ;;  %v3077_v44 = vsub.f32 %v2757_v34, %v2821_v37  ;;  %v2634_v56 = vpop.permute.xlu1 %2633  ;;  %v2508_v11 = vpop.permute.xlu0 %2507  ;;  %v2013_v2 = vadd.f32 %v5469_v28, %v2012_v61 }
 0x273   :  { %3939 = vpow2.f32 %v3141_v15  ;;  %v2758_v46 = vsel %vm5668_vm2, %v2506_v4, %v2634_v56  ;;  %v2014_v20 = vpop.f32.mrb[197].mxu1  ;;  %v2303_v22 = vpop.f32.mrb[197].mxu0  ;;  %2565 = vrot.lane.b32.xlu1 %v2297_v0, %s4393_s12  ;;  %2691 = vrot.lane.b32.xlu0 %v2294_v52, %s4394_s1 }
 0x274   :  { %v2951_v36 = vmul.f32 1.442695, %v2885_v19  ;;  %v3143_v55 = vmul.f32 1.442695, %v3077_v44  ;;  %v2822_v32 = vmax.f32 %v5502_v63, %v2758_v46  ;;  %v2302_v21 = vadd.f32 %v2301_v18, %v2013_v2  ;;  %v2015_v53 = vpop.f32.mrb[198].mxu1  ;;  %v2304_v12 = vpop.f32.mrb[198].mxu0 }
 0x275   :  { %v2016_v26 = vadd.f32 %v5469_v28, %v2015_v53  ;;  %v2017_v41 = vpop.f32.mrb[199].mxu1  ;;  %v2306_v42 = vpop.f32.mrb[199].mxu0 }
 0x276   :  { %3941 = vpow2.f32 %v2951_v36  ;;  %v2886_v43 = vsub.f32 %v5502_v63, %v2822_v32  ;;  %v3078_v9 = vsub.f32 %v2758_v46, %v2822_v32  ;;  %2454 = vst [vmem:[#allocation2 + $0x110] sm:$0xff] %v2302_v21  ;;  %v2510_v35 = vpop.permute.xlu1 %2509  ;;  %v2636_v62 = vpop.permute.xlu0 %2635 }
 0x277   :  { %3943 = vpow2.f32 %v3143_v55  ;;  %v2305_v6 = vadd.f32 %v2304_v12, %v2016_v26  ;;  %v2759_v38 = vsel %vm5668_vm2, %v2508_v11, %v2636_v62  ;;  %2693 = vrot.lane.b32.xlu1 %v2297_v0, %s4394_s1  ;;  %2567 = vrot.lane.b32.xlu0 %v2302_v21, %s4393_s12 }
 0x278   :  { %v5705_v31 = vpop.eup %3933  ;;  %v2953_v10 = vmul.f32 1.442695, %v2886_v43  ;;  %v3145_v47 = vmul.f32 1.442695, %v3078_v9  ;;  %v2823_v7 = vmax.f32 %v5518_v45, %v2759_v38 }
 0x279   :  { %v3936_v63 = vpop.eup %3935  ;;  %2455 = vst [vmem:[#allocation2 + $0x118] sm:$0xff] %v2305_v6  ;;  %v2020_v49 = vpop.f32.mrb[200].mxu1 }
 0x27a   :  { %v2309_v8 = vpop.f32.mrb[200].mxu0  ;;  %v3267_v29 = vadd.f32 %v3936_v63, %v5705_v31  ;;  %3945 = vpow2.f32 %v2953_v10  ;;  %v2887_v30 = vsub.f32 %v5518_v45, %v2823_v7  ;;  %v3079_v50 = vsub.f32 %v2759_v38, %v2823_v7  ;;  %v2638_v52 = vpop.permute.xlu1 %2637 }
 0x27b   :  { %v2512_v51 = vpop.permute.xlu0 %2511  ;;  %3947 = vpow2.f32 %v3145_v47  ;;  %v2760_v16 = vsel %vm5668_vm2, %v2510_v35, %v2638_v52  ;;  %v2021_v59 = vadd.f32 %v5469_v28, %v2020_v49  ;;  %v2022_v1 = vpop.f32.mrb[201].mxu1  ;;  %2569 = vrot.lane.b32.xlu1 %v2305_v6, %s4393_s12  ;;  %2695 = vrot.lane.b32.xlu0 %v2302_v21, %s4394_s1 }
 0x27c   :  { %v2311_v24 = vpop.f32.mrb[201].mxu0  ;;  %v5715_v3 = vpop.eup %3937  ;;  %3949 = vrcp.f32 %v3267_v29  ;;  %v2955_v48 = vmul.f32 1.442695, %v2887_v30  ;;  %v3147_v45 = vmul.f32 1.442695, %v3079_v50  ;;  %v2824_v4 = vmax.f32 %v5522_v60, %v2760_v16 }
 0x27d   :  { %v2023_v25 = vpop.f32.mrb[202].mxu1  ;;  %v2312_v0 = vpop.f32.mrb[202].mxu0  ;;  %v2310_v13 = vadd.f32 %v2309_v8, %v2021_v59 }
 0x27e   :  { %v3940_v34 = vpop.eup %3939  ;;  %v2024_v15 = vadd.f32 %v5469_v28, %v2023_v25  ;;  %v2025_v37 = vpop.f32.mrb[203].mxu1  ;;  %3951 = vpow2.f32 %v2955_v48  ;;  %v2888_v19 = vsub.f32 %v5522_v60, %v2824_v4  ;;  %v3080_v44 = vsub.f32 %v2760_v16, %v2824_v4 }
 0x27f   :  { %v2314_v61 = vpop.f32.mrb[203].mxu0  ;;  %v3268_v18 = vadd.f32 %v3940_v34, %v5715_v3  ;;  %v2514_v56 = vpop.permute.xlu1 %2513  ;;  %3953 = vpow2.f32 %v3147_v45  ;;  %2456 = vst [vmem:[#allocation2 + $0x120] sm:$0xff] %v2310_v13  ;;  %2697 = vrot.lane.b32.xlu1 %v2305_v6, %s4394_s1  ;;  %2571 = vrot.lane.b32.xlu0 %v2310_v13, %s4393_s12 }
 0x280   :  { %v2640_v11 = vpop.permute.xlu0 %2639  ;;  %v2313_v2 = vadd.f32 %v2312_v0, %v2024_v15  ;;  %v5725_v20 = vpop.eup %3941  ;;  %v2957_v22 = vmul.f32 1.442695, %v2888_v19  ;;  %v3149_v36 = vmul.f32 1.442695, %v3080_v44 }
 0x281   :  { %v2761_v46 = vsel %vm5668_vm2, %v2512_v51, %v2640_v11  ;;  %3955 = vrcp.f32 %v3268_v18  ;;  %v3944_v55 = vpop.eup %3943  ;;  %v2028_v32 = vpop.f32.mrb[204].mxu1 }
 0x282   :  { %v2825_v60 = vmax.f32 %v5538_v58, %v2761_v46  ;;  %2457 = vst [vmem:[#allocation2 + $0x128] sm:$0xff] %v2313_v2  ;;  %v2317_v21 = vpop.f32.mrb[204].mxu0  ;;  %v3269_v53 = vadd.f32 %v3944_v55, %v5725_v20  ;;  %3957 = vpow2.f32 %v2957_v22  ;;  %v2029_v9 = vadd.f32 %v5469_v28, %v2028_v32  ;;  %v2030_v35 = vpop.f32.mrb[205].mxu1 }
 0x283   :  { %v2642_v41 = vpop.permute.xlu1 %2641  ;;  %3959 = vpow2.f32 %v3149_v36  ;;  %v2319_v62 = vpop.f32.mrb[205].mxu0  ;;  %2573 = vrot.lane.b32.xlu1 %v2313_v2, %s4393_s12  ;;  %2699 = vrot.lane.b32.xlu0 %v2310_v13, %s4394_s1 }
 0x284   :  { %v2889_v12 = vsub.f32 %v5538_v58, %v2825_v60  ;;  %v3081_v26 = vsub.f32 %v2761_v46, %v2825_v60  ;;  %v2516_v42 = vpop.permute.xlu0 %2515  ;;  %v2762_v43 = vsel %vm5668_vm2, %v2514_v56, %v2642_v41  ;;  %v5735_v6 = vpop.eup %3945  ;;  %3961 = vrcp.f32 %v3269_v53 }
 0x285   :  { %v2826_v10 = vmax.f32 %v5542_v54, %v2762_v43  ;;  %v2031_v47 = vpop.f32.mrb[206].mxu1  ;;  %v2320_v7 = vpop.f32.mrb[206].mxu0  ;;  %v2318_v49 = vadd.f32 %v2317_v21, %v2029_v9 }
 0x286   :  { %v2959_v38 = vmul.f32 1.442695, %v2889_v12  ;;  %v3151_v58 = vmul.f32 1.442695, %v3081_v26  ;;  %v3948_v63 = vpop.eup %3947  ;;  %v2032_v8 = vadd.f32 %v5469_v28, %v2031_v47  ;;  %v2033_v29 = vpop.f32.mrb[207].mxu1 }
 0x287   :  { %v2322_v30 = vpop.f32.mrb[207].mxu0  ;;  %v3950_v50 = vpop.eup %3949  ;;  %v3270_v52 = vadd.f32 %v3948_v63, %v5735_v6  ;;  %v2890_v51 = vsub.f32 %v5542_v54, %v2826_v10  ;;  %v3082_v16 = vsub.f32 %v2762_v43, %v2826_v10  ;;  %2458 = vst [vmem:[#allocation2 + $0x130] sm:$0xff] %v2318_v49  ;;  %2701 = vrot.lane.b32.xlu1 %v2313_v2, %s4394_s1 }
 0x288   :  { %3963 = vpow2.f32 %v2959_v38  ;;  %v2518_v59 = vpop.permute.xlu1 %2517  ;;  %v2644_v1 = vpop.permute.xlu0 %2643  ;;  %v3395_v24 = vmul.f32 %v3950_v50, %v5705_v31  ;;  %v2321_v48 = vadd.f32 %v2320_v7, %v2032_v8  ;;  %2575 = vrot.lane.b32.xlu0 %v2318_v49, %s4393_s12 }
 0x289   :  { %3965 = vpow2.f32 %v3151_v58  ;;  %v2763_v45 = vsel %vm5668_vm2, %v2516_v42, %v2644_v1  ;;  %v5746_v4 = vpop.eup %3951  ;;  %v2961_v25 = vmul.f32 1.442695, %v2890_v51  ;;  %v3153_v54 = vmul.f32 1.442695, %v3082_v16  ;;  %v2036_v31 = vpop.f32.mrb[208].mxu1 }
 0x28a   :  { %3967 = vrcp.f32 %v3270_v52  ;;  %v2827_v0 = vmax.f32 %v5558_v5, %v2763_v45  ;;  %v3954_v34 = vpop.eup %3953  ;;  %3459 = vst [vmem:[#allocation4] sm:$0xff] %v3395_v24  ;;  %2459 = vst [vmem:[#allocation2 + $0x138] sm:$0xff] %v2321_v48  ;;  %v2325_v13 = vpop.f32.mrb[208].mxu0  ;;  %v2037_v2 = vadd.f32 %v5469_v28, %v2036_v31  ;;  %v5765_v28 = vld [vmem:[%s6364_s4] ss:$0 sm:$0xff] }
 0x28b   :  { %v3956_v15 = vpop.eup %3955  ;;  %v3271_v37 = vadd.f32 %v3954_v34, %v5746_v4  ;;  %3969 = vpow2.f32 %v2961_v25  ;;  %v2038_v46 = vpop.f32.mrb[209].mxu1  ;;  %2577 = vrot.lane.b32.xlu1 %v2321_v48, %s4393_s12 }
 0x28c   :  { %v2891_v61 = vsub.f32 %v5558_v5, %v2827_v0  ;;  %v3083_v18 = vsub.f32 %v2763_v45, %v2827_v0  ;;  %v2646_v19 = vpop.permute.xlu1 %2645  ;;  %v2520_v44 = vpop.permute.xlu0 %2519  ;;  %v3396_v56 = vmul.f32 %v3956_v15, %v5715_v3  ;;  %3971 = vpow2.f32 %v3153_v54  ;;  %2703 = vrot.lane.b32.xlu0 %v2318_v49, %s4394_s1 }
 0x28d   :  { %v2764_v11 = vsel %vm5668_vm2, %v2518_v59, %v2646_v19  ;;  %v2327_v22 = vpop.f32.mrb[209].mxu0  ;;  %v5757_v36 = vpop.eup %3957  ;;  %3973 = vrcp.f32 %v3271_v37  ;;  %v5760_v53 = vadd.f32 %v2325_v13, %v2037_v2 }
 0x28e   :  { %v2963_v5 = vmul.f32 1.442695, %v2891_v61  ;;  %v3155_v60 = vmul.f32 1.442695, %v3083_v18  ;;  %v2828_v55 = vmax.f32 %v5562_v57, %v2764_v11  ;;  %v2039_v3 = vpop.f32.mrb[210].mxu1  ;;  %v2328_v32 = vpop.f32.mrb[210].mxu0 }
 0x28f   :  { %v3960_v21 = vpop.eup %3959  ;;  %3460 = vst [vmem:[#allocation4 + $0x8] sm:$0xff] %v3396_v56  ;;  %v2040_v12 = vadd.f32 %v5765_v28, %v2039_v3  ;;  %v2041_v26 = vpop.f32.mrb[211].mxu1  ;;  %2460 = vst [vmem:[#allocation2 + $0x140] sm:$0xff] %v5760_v53  ;;  %2705 = vrot.lane.b32.xlu1 %v2321_v48, %s4394_s1 }
 0x290   :  { %v2330_v41 = vpop.f32.mrb[211].mxu0  ;;  %v3962_v42 = vpop.eup %3961  ;;  %v3272_v43 = vadd.f32 %v3960_v21, %v5757_v36  ;;  %3975 = vpow2.f32 %v2963_v5  ;;  %v2892_v9 = vsub.f32 %v5562_v57, %v2828_v55  ;;  %v3084_v35 = vsub.f32 %v2764_v11, %v2828_v55  ;;  %2579 = vrot.lane.b32.xlu0 %v5760_v53, %s4393_s12 }
 0x291   :  { %v2522_v62 = vpop.permute.xlu1 %2521  ;;  %v2648_v38 = vpop.permute.xlu0 %2647  ;;  %v3397_v58 = vmul.f32 %v3962_v42, %v5725_v20  ;;  %3977 = vpow2.f32 %v3155_v60  ;;  %v5772_v10 = vadd.f32 %v2328_v32, %v2040_v12 }
 0x292   :  { %v2765_v47 = vsel %vm5668_vm2, %v2520_v44, %v2648_v38  ;;  %v5779_v7 = vpop.eup %3963  ;;  %3979 = vrcp.f32 %v3272_v43  ;;  %v2965_v57 = vmul.f32 1.442695, %v2892_v9  ;;  %v3157_v63 = vmul.f32 1.442695, %v3084_v35  ;;  %v2044_v8 = vpop.f32.mrb[212].mxu1 }
 0x293   :  { %v2829_v20 = vmax.f32 %v5576_v27, %v2765_v47  ;;  %v3966_v49 = vpop.eup %3965  ;;  %3461 = vst [vmem:[#allocation4 + $0x10] sm:$0xff] %v3397_v58  ;;  %2461 = vst [vmem:[#allocation2 + $0x148] sm:$0xff] %v5772_v10  ;;  %v2333_v29 = vpop.f32.mrb[212].mxu0  ;;  %v2045_v48 = vadd.f32 %v5765_v28, %v2044_v8  ;;  %2581 = vrot.lane.b32.xlu1 %v5772_v10, %s4393_s12 }
 0x294   :  { %v3968_v30 = vpop.eup %3967  ;;  %v3273_v50 = vadd.f32 %v3966_v49, %v5779_v7  ;;  %3981 = vpow2.f32 %v2965_v57  ;;  %v2046_v45 = vpop.f32.mrb[213].mxu1  ;;  %2707 = vrot.lane.b32.xlu0 %v5760_v53, %s4394_s1 }
 0x295   :  { %v2893_v52 = vsub.f32 %v5576_v27, %v2829_v20  ;;  %v3085_v51 = vsub.f32 %v2765_v47, %v2829_v20  ;;  %v2650_v16 = vpop.permute.xlu1 %2649  ;;  %v2524_v59 = vpop.permute.xlu0 %2523  ;;  %v3398_v1 = vmul.f32 %v3968_v30, %v5735_v6  ;;  %3983 = vpow2.f32 %v3157_v63 }
 0x296   :  { %v2766_v24 = vsel %vm5668_vm2, %v2522_v62, %v2650_v16  ;;  %v2335_v25 = vpop.f32.mrb[213].mxu0  ;;  %v5793_v27 = vpop.eup %3969  ;;  %3985 = vrcp.f32 %v3273_v50  ;;  %v5796_v15 = vadd.f32 %v2333_v29, %v2045_v48 }
 0x297   :  { %v2967_v54 = vmul.f32 1.442695, %v2893_v52  ;;  %v3159_v0 = vmul.f32 1.442695, %v3085_v51  ;;  %v2830_v6 = vmax.f32 %v5580_v17, %v2766_v24  ;;  %v2047_v34 = vpop.f32.mrb[214].mxu1  ;;  %v2336_v31 = vpop.f32.mrb[214].mxu0  ;;  %2709 = vrot.lane.b32.xlu1 %v5772_v10, %s4394_s1 }
 0x298   :  { %v3972_v13 = vpop.eup %3971  ;;  %3462 = vst [vmem:[#allocation4 + $0x18] sm:$0xff] %v3398_v1  ;;  %v2048_v37 = vadd.f32 %v5765_v28, %v2047_v34  ;;  %v2049_v61 = vpop.f32.mrb[215].mxu1  ;;  %2462 = vst [vmem:[#allocation2 + $0x150] sm:$0xff] %v5796_v15  ;;  %2583 = vrot.lane.b32.xlu0 %v5796_v15, %s4393_s12 }
 0x299   :  { %v2338_v18 = vpop.f32.mrb[215].mxu0  ;;  %v3974_v19 = vpop.eup %3973  ;;  %v3274_v44 = vadd.f32 %v3972_v13, %v5793_v27  ;;  %3987 = vpow2.f32 %v2967_v54  ;;  %v2894_v56 = vsub.f32 %v5580_v17, %v2830_v6  ;;  %v3086_v11 = vsub.f32 %v2766_v24, %v2830_v6 }
 0x29a   :  { %v2526_v2 = vpop.permute.xlu1 %2525  ;;  %v2652_v46 = vpop.permute.xlu0 %2651  ;;  %v3399_v22 = vmul.f32 %v3974_v19, %v5746_v4  ;;  %3989 = vpow2.f32 %v3159_v0  ;;  %v5803_v5 = vadd.f32 %v2336_v31, %v2048_v37 }
 0x29b   :  { %v2767_v60 = vsel %vm5668_vm2, %v2524_v59, %v2652_v46  ;;  %v5811_v17 = vpop.eup %3975  ;;  %3991 = vrcp.f32 %v3274_v44  ;;  %v2969_v55 = vmul.f32 1.442695, %v2894_v56  ;;  %v3161_v3 = vmul.f32 1.442695, %v3086_v11  ;;  %v2052_v21 = vpop.f32.mrb[216].mxu1 }
 0x29c   :  { %v2831_v4 = vmax.f32 %v5592_v33, %v2767_v60  ;;  %v3978_v32 = vpop.eup %3977  ;;  %3463 = vst [vmem:[#allocation4 + $0x20] sm:$0xff] %v3399_v22  ;;  %2463 = vst [vmem:[#allocation2 + $0x158] sm:$0xff] %v5803_v5  ;;  %v2341_v12 = vpop.f32.mrb[216].mxu0  ;;  %v2053_v58 = vadd.f32 %v5765_v28, %v2052_v21  ;;  %2585 = vrot.lane.b32.xlu1 %v5803_v5, %s4393_s12  ;;  %2711 = vrot.lane.b32.xlu0 %v5796_v15, %s4394_s1 }
 0x29d   :  { %v3980_v26 = vpop.eup %3979  ;;  %v3275_v41 = vadd.f32 %v3978_v32, %v5811_v17  ;;  %3993 = vpow2.f32 %v2969_v55  ;;  %v2054_v47 = vpop.f32.mrb[217].mxu1 }
 0x29e   :  { %v2895_v42 = vsub.f32 %v5592_v33, %v2831_v4  ;;  %v3087_v43 = vsub.f32 %v2767_v60, %v2831_v4  ;;  %v2654_v9 = vpop.permute.xlu1 %2653  ;;  %v2528_v35 = vpop.permute.xlu0 %2527  ;;  %v3400_v62 = vmul.f32 %v3980_v26, %v5757_v36  ;;  %3995 = vpow2.f32 %v3161_v3 }
 0x29f   :  { %v2768_v38 = vsel %vm5668_vm2, %v2526_v2, %v2654_v9  ;;  %v2343_v57 = vpop.f32.mrb[217].mxu0  ;;  %v5825_v33 = vpop.eup %3981  ;;  %3997 = vrcp.f32 %v3275_v41  ;;  %v5828_v30 = vadd.f32 %v2341_v12, %v2053_v58 }
 0x2a0   :  { %v2971_v63 = vmul.f32 1.442695, %v2895_v42  ;;  %v3163_v20 = vmul.f32 1.442695, %v3087_v43  ;;  %v2832_v36 = vmax.f32 %v5596_v14, %v2768_v38  ;;  %v2055_v49 = vpop.f32.mrb[218].mxu1  ;;  %v2344_v8 = vpop.f32.mrb[218].mxu0  ;;  %2713 = vrot.lane.b32.xlu1 %v5803_v5, %s4394_s1 }
 0x2a1   :  { %v3984_v29 = vpop.eup %3983  ;;  %3464 = vst [vmem:[#allocation4 + $0x28] sm:$0xff] %v3400_v62  ;;  %v2056_v50 = vadd.f32 %v5765_v28, %v2055_v49  ;;  %v2057_v52 = vpop.f32.mrb[219].mxu1  ;;  %2464 = vst [vmem:[#allocation2 + $0x160] sm:$0xff] %v5828_v30  ;;  %2587 = vrot.lane.b32.xlu0 %v5828_v30, %s4393_s12  ;;  %v4318_v62 = vld [vmem:[#allocation2 + $0x78] sm:$0xff] }
 0x2a2   :  { %v2346_v51 = vpop.f32.mrb[219].mxu0  ;;  %v3986_v16 = vpop.eup %3985  ;;  %v3276_v59 = vadd.f32 %v3984_v29, %v5825_v33  ;;  %3999 = vpow2.f32 %v2971_v63  ;;  %v2896_v1 = vsub.f32 %v5596_v14, %v2832_v36  ;;  %v3088_v24 = vsub.f32 %v2768_v38, %v2832_v36 }
 0x2a3   :  { %v2530_v48 = vpop.permute.xlu1 %2529  ;;  %v2656_v45 = vpop.permute.xlu0 %2655  ;;  %v3401_v25 = vmul.f32 %v3986_v16, %v5779_v7  ;;  %4001 = vpow2.f32 %v3163_v20  ;;  %v5835_v54 = vadd.f32 %v2344_v8, %v2056_v50 }
 0x2a4   :  { %v2769_v0 = vsel %vm5668_vm2, %v2528_v35, %v2656_v45  ;;  %v5843_v14 = vpop.eup %3987  ;;  %4003 = vrcp.f32 %v3276_v59  ;;  %v2973_v6 = vmul.f32 1.442695, %v2896_v1  ;;  %v3165_v34 = vmul.f32 1.442695, %v3088_v24  ;;  %v2060_v13 = vpop.f32.mrb[220].mxu1 }
 0x2a5   :  { %v2833_v7 = vmax.f32 %v5608_v39, %v2769_v0  ;;  %v3990_v31 = vpop.eup %3989  ;;  %3465 = vst [vmem:[#allocation4 + $0x30] sm:$0xff] %v3401_v25  ;;  %2465 = vst [vmem:[#allocation2 + $0x168] sm:$0xff] %v5835_v54  ;;  %v2349_v37 = vpop.f32.mrb[220].mxu0  ;;  %v2061_v22 = vadd.f32 %v5765_v28, %v2060_v13  ;;  %2589 = vrot.lane.b32.xlu1 %v5835_v54, %s4393_s12  ;;  %2715 = vrot.lane.b32.xlu0 %v5828_v30, %s4394_s1 }
 0x2a6   :  { %v3992_v61 = vpop.eup %3991  ;;  %v3277_v18 = vadd.f32 %v3990_v31, %v5843_v14  ;;  %4005 = vpow2.f32 %v2973_v6  ;;  %v2062_v60 = vpop.f32.mrb[221].mxu1 }
 0x2a7   :  { %v2897_v19 = vsub.f32 %v5608_v39, %v2833_v7  ;;  %v3089_v44 = vsub.f32 %v2769_v0, %v2833_v7  ;;  %v2658_v56 = vpop.permute.xlu1 %2657  ;;  %v2532_v11 = vpop.permute.xlu0 %2531  ;;  %v3402_v2 = vmul.f32 %v3992_v61, %v5793_v27  ;;  %4007 = vpow2.f32 %v3165_v34 }
 0x2a8   :  { %v2770_v46 = vsel %vm5668_vm2, %v2530_v48, %v2658_v56  ;;  %v2351_v55 = vpop.f32.mrb[221].mxu0  ;;  %v5857_v39 = vpop.eup %3993  ;;  %4009 = vrcp.f32 %v3277_v18  ;;  %v5860_v26 = vadd.f32 %v2349_v37, %v2061_v22 }
 0x2a9   :  { %v2975_v3 = vmul.f32 1.442695, %v2897_v19  ;;  %v3167_v4 = vmul.f32 1.442695, %v3089_v44  ;;  %v2834_v27 = vmax.f32 %v5612_v23, %v2770_v46  ;;  %v2063_v32 = vpop.f32.mrb[222].mxu1  ;;  %v2352_v21 = vpop.f32.mrb[222].mxu0  ;;  %2717 = vrot.lane.b32.xlu1 %v5835_v54, %s4394_s1 }
 0x2aa   :  { %v3996_v12 = vpop.eup %3995  ;;  %3466 = vst [vmem:[#allocation4 + $0x38] sm:$0xff] %v3402_v2  ;;  %v2064_v41 = vadd.f32 %v5765_v28, %v2063_v32  ;;  %v2065_v42 = vpop.f32.mrb[223].mxu1  ;;  %2466 = vst [vmem:[#allocation2 + $0x170] sm:$0xff] %v5860_v26  ;;  %2591 = vrot.lane.b32.xlu0 %v5860_v26, %s4393_s12 }
 0x2ab   :  { %v2354_v43 = vpop.f32.mrb[223].mxu0  ;;  %v3998_v9 = vpop.eup %3997  ;;  %v3278_v35 = vadd.f32 %v3996_v12, %v5857_v39  ;;  %4011 = vpow2.f32 %v2975_v3  ;;  %v2898_v38 = vsub.f32 %v4318_v62, %v2834_v27  ;;  %v3090_v58 = vsub.f32 %v2770_v46, %v2834_v27 }
 0x2ac   :  { %v2534_v47 = vpop.permute.xlu1 %2533  ;;  %v2660_v57 = vpop.permute.xlu0 %2659  ;;  %v3403_v23 = vmul.f32 %v3998_v9, %v5811_v17  ;;  %4013 = vpow2.f32 %v3167_v4  ;;  %v5866_v63 = vadd.f32 %v2352_v21, %v2064_v41  ;;  %v4319_v17 = vld [vmem:[#allocation2 + $0x80] sm:$0xff] }
 0x2ad   :  { %v2771_v20 = vsel %vm5668_vm2, %v2532_v11, %v2660_v57  ;;  %v5874_v36 = vpop.eup %3999  ;;  %4015 = vrcp.f32 %v3278_v35  ;;  %v2977_v49 = vmul.f32 1.442695, %v2898_v38  ;;  %v3169_v8 = vmul.f32 1.442695, %v3090_v58  ;;  %v2068_v52 = vpop.f32.mrb[224].mxu1 }
 0x2ae   :  { %v2835_v29 = vmax.f32 %v4319_v17, %v2771_v20  ;;  %v4002_v50 = vpop.eup %4001  ;;  %3467 = vst [vmem:[#allocation4 + $0x40] sm:$0xff] %v3403_v23  ;;  %2467 = vst [vmem:[#allocation2 + $0x178] sm:$0xff] %v5866_v63  ;;  %v2357_v51 = vpop.f32.mrb[224].mxu0  ;;  %v2069_v6 = vadd.f32 %v5765_v28, %v2068_v52  ;;  %2593 = vrot.lane.b32.xlu1 %v5866_v63, %s4393_s12  ;;  %2719 = vrot.lane.b32.xlu0 %v5860_v26, %s4394_s1 }
 0x2af   :  { %v4004_v16 = vpop.eup %4003  ;;  %v3279_v59 = vadd.f32 %v4002_v50, %v5874_v36  ;;  %4017 = vpow2.f32 %v2977_v49  ;;  %v2070_v34 = vpop.f32.mrb[225].mxu1 }
 0x2b0   :  { %v2899_v1 = vsub.f32 %v4319_v17, %v2835_v29  ;;  %v3091_v24 = vsub.f32 %v2771_v20, %v2835_v29  ;;  %v2662_v48 = vpop.permute.xlu1 %2661  ;;  %v2536_v45 = vpop.permute.xlu0 %2535  ;;  %v3404_v25 = vmul.f32 %v4004_v16, %v5825_v33  ;;  %4019 = vpow2.f32 %v3169_v8  ;;  %v4320_v33 = vld [vmem:[#allocation2 + $0x88] sm:$0xff] }
 0x2b1   :  { %v2772_v0 = vsel %vm5668_vm2, %v2534_v47, %v2662_v48  ;;  %v2359_v7 = vpop.f32.mrb[225].mxu0  ;;  %v5886_v31 = vpop.eup %4005  ;;  %4021 = vrcp.f32 %v3279_v59  ;;  %v5888_v56 = vadd.f32 %v2357_v51, %v2069_v6 }
 0x2b2   :  { %v2979_v13 = vmul.f32 1.442695, %v2899_v1  ;;  %v3171_v37 = vmul.f32 1.442695, %v3091_v24  ;;  %v2836_v61 = vmax.f32 %v4320_v33, %v2772_v0  ;;  %v2071_v18 = vpop.f32.mrb[226].mxu1  ;;  %v2360_v19 = vpop.f32.mrb[226].mxu0  ;;  %2721 = vrot.lane.b32.xlu1 %v5866_v63, %s4394_s1 }
 0x2b3   :  { %v4008_v44 = vpop.eup %4007  ;;  %3468 = vst [vmem:[#allocation4 + $0x48] sm:$0xff] %v3404_v25  ;;  %v2072_v11 = vadd.f32 %v5765_v28, %v2071_v18  ;;  %v2073_v2 = vpop.f32.mrb[227].mxu1  ;;  %2468 = vst [vmem:[#allocation2 + $0x180] sm:$0xff] %v5888_v56  ;;  %2595 = vrot.lane.b32.xlu0 %v5888_v56, %s4393_s12 }
 0x2b4   :  { %v2362_v46 = vpop.f32.mrb[227].mxu0  ;;  %v4010_v22 = vpop.eup %4009  ;;  %v3280_v60 = vadd.f32 %v4008_v44, %v5886_v31  ;;  %4023 = vpow2.f32 %v2979_v13  ;;  %v2900_v55 = vsub.f32 %v4320_v33, %v2836_v61  ;;  %v3092_v3 = vsub.f32 %v2772_v0, %v2836_v61 }
 0x2b5   :  { %v2538_v4 = vpop.permute.xlu1 %2537  ;;  %v2664_v27 = vpop.permute.xlu0 %2663  ;;  %v3405_v32 = vmul.f32 %v4010_v22, %v5843_v14  ;;  %4025 = vpow2.f32 %v3171_v37  ;;  %v5894_v21 = vadd.f32 %v2360_v19, %v2072_v11  ;;  %v4321_v14 = vld [vmem:[#allocation2 + $0x90] sm:$0xff] }
 0x2b6   :  { %v2773_v12 = vsel %vm5668_vm2, %v2536_v45, %v2664_v27  ;;  %v5902_v41 = vpop.eup %4011  ;;  %4027 = vrcp.f32 %v3280_v60  ;;  %v2981_v42 = vmul.f32 1.442695, %v2900_v55  ;;  %v3173_v43 = vmul.f32 1.442695, %v3092_v3  ;;  %v2076_v62 = vpop.f32.mrb[228].mxu1 }
 0x2b7   :  { %v2837_v9 = vmax.f32 %v4321_v14, %v2773_v12  ;;  %v4014_v35 = vpop.eup %4013  ;;  %3469 = vst [vmem:[#allocation4 + $0x50] sm:$0xff] %v3405_v32  ;;  %2469 = vst [vmem:[#allocation2 + $0x188] sm:$0xff] %v5894_v21  ;;  %v2365_v38 = vpop.f32.mrb[228].mxu0  ;;  %v2077_v29 = vadd.f32 %v5765_v28, %v2076_v62  ;;  %2597 = vrot.lane.b32.xlu1 %v5894_v21, %s4393_s12  ;;  %2723 = vrot.lane.b32.xlu0 %v5888_v56, %s4394_s1 }
 0x2b8   :  { %v4016_v58 = vpop.eup %4015  ;;  %v3281_v47 = vadd.f32 %v4014_v35, %v5902_v41  ;;  %4029 = vpow2.f32 %v2981_v42  ;;  %v2078_v50 = vpop.f32.mrb[229].mxu1 }
 0x2b9   :  { %v2901_v57 = vsub.f32 %v4321_v14, %v2837_v9  ;;  %v3093_v23 = vsub.f32 %v2773_v12, %v2837_v9  ;;  %v2666_v20 = vpop.permute.xlu1 %2665  ;;  %v2540_v49 = vpop.permute.xlu0 %2539  ;;  %v3406_v8 = vmul.f32 %v4016_v58, %v5857_v39  ;;  %4031 = vpow2.f32 %v3173_v43  ;;  %v4322_v39 = vld [vmem:[#allocation2 + $0x98] sm:$0xff] }
 0x2ba   :  { %v2774_v17 = vsel %vm5668_vm2, %v2538_v4, %v2666_v20  ;;  %v2367_v52 = vpop.f32.mrb[229].mxu0  ;;  %v5914_v51 = vpop.eup %4017  ;;  %4033 = vrcp.f32 %v3281_v47  ;;  %v5916_v25 = vadd.f32 %v2365_v38, %v2077_v29 }
 0x2bb   :  { %v2983_v16 = vmul.f32 1.442695, %v2901_v57  ;;  %v3175_v59 = vmul.f32 1.442695, %v3093_v23  ;;  %v2838_v1 = vmax.f32 %v4322_v39, %v2774_v17  ;;  %v2079_v24 = vpop.f32.mrb[230].mxu1  ;;  %v2368_v48 = vpop.f32.mrb[230].mxu0  ;;  %2725 = vrot.lane.b32.xlu1 %v5894_v21, %s4394_s1 }
 0x2bc   :  { %v4020_v45 = vpop.eup %4019  ;;  %3470 = vst [vmem:[#allocation4 + $0x58] sm:$0xff] %v3406_v8  ;;  %v2080_v0 = vadd.f32 %v5765_v28, %v2079_v24  ;;  %v2081_v6 = vpop.f32.mrb[231].mxu1  ;;  %2470 = vst [vmem:[#allocation2 + $0x190] sm:$0xff] %v5916_v25  ;;  %2599 = vrot.lane.b32.xlu0 %v5916_v25, %s4393_s12 }
 0x2bd   :  { %v2370_v34 = vpop.f32.mrb[231].mxu0  ;;  %v4022_v7 = vpop.eup %4021  ;;  %v3282_v13 = vadd.f32 %v4020_v45, %v5914_v51  ;;  %4035 = vpow2.f32 %v2983_v16  ;;  %v2902_v37 = vsub.f32 %v4322_v39, %v2838_v1  ;;  %v3094_v33 = vsub.f32 %v2774_v17, %v2838_v1 }
 0x2be   :  { %v2542_v61 = vpop.permute.xlu1 %2541  ;;  %v2668_v18 = vpop.permute.xlu0 %2667  ;;  %v3407_v19 = vmul.f32 %v4022_v7, %v5874_v36  ;;  %4037 = vpow2.f32 %v3175_v59  ;;  %v5922_v44 = vadd.f32 %v2368_v48, %v2080_v0  ;;  %v4323_v36 = vld [vmem:[#allocation2 + $0xa0] sm:$0xff] }
 0x2bf   :  { %v2775_v11 = vsel %vm5668_vm2, %v2540_v49, %v2668_v18  ;;  %v5930_v2 = vpop.eup %4023  ;;  %4039 = vrcp.f32 %v3282_v13  ;;  %v2985_v46 = vmul.f32 1.442695, %v2902_v37  ;;  %v3177_v22 = vmul.f32 1.442695, %v3094_v33  ;;  %v2084_v3 = vpop.f32.mrb[232].mxu1 }
 0x2c0   :  { %v2839_v60 = vmax.f32 %v4323_v36, %v2775_v11  ;;  %v4026_v55 = vpop.eup %4025  ;;  %3471 = vst [vmem:[#allocation4 + $0x60] sm:$0xff] %v3407_v19  ;;  %2471 = vst [vmem:[#allocation2 + $0x198] sm:$0xff] %v5922_v44  ;;  %v2373_v4 = vpop.f32.mrb[232].mxu0  ;;  %v2085_v62 = vadd.f32 %v5765_v28, %v2084_v3  ;;  %2601 = vrot.lane.b32.xlu1 %v5922_v44, %s4393_s12  ;;  %2727 = vrot.lane.b32.xlu0 %v5916_v25, %s4394_s1 }
 0x2c1   :  { %v4028_v27 = vpop.eup %4027  ;;  %v3283_v32 = vadd.f32 %v4026_v55, %v5930_v2  ;;  %4041 = vpow2.f32 %v2985_v46  ;;  %v2086_v38 = vpop.f32.mrb[233].mxu1 }
 0x2c2   :  { %v2903_v12 = vsub.f32 %v4323_v36, %v2839_v60  ;;  %v3095_v42 = vsub.f32 %v2775_v11, %v2839_v60  ;;  %v2670_v43 = vpop.permute.xlu1 %2669  ;;  %v2544_v14 = vpop.permute.xlu0 %2543  ;;  %v3408_v9 = vmul.f32 %v4028_v27, %v5886_v31  ;;  %4043 = vpow2.f32 %v3177_v22  ;;  %v4324_v31 = vld [vmem:[#allocation2 + $0xa8] sm:$0xff] }
 0x2c3   :  { %v2776_v35 = vsel %vm5668_vm2, %v2542_v61, %v2670_v43  ;;  %v2375_v58 = vpop.f32.mrb[233].mxu0  ;;  %v5942_v47 = vpop.eup %4029  ;;  %4045 = vrcp.f32 %v3283_v32  ;;  %v5944_v29 = vadd.f32 %v2373_v4, %v2085_v62 }
 0x2c4   :  { %v2987_v57 = vmul.f32 1.442695, %v2903_v12  ;;  %v3179_v23 = vmul.f32 1.442695, %v3095_v42  ;;  %v2840_v20 = vmax.f32 %v4324_v31, %v2776_v35  ;;  %v2087_v49 = vpop.f32.mrb[234].mxu1  ;;  %v2376_v8 = vpop.f32.mrb[234].mxu0  ;;  %2729 = vrot.lane.b32.xlu1 %v5922_v44, %s4394_s1 }
 0x2c5   :  { %v4032_v17 = vpop.eup %4031  ;;  %3472 = vst [vmem:[#allocation4 + $0x68] sm:$0xff] %v3408_v9  ;;  %v2088_v50 = vadd.f32 %v5765_v28, %v2087_v49  ;;  %v2089_v52 = vpop.f32.mrb[235].mxu1  ;;  %2472 = vst [vmem:[#allocation2 + $0x1a0] sm:$0xff] %v5944_v29  ;;  %2603 = vrot.lane.b32.xlu0 %v5944_v29, %s4393_s12 }
 0x2c6   :  { %v2378_v16 = vpop.f32.mrb[235].mxu0  ;;  %v4034_v59 = vpop.eup %4033  ;;  %v3284_v39 = vadd.f32 %v4032_v17, %v5942_v47  ;;  %4047 = vpow2.f32 %v2987_v57  ;;  %v2904_v1 = vsub.f32 %v4324_v31, %v2840_v20  ;;  %v3096_v24 = vsub.f32 %v2776_v35, %v2840_v20 }
 0x2c7   :  { %v2546_v48 = vpop.permute.xlu1 %2545  ;;  %v2672_v45 = vpop.permute.xlu0 %2671  ;;  %v3409_v0 = vmul.f32 %v4034_v59, %v5902_v41  ;;  %4049 = vpow2.f32 %v3179_v23  ;;  %v5950_v6 = vadd.f32 %v2376_v8, %v2088_v50  ;;  %v4325_v41 = vld [vmem:[#allocation2 + $0xb0] sm:$0xff] }
 0x2c8   :  { %v2777_v34 = vsel %vm5668_vm2, %v2544_v14, %v2672_v45  ;;  %v5958_v7 = vpop.eup %4035  ;;  %4051 = vrcp.f32 %v3284_v39  ;;  %v2989_v13 = vmul.f32 1.442695, %v2904_v1  ;;  %v3181_v37 = vmul.f32 1.442695, %v3096_v24  ;;  %v2092_v18 = vpop.f32.mrb[236].mxu1 }
 0x2c9   :  { %v2841_v33 = vmax.f32 %v4325_v41, %v2777_v34  ;;  %v4038_v61 = vpop.eup %4037  ;;  %3473 = vst [vmem:[#allocation4 + $0x70] sm:$0xff] %v3409_v0  ;;  %2473 = vst [vmem:[#allocation2 + $0x1a8] sm:$0xff] %v5950_v6  ;;  %v2381_v19 = vpop.f32.mrb[236].mxu0  ;;  %v2093_v27 = vadd.f32 %v5765_v28, %v2092_v18  ;;  %2605 = vrot.lane.b32.xlu1 %v5950_v6, %s4393_s12  ;;  %2731 = vrot.lane.b32.xlu0 %v5944_v29, %s4394_s1 }
 0x2ca   :  { %v4040_v11 = vpop.eup %4039  ;;  %v3285_v46 = vadd.f32 %v4038_v61, %v5958_v7  ;;  %4053 = vpow2.f32 %v2989_v13  ;;  %v2094_v32 = vpop.f32.mrb[237].mxu1 }
 0x2cb   :  { %v2905_v22 = vsub.f32 %v4325_v41, %v2841_v33  ;;  %v3097_v36 = vsub.f32 %v2777_v34, %v2841_v33  ;;  %v2674_v60 = vpop.permute.xlu1 %2673  ;;  %v2548_v55 = vpop.permute.xlu0 %2547  ;;  %v3410_v3 = vmul.f32 %v4040_v11, %v5914_v51  ;;  %4055 = vpow2.f32 %v3181_v37  ;;  %v4326_v51 = vld [vmem:[#allocation2 + $0xb8] sm:$0xff] }
 0x2cc   :  { %v2778_v4 = vsel %vm5668_vm2, %v2546_v48, %v2674_v60  ;;  %v2383_v12 = vpop.f32.mrb[237].mxu0  ;;  %v5970_v42 = vpop.eup %4041  ;;  %4057 = vrcp.f32 %v3285_v46  ;;  %v5972_v58 = vadd.f32 %v2381_v19, %v2093_v27 }
 0x2cd   :  { %v2991_v43 = vmul.f32 1.442695, %v2905_v22  ;;  %v3183_v14 = vmul.f32 1.442695, %v3097_v36  ;;  %v2842_v9 = vmax.f32 %v4326_v51, %v2778_v4  ;;  %v2095_v35 = vpop.f32.mrb[238].mxu1  ;;  %v2384_v62 = vpop.f32.mrb[238].mxu0  ;;  %2733 = vrot.lane.b32.xlu1 %v5950_v6, %s4394_s1 }
 0x2ce   :  { %v4044_v38 = vpop.eup %4043  ;;  %3474 = vst [vmem:[#allocation4 + $0x78] sm:$0xff] %v3410_v3  ;;  %v2096_v57 = vadd.f32 %v5765_v28, %v2095_v35  ;;  %v2097_v23 = vpop.f32.mrb[239].mxu1  ;;  %2474 = vst [vmem:[#allocation2 + $0x1b0] sm:$0xff] %v5972_v58  ;;  %2607 = vrot.lane.b32.xlu0 %v5972_v58, %s4393_s12 }
 0x2cf   :  { %v2386_v31 = vpop.f32.mrb[239].mxu0  ;;  %v4046_v20 = vpop.eup %4045  ;;  %v3286_v49 = vadd.f32 %v4044_v38, %v5970_v42  ;;  %4059 = vpow2.f32 %v2991_v43  ;;  %v2906_v8 = vsub.f32 %v4326_v51, %v2842_v9  ;;  %v3098_v17 = vsub.f32 %v2778_v4, %v2842_v9 }
 0x2d0   :  { %v2550_v50 = vpop.permute.xlu1 %2549  ;;  %v2676_v52 = vpop.permute.xlu0 %2675  ;;  %v3411_v16 = vmul.f32 %v4046_v20, %v5930_v2  ;;  %4061 = vpow2.f32 %v3183_v14  ;;  %v5978_v59 = vadd.f32 %v2384_v62, %v2096_v57  ;;  %v4327_v2 = vld [vmem:[#allocation2 + $0xc0] sm:$0xff] }
 0x2d1   :  { %v2779_v39 = vsel %vm5668_vm2, %v2548_v55, %v2676_v52  ;;  %v5986_v1 = vpop.eup %4047  ;;  %4063 = vrcp.f32 %v3286_v49  ;;  %v2993_v24 = vmul.f32 1.442695, %v2906_v8  ;;  %v3185_v48 = vmul.f32 1.442695, %v3098_v17  ;;  %v2100_v34 = vpop.f32.mrb[240].mxu1 }
 0x2d2   :  { %v2843_v45 = vmax.f32 %v4327_v2, %v2779_v39  ;;  %v4050_v0 = vpop.eup %4049  ;;  %3475 = vst [vmem:[#allocation4 + $0x80] sm:$0xff] %v3411_v16  ;;  %2475 = vst [vmem:[#allocation2 + $0x1b8] sm:$0xff] %v5978_v59  ;;  %v2389_v13 = vpop.f32.mrb[240].mxu0  ;;  %v2101_v22 = vadd.f32 %v5765_v28, %v2100_v34  ;;  %2609 = vrot.lane.b32.xlu1 %v5978_v59, %s4393_s12  ;;  %2735 = vrot.lane.b32.xlu0 %v5972_v58, %s4394_s1 }
 0x2d3   :  { %v4052_v37 = vpop.eup %4051  ;;  %v3287_v41 = vadd.f32 %v4050_v0, %v5986_v1  ;;  %4065 = vpow2.f32 %v2993_v24  ;;  %v2102_v36 = vpop.f32.mrb[241].mxu1 }
 0x2d4   :  { %v2907_v33 = vsub.f32 %v4327_v2, %v2843_v45  ;;  %v3099_v61 = vsub.f32 %v2779_v39, %v2843_v45  ;;  %v2678_v18 = vpop.permute.xlu1 %2677  ;;  %v2552_v19 = vpop.permute.xlu0 %2551  ;;  %v3412_v11 = vmul.f32 %v4052_v37, %v5942_v47  ;;  %4067 = vpow2.f32 %v3185_v48  ;;  %v4328_v47 = vld [vmem:[#allocation2 + $0xc8] sm:$0xff] }
 0x2d5   :  { %v2780_v46 = vsel %vm5668_vm2, %v2550_v50, %v2678_v18  ;;  %v2391_v60 = vpop.f32.mrb[241].mxu0  ;;  %v5998_v55 = vpop.eup %4053  ;;  %4069 = vrcp.f32 %v3287_v41  ;;  %v6000_v14 = vadd.f32 %v2389_v13, %v2101_v22 }
 0x2d6   :  { %v2995_v3 = vmul.f32 1.442695, %v2907_v33  ;;  %v3187_v4 = vmul.f32 1.442695, %v3099_v61  ;;  %v2844_v27 = vmax.f32 %v4328_v47, %v2780_v46  ;;  %v2103_v32 = vpop.f32.mrb[242].mxu1  ;;  %v2392_v12 = vpop.f32.mrb[242].mxu0  ;;  %2737 = vrot.lane.b32.xlu1 %v5978_v59, %s4394_s1 }
 0x2d7   :  { %v4056_v43 = vpop.eup %4055  ;;  %3476 = vst [vmem:[#allocation4 + $0x88] sm:$0xff] %v3412_v11  ;;  %v2104_v51 = vadd.f32 %v5765_v28, %v2103_v32  ;;  %v2105_v9 = vpop.f32.mrb[243].mxu1  ;;  %2476 = vst [vmem:[#allocation2 + $0x1c0] sm:$0xff] %v6000_v14  ;;  %2611 = vrot.lane.b32.xlu0 %v6000_v14, %s4393_s12 }
 0x2d8   :  { %v2394_v35 = vpop.f32.mrb[243].mxu0  ;;  %v4058_v62 = vpop.eup %4057  ;;  %v3288_v38 = vadd.f32 %v4056_v43, %v5998_v55  ;;  %4071 = vpow2.f32 %v2995_v3  ;;  %v2908_v57 = vsub.f32 %v4328_v47, %v2844_v27  ;;  %v3100_v23 = vsub.f32 %v2780_v46, %v2844_v27 }
 0x2d9   :  { %v2554_v31 = vpop.permute.xlu1 %2553  ;;  %v2680_v20 = vpop.permute.xlu0 %2679  ;;  %v3413_v49 = vmul.f32 %v4058_v62, %v5958_v7  ;;  %4073 = vpow2.f32 %v3187_v4  ;;  %v6006_v8 = vadd.f32 %v2392_v12, %v2104_v51  ;;  %v4329_v7 = vld [vmem:[#allocation2 + $0xd0] sm:$0xff] }
 0x2da   :  { %v2781_v17 = vsel %vm5668_vm2, %v2552_v19, %v2680_v20  ;;  %v6014_v50 = vpop.eup %4059  ;;  %4075 = vrcp.f32 %v3288_v38  ;;  %v2997_v52 = vmul.f32 1.442695, %v2908_v57  ;;  %v3189_v16 = vmul.f32 1.442695, %v3100_v23  ;;  %v2108_v48 = vpop.f32.mrb[244].mxu1 }
 0x2db   :  { %v2845_v39 = vmax.f32 %v4329_v7, %v2781_v17  ;;  %v4062_v24 = vpop.eup %4061  ;;  %3477 = vst [vmem:[#allocation4 + $0x90] sm:$0xff] %v3413_v49  ;;  %2477 = vst [vmem:[#allocation2 + $0x1c8] sm:$0xff] %v6006_v8  ;;  %v2397_v2 = vpop.f32.mrb[244].mxu0  ;;  %v2109_v18 = vadd.f32 %v5765_v28, %v2108_v48  ;;  %2613 = vrot.lane.b32.xlu1 %v6006_v8, %s4393_s12  ;;  %2739 = vrot.lane.b32.xlu0 %v6000_v14, %s4394_s1 }
 0x2dc   :  { %v4064_v45 = vpop.eup %4063  ;;  %v3289_v0 = vadd.f32 %v4062_v24, %v6014_v50  ;;  %4077 = vpow2.f32 %v2997_v52  ;;  %v2110_v19 = vpop.f32.mrb[245].mxu1 }
 0x2dd   :  { %v2909_v34 = vsub.f32 %v4329_v7, %v2845_v39  ;;  %v3101_v13 = vsub.f32 %v2781_v17, %v2845_v39  ;;  %v2682_v37 = vpop.permute.xlu1 %2681  ;;  %v2556_v41 = vpop.permute.xlu0 %2555  ;;  %v3414_v33 = vmul.f32 %v4064_v45, %v5970_v42  ;;  %4079 = vpow2.f32 %v3189_v16  ;;  %v4330_v42 = vld [vmem:[#allocation2 + $0xd8] sm:$0xff] }
 0x2de   :  { %v2782_v61 = vsel %vm5668_vm2, %v2554_v31, %v2682_v37  ;;  %v2399_v11 = vpop.f32.mrb[245].mxu0  ;;  %v6026_v46 = vpop.eup %4065  ;;  %4081 = vrcp.f32 %v3289_v0  ;;  %v6028_v27 = vadd.f32 %v2397_v2, %v2109_v18 }
 0x2df   :  { %v2999_v22 = vmul.f32 1.442695, %v2909_v34  ;;  %v3191_v36 = vmul.f32 1.442695, %v3101_v13  ;;  %v2846_v60 = vmax.f32 %v4330_v42, %v2782_v61  ;;  %v2111_v3 = vpop.f32.mrb[246].mxu1  ;;  %v2400_v4 = vpop.f32.mrb[246].mxu0  ;;  %2741 = vrot.lane.b32.xlu1 %v6006_v8, %s4394_s1 }
 0x2e0   :  { %v4068_v47 = vpop.eup %4067  ;;  %3478 = vst [vmem:[#allocation4 + $0x98] sm:$0xff] %v3414_v33  ;;  %v2112_v32 = vadd.f32 %v5765_v28, %v2111_v3  ;;  %v2113_v12 = vpop.f32.mrb[247].mxu1  ;;  %2478 = vst [vmem:[#allocation2 + $0x1d0] sm:$0xff] %v6028_v27  ;;  %2615 = vrot.lane.b32.xlu0 %v6028_v27, %s4393_s12 }
 0x2e1   :  { %v2402_v43 = vpop.f32.mrb[247].mxu0  ;;  %v4070_v51 = vpop.eup %4069  ;;  %v3290_v9 = vadd.f32 %v4068_v47, %v6026_v46  ;;  %4083 = vpow2.f32 %v2999_v22  ;;  %v2910_v35 = vsub.f32 %v4330_v42, %v2846_v60  ;;  %v3102_v62 = vsub.f32 %v2782_v61, %v2846_v60 }
 0x2e2   :  { %v2558_v38 = vpop.permute.xlu1 %2557  ;;  %v2684_v57 = vpop.permute.xlu0 %2683  ;;  %v3415_v23 = vmul.f32 %v4070_v51, %v5986_v1  ;;  %4085 = vpow2.f32 %v3191_v36  ;;  %v6034_v31 = vadd.f32 %v2400_v4, %v2112_v32  ;;  %v4331_v1 = vld [vmem:[#allocation2 + $0xe0] sm:$0xff] }
 0x2e3   :  { %v2783_v20 = vsel %vm5668_vm2, %v2556_v41, %v2684_v57  ;;  %v6042_v49 = vpop.eup %4071  ;;  %4087 = vrcp.f32 %v3290_v9  ;;  %v3001_v17 = vmul.f32 1.442695, %v2910_v35  ;;  %v3193_v52 = vmul.f32 1.442695, %v3102_v62  ;;  %v2116_v39 = vpop.f32.mrb[248].mxu1 }
 0x2e4   :  { %v2847_v16 = vmax.f32 %v4331_v1, %v2783_v20  ;;  %v4074_v7 = vpop.eup %4073  ;;  %3479 = vst [vmem:[#allocation4 + $0xa0] sm:$0xff] %v3415_v23  ;;  %2479 = vst [vmem:[#allocation2 + $0x1d8] sm:$0xff] %v6034_v31  ;;  %v2405_v24 = vpop.f32.mrb[248].mxu0  ;;  %v2117_v33 = vadd.f32 %v5765_v28, %v2116_v39  ;;  %2617 = vrot.lane.b32.xlu1 %v6034_v31, %s4393_s12  ;;  %2743 = vrot.lane.b32.xlu0 %v6028_v27, %s4394_s1  ;;  %v4333_v4 = vld [vmem:[%s6364_s4] ss:$0 sm:$0xff]  ;;  %s4395_s4 = smov [#allocation2]  }
 0x2e5   :  { %v4076_v48 = vpop.eup %4075  ;;  %v3291_v2 = vadd.f32 %v4074_v7, %v6042_v49  ;;  %4089 = vpow2.f32 %v3001_v17  ;;  %v2118_v61 = vpop.f32.mrb[249].mxu1  ;;  %s3528_s17 = sshll.u32 %s4395_s4, 4  ;;  %s3529_s17 = int_to_ptr.vmem [resolvable:$true] %s3528_s17 }
 0x2e6   :  { %v2911_v45 = vsub.f32 %v4331_v1, %v2847_v16  ;;  %v3103_v0 = vsub.f32 %v2783_v20, %v2847_v16  ;;  %v2686_v34 = vpop.permute.xlu1 %2685  ;;  %v2560_v13 = vpop.permute.xlu0 %2559  ;;  %v3416_v37 = vmul.f32 %v4076_v48, %v5998_v55  ;;  %4091 = vpow2.f32 %v3193_v52  ;;  %v4332_v55 = vld [vmem:[#allocation2 + $0xe8] sm:$0xff]  ;;  %s4344_s18 = scalar_lea.vmem %s3529_s17, 8192  ;;  %p4349_p1 = scmp.lt.s32.totalorder %s3529_s17, %s3529_s17 }
 0x2e7   :  { %v2784_v41 = vsel %vm5668_vm2, %v2558_v38, %v2686_v34  ;;  %v2407_v18 = vpop.f32.mrb[249].mxu0  ;;  %v6054_v19 = vpop.eup %4077  ;;  %4093 = vrcp.f32 %v3291_v2  ;;  %v6056_v28 = vadd.f32 %v2405_v24, %v2117_v33  ;;  %p4345_p0 = scmp.ne.s32.totalorder %s3529_s17, %s4344_s18  ;;  %p4350_p2 = scmp.lt.s32.totalorder %s4344_s18, %s4344_s18 }
 0x2e8   :  { %v3003_v11 = vmul.f32 1.442695, %v2911_v45  ;;  %v3195_v22 = vmul.f32 1.442695, %v3103_v0  ;;  %v2848_v36 = vmax.f32 %v4332_v55, %v2784_v41  ;;  %v2119_v42 = vpop.f32.mrb[250].mxu1  ;;  %v2408_v60 = vpop.f32.mrb[250].mxu0  ;;  %2745 = vrot.lane.b32.xlu1 %v6034_v31, %s4394_s1 }
 0x2e9   :  { %v4080_v3 = vpop.eup %4079  ;;  %3480 = vst [vmem:[#allocation4 + $0xa8] sm:$0xff] %v3416_v37  ;;  %v2120_v47 = vadd.f32 %v4333_v4, %v2119_v42  ;;  %v2121_v32 = vpop.f32.mrb[251].mxu1  ;;  %2480 = vst [vmem:[#allocation2 + $0x1e0] sm:$0xff] %v6056_v28  ;;  %2619 = vrot.lane.b32.xlu0 %v6056_v28, %s4393_s12  ;;  %p4351_p3 = por %p4350_p2, %p4349_p1 }
 0x2ea   :  { %v2410_v12 = vpop.f32.mrb[251].mxu0  ;;  %v4082_v43 = vpop.eup %4081  ;;  %v3292_v51 = vadd.f32 %v4080_v3, %v6054_v19  ;;  %4095 = vpow2.f32 %v3003_v11  ;;  %v2912_v9 = vsub.f32 %v4332_v55, %v2848_v36  ;;  %v3104_v35 = vsub.f32 %v2784_v41, %v2848_v36  ;;  %v4335_v36 = vld [vmem:[#allocation2 + $0xf8] sm:$0xff] }
 0x2eb   :  { %v2562_v62 = vpop.permute.xlu1 %2561  ;;  %v2688_v38 = vpop.permute.xlu0 %2687  ;;  %v3417_v57 = vmul.f32 %v4082_v43, %v6014_v50  ;;  %4097 = vpow2.f32 %v3195_v22  ;;  %v6064_v23 = vadd.f32 %v2408_v60, %v2120_v47  ;;  %v4334_v50 = vld [vmem:[#allocation2 + $0xf0] sm:$0xff]  ;;  %p4352_p4 = pnand %p4351_p3, %p4345_p0 }
 0x2ec   :  { %v2785_v20 = vsel %vm5668_vm2, %v2560_v13, %v2688_v38  ;;  %v6072_v17 = vpop.eup %4083  ;;  %4099 = vrcp.f32 %v3292_v51  ;;  %v3005_v52 = vmul.f32 1.442695, %v2912_v9  ;;  %v3197_v1 = vmul.f32 1.442695, %v3104_v35  ;;  %v2124_v39 = vpop.f32.mrb[252].mxu1 }
 0x2ed   :  { %v2849_v16 = vmax.f32 %v4334_v50, %v2785_v20  ;;  %v4086_v7 = vpop.eup %4085  ;;  %3481 = vst [vmem:[#allocation4 + $0xb0] sm:$0xff] %v3417_v57  ;;  %2481 = vst [vmem:[#allocation2 + $0x1e8] sm:$0xff] %v6064_v23  ;;  %v2413_v24 = vpop.f32.mrb[252].mxu0  ;;  %v2125_v33 = vadd.f32 %v4333_v4, %v2124_v39  ;;  %2621 = vrot.lane.b32.xlu1 %v6064_v23, %s4393_s12  ;;  %2747 = vrot.lane.b32.xlu0 %v6056_v28, %s4394_s1 }
 0x2ee   :  { %v4088_v48 = vpop.eup %4087  ;;  %v3293_v2 = vadd.f32 %v4086_v7, %v6072_v17  ;;  %4101 = vpow2.f32 %v3005_v52  ;;  %v2126_v61 = vpop.f32.mrb[253].mxu1 }
 0x2ef   :  { %v2913_v45 = vsub.f32 %v4334_v50, %v2849_v16  ;;  %v3105_v0 = vsub.f32 %v2785_v20, %v2849_v16  ;;  %v2690_v34 = vpop.permute.xlu1 %2689  ;;  %v2564_v13 = vpop.permute.xlu0 %2563  ;;  %v3418_v37 = vmul.f32 %v4088_v48, %v6026_v46  ;;  %4103 = vpow2.f32 %v3197_v1 }
 0x2f0   :  { %v2786_v41 = vsel %vm5668_vm2, %v2562_v62, %v2690_v34  ;;  %v2415_v18 = vpop.f32.mrb[253].mxu0  ;;  %v6083_v11 = vpop.eup %4089  ;;  %4105 = vrcp.f32 %v3293_v2  ;;  %v6085_v47 = vadd.f32 %v2413_v24, %v2125_v33 }
 0x2f1   :  { %v3007_v22 = vmul.f32 1.442695, %v2913_v45  ;;  %v3199_v55 = vmul.f32 1.442695, %v3105_v0  ;;  %v2850_v46 = vmax.f32 %v4335_v36, %v2786_v41  ;;  %v2127_v42 = vpop.f32.mrb[254].mxu1  ;;  %v2416_v60 = vpop.f32.mrb[254].mxu0  ;;  %2749 = vrot.lane.b32.xlu1 %v6064_v23, %s4394_s1 }
 0x2f2   :  { %v4092_v3 = vpop.eup %4091  ;;  %3482 = vst [vmem:[#allocation4 + $0xb8] sm:$0xff] %v3418_v37  ;;  %v2128_v32 = vadd.f32 %v4333_v4, %v2127_v42  ;;  %v2129_v12 = vpop.f32.mrb[255].mxu1  ;;  %2482 = vst [vmem:[#allocation2 + $0x1f0] sm:$0xff] %v6085_v47  ;;  %2623 = vrot.lane.b32.xlu0 %v6085_v47, %s4393_s12  ;;  %v4337_v18 = vld [vmem:[#allocation2 + $0x108] sm:$0xff] }
 0x2f3   :  { %v2418_v43 = vpop.f32.mrb[255].mxu0  ;;  %v4094_v51 = vpop.eup %4093  ;;  %v3294_v9 = vadd.f32 %v4092_v3, %v6083_v11  ;;  %4107 = vpow2.f32 %v3007_v22  ;;  %v2914_v35 = vsub.f32 %v4335_v36, %v2850_v46  ;;  %v3106_v62 = vsub.f32 %v2786_v41, %v2850_v46 }
 0x2f4   :  { %v2566_v38 = vpop.permute.xlu1 %2565  ;;  %v2692_v57 = vpop.permute.xlu0 %2691  ;;  %v3419_v20 = vmul.f32 %v4094_v51, %v6042_v49  ;;  %4109 = vpow2.f32 %v3199_v55  ;;  %v6090_v52 = vadd.f32 %v2416_v60, %v2128_v32  ;;  %v4336_v49 = vld [vmem:[#allocation2 + $0x100] sm:$0xff] }
 0x2f5   :  { %v2787_v4 = vsel %vm5668_vm2, %v2564_v13, %v2692_v57  ;;  %v6098_v1 = vpop.eup %4095  ;;  %4111 = vrcp.f32 %v3294_v9  ;;  %v3009_v50 = vmul.f32 1.442695, %v2914_v35  ;;  %v3201_v16 = vmul.f32 1.442695, %v3106_v62  ;;  %v4338_v35 = vld [vmem:[#allocation2 + $0x110] sm:$0xff] }
 0x2f6   :  { %v2851_v7 = vmax.f32 %v4336_v49, %v2787_v4  ;;  %v4098_v39 = vpop.eup %4097  ;;  %3483 = vst [vmem:[#allocation4 + $0xc0] sm:$0xff] %v3419_v20  ;;  %2483 = vst [vmem:[#allocation2 + $0x1f8] sm:$0xff] %v6090_v52  ;;  %2625 = vrot.lane.b32.xlu1 %v6090_v52, %s4393_s12  ;;  %2751 = vrot.lane.b32.xlu0 %v6085_v47, %s4394_s1 }
 0x2f7   :  { %v4100_v24 = vpop.eup %4099  ;;  %v3295_v48 = vadd.f32 %v4098_v39, %v6098_v1  ;;  %4113 = vpow2.f32 %v3009_v50 }
 0x2f8   :  { %v2915_v2 = vsub.f32 %v4336_v49, %v2851_v7  ;;  %v3107_v45 = vsub.f32 %v2787_v4, %v2851_v7  ;;  %v2694_v0 = vpop.permute.xlu1 %2693  ;;  %v2568_v34 = vpop.permute.xlu0 %2567  ;;  %v3420_v13 = vmul.f32 %v4100_v24, %v6054_v19  ;;  %4115 = vpow2.f32 %v3201_v16 }
 0x2f9   :  { %v2788_v37 = vsel %vm5668_vm2, %v2566_v38, %v2694_v0  ;;  %v6109_v41 = vpop.eup %4101  ;;  %4117 = vrcp.f32 %v3295_v48 }
 0x2fa   :  { %v3011_v33 = vmul.f32 1.442695, %v2915_v2  ;;  %v3203_v61 = vmul.f32 1.442695, %v3107_v45  ;;  %v2852_v22 = vmax.f32 %v4337_v18, %v2788_v37  ;;  %v4104_v55 = vpop.eup %4103  ;;  %3484 = vst [vmem:[#allocation4 + $0xc8] sm:$0xff] %v3420_v13  ;;  %2753 = vrot.lane.b32.xlu1 %v6090_v52, %s4394_s1  ;;  %v4339_v2 = vld [vmem:[#allocation2 + $0x118] sm:$0xff] }
 0x2fb   :  { %v4106_v19 = vpop.eup %4105  ;;  %v3296_v36 = vadd.f32 %v4104_v55, %v6109_v41 }
 0x2fc   :  { %4119 = vpow2.f32 %v3011_v33  ;;  %v2916_v46 = vsub.f32 %v4337_v18, %v2852_v22  ;;  %v3108_v42 = vsub.f32 %v2788_v37, %v2852_v22  ;;  %v2570_v60 = vpop.permute.xlu1 %2569  ;;  %v2696_v3 = vpop.permute.xlu0 %2695  ;;  %v3421_v32 = vmul.f32 %v4106_v19, %v6072_v17 }
 0x2fd   :  { %4121 = vpow2.f32 %v3203_v61  ;;  %v2789_v12 = vsel %vm5668_vm2, %v2568_v34, %v2696_v3  ;;  %v6117_v43 = vpop.eup %4107 }
 0x2fe   :  { %4123 = vrcp.f32 %v3296_v36  ;;  %v3013_v51 = vmul.f32 1.442695, %v2916_v46  ;;  %v3205_v9 = vmul.f32 1.442695, %v3108_v42  ;;  %v2853_v62 = vmax.f32 %v4338_v35, %v2789_v12  ;;  %v4110_v38 = vpop.eup %4109  ;;  %3485 = vst [vmem:[#allocation4 + $0xd0] sm:$0xff] %v3421_v32  ;;  %v4340_v46 = vld [vmem:[#allocation2 + $0x120] sm:$0xff] }
 0x2ff   :  { %v4112_v57 = vpop.eup %4111  ;;  %v3297_v20 = vadd.f32 %v4110_v38, %v6117_v43 }
 0x300   :  { %4125 = vpow2.f32 %v3013_v51  ;;  %v2917_v17 = vsub.f32 %v4338_v35, %v2853_v62  ;;  %v3109_v4 = vsub.f32 %v2789_v12, %v2853_v62  ;;  %v2698_v50 = vpop.permute.xlu1 %2697  ;;  %v2572_v16 = vpop.permute.xlu0 %2571  ;;  %v3422_v49 = vmul.f32 %v4112_v57, %v6083_v11 }
 0x301   :  { %4127 = vpow2.f32 %v3205_v9  ;;  %v2790_v7 = vsel %vm5668_vm2, %v2570_v60, %v2698_v50  ;;  %v6123_v39 = vpop.eup %4113 }
 0x302   :  { %4129 = vrcp.f32 %v3297_v20  ;;  %v3015_v24 = vmul.f32 1.442695, %v2917_v17  ;;  %v3207_v48 = vmul.f32 1.442695, %v3109_v4  ;;  %v2854_v45 = vmax.f32 %v4339_v2, %v2790_v7  ;;  %v4116_v0 = vpop.eup %4115  ;;  %3486 = vst [vmem:[#allocation4 + $0xd8] sm:$0xff] %v3422_v49  ;;  %v4341_v17 = vld [vmem:[#allocation2 + $0x128] sm:$0xff] }
 0x303   :  { %v4118_v34 = vpop.eup %4117  ;;  %v3298_v13 = vadd.f32 %v4116_v0, %v6123_v39 }
 0x304   :  { %4131 = vpow2.f32 %v3015_v24  ;;  %v2918_v37 = vsub.f32 %v4339_v2, %v2854_v45  ;;  %v3110_v33 = vsub.f32 %v2790_v7, %v2854_v45  ;;  %v2574_v11 = vpop.permute.xlu1 %2573  ;;  %v2700_v61 = vpop.permute.xlu0 %2699  ;;  %v3423_v18 = vmul.f32 %v4118_v34, %v6098_v1 }
 0x305   :  { %4133 = vpow2.f32 %v3207_v48  ;;  %v2791_v22 = vsel %vm5668_vm2, %v2572_v16, %v2700_v61 }
 0x306   :  { %v6129_v55 = vpop.eup %4119  ;;  %4135 = vrcp.f32 %v3298_v13  ;;  %v3017_v19 = vmul.f32 1.442695, %v2918_v37  ;;  %v3209_v36 = vmul.f32 1.442695, %v3110_v33  ;;  %v2855_v42 = vmax.f32 %v4340_v46, %v2791_v22  ;;  %3487 = vst [vmem:[#allocation4 + $0xe0] sm:$0xff] %v3423_v18  ;;  %v4342_v37 = vld [vmem:[#allocation2 + $0x130] sm:$0xff] }
 0x307   :  { %v4122_v60 = vpop.eup %4121 }
 0x308   :  { %v4124_v3 = vpop.eup %4123  ;;  %v3299_v32 = vadd.f32 %v4122_v60, %v6129_v55  ;;  %4137 = vpow2.f32 %v3017_v19  ;;  %v2919_v12 = vsub.f32 %v4340_v46, %v2855_v42  ;;  %v3111_v51 = vsub.f32 %v2791_v22, %v2855_v42  ;;  %v2702_v1 = vpop.permute.xlu1 %2701 }
 0x309   :  { %v2576_v9 = vpop.permute.xlu0 %2575  ;;  %v3424_v35 = vmul.f32 %v4124_v3, %v6109_v41  ;;  %4139 = vpow2.f32 %v3209_v36  ;;  %v2792_v62 = vsel %vm5668_vm2, %v2574_v11, %v2702_v1 }
 0x30a   :  { %v6135_v38 = vpop.eup %4125  ;;  %4141 = vrcp.f32 %v3299_v32  ;;  %v3019_v57 = vmul.f32 1.442695, %v2919_v12  ;;  %v3211_v20 = vmul.f32 1.442695, %v3111_v51  ;;  %v2856_v4 = vmax.f32 %v4341_v17, %v2792_v62  ;;  %v4343_v12 = vld [vmem:[#allocation2 + $0x138] sm:$0xff] }
 0x30b   :  { %v4128_v50 = vpop.eup %4127  ;;  %3488 = vst [vmem:[#allocation4 + $0xe8] sm:$0xff] %v3424_v35 }
 0x30c   :  { %v4130_v16 = vpop.eup %4129  ;;  %v3300_v49 = vadd.f32 %v4128_v50, %v6135_v38  ;;  %4143 = vpow2.f32 %v3019_v57  ;;  %v2920_v7 = vsub.f32 %v4341_v17, %v2856_v4  ;;  %v3112_v24 = vsub.f32 %v2792_v62, %v2856_v4  ;;  %v2578_v41 = vpop.permute.xlu1 %2577 }
 0x30d   :  { %v2704_v48 = vpop.permute.xlu0 %2703  ;;  %v3425_v2 = vmul.f32 %v4130_v16, %v6117_v43  ;;  %4145 = vpow2.f32 %v3211_v20 }
 0x30e   :  { %v2793_v45 = vsel %vm5668_vm2, %v2576_v9, %v2704_v48  ;;  %v6141_v0 = vpop.eup %4131  ;;  %4147 = vrcp.f32 %v3300_v49  ;;  %v3021_v34 = vmul.f32 1.442695, %v2920_v7  ;;  %v3213_v13 = vmul.f32 1.442695, %v3112_v24 }
 0x30f   :  { %v2857_v33 = vmax.f32 %v4342_v37, %v2793_v45  ;;  %v4134_v11 = vpop.eup %4133  ;;  %3489 = vst [vmem:[#allocation4 + $0xf0] sm:$0xff] %v3425_v2 }
 0x310   :  { %v4136_v61 = vpop.eup %4135  ;;  %v3301_v18 = vadd.f32 %v4134_v11, %v6141_v0  ;;  %4149 = vpow2.f32 %v3021_v34  ;;  %v2706_v43 = vpop.permute.xlu1 %2705 }
 0x311   :  { %v2921_v22 = vsub.f32 %v4342_v37, %v2857_v33  ;;  %v3113_v19 = vsub.f32 %v2793_v45, %v2857_v33  ;;  %v2580_v36 = vpop.permute.xlu0 %2579  ;;  %v3426_v46 = vmul.f32 %v4136_v61, %v6123_v39  ;;  %4151 = vpow2.f32 %v3213_v13 }
 0x312   :  { %v2794_v42 = vsel %vm5668_vm2, %v2578_v41, %v2706_v43  ;;  %v6147_v60 = vpop.eup %4137  ;;  %4153 = vrcp.f32 %v3301_v18 }
 0x313   :  { %v3023_v3 = vmul.f32 1.442695, %v2921_v22  ;;  %v3215_v32 = vmul.f32 1.442695, %v3113_v19  ;;  %v2858_v51 = vmax.f32 %v4343_v12, %v2794_v42  ;;  %v4140_v1 = vpop.eup %4139  ;;  %3490 = vst [vmem:[#allocation4 + $0xf8] sm:$0xff] %v3426_v46 }
 0x314   :  { %v4142_v9 = vpop.eup %4141  ;;  %v3302_v35 = vadd.f32 %v4140_v1, %v6147_v60  ;;  %v2582_v57 = vpop.permute.xlu1 %2581 }
 0x315   :  { %4155 = vpow2.f32 %v3023_v3  ;;  %v2922_v39 = vsub.f32 %v4343_v12, %v2858_v51  ;;  %v3114_v62 = vsub.f32 %v2794_v42, %v2858_v51  ;;  %v2708_v20 = vpop.permute.xlu0 %2707  ;;  %v3427_v17 = vmul.f32 %v4142_v9, %v6129_v55 }
 0x316   :  { %4157 = vpow2.f32 %v3215_v32  ;;  %v2795_v4 = vsel %vm5668_vm2, %v2580_v36, %v2708_v20 }
 0x317   :  { %4355 = shalt.err (!%p4352_p4)
}
 0x318   :  { %s4356_s21 = scalar_lea.hbm %s6365_s5, 8192 }
 0x319   :  { %p4357_p5 = scmp.ne.s32.totalorder %s6365_s5, %s4356_s21  ;;  %p4360_p6 = scmp.lt.u32.totalorder %s4356_s21, %s6365_s5 }
 0x31b   :  { %p4362_p7 = pnand %p4360_p6, %p4357_p5 }
 0x31d   :  { %4365 = shalt.err (!%p4362_p7)
}
 0x31e   :  { %s4396_s26 = smov 128   ;;  %s4397_s2 = smov 8   ;;  %v6168_v55 = vpop.eup %4143  ;;  %4159 = vrcp.f32 %v3302_v35  ;;  %v3025_v50 = vmul.f32 1.442695, %v2922_v39  ;;  %v3217_v16 = vmul.f32 1.442695, %v3114_v62  ;;  %v2859_v49 = vmax.f32 %v5760_v53, %v2795_v4  ;;  %v2710_v45 = vpop.permute.xlu1 %2709 }
 0x31f   :  { %3534 = dma.vmem_to_hbm [thread:$0]  %s3529_s17, 8192, %s6365_s5, [#allocation3], %s4396_s26, %s4396_s26, %s4397_s2   ;;  %v4146_v7 = vpop.eup %4145  ;;  %3491 = vst [vmem:[#allocation4 + $0x100] sm:$0xff] %v3427_v17  ;;  %v2584_v34 = vpop.permute.xlu0 %2583  ;;  %v2796_v37 = vsel %vm5668_vm2, %v2582_v57, %v2710_v45 }
 0x320   :  { %v4148_v24 = vpop.eup %4147  ;;  %v3303_v41 = vadd.f32 %v4146_v7, %v6168_v55  ;;  %4161 = vpow2.f32 %v3025_v50  ;;  %v2923_v48 = vsub.f32 %v5760_v53, %v2859_v49  ;;  %v3115_v2 = vsub.f32 %v2795_v4, %v2859_v49  ;;  %s4398_s5 = smov [#allocation4]  }
 0x321   :  { %v3428_v13 = vmul.f32 %v4148_v24, %v6135_v38  ;;  %4163 = vpow2.f32 %v3217_v16  ;;  %v6176_v33 = vpop.eup %4149  ;;  %v2860_v18 = vmax.f32 %v5772_v10, %v2796_v37  ;;  %s3540_s29 = sshll.u32 %s4398_s5, 4  ;;  %s3541_s29 = int_to_ptr.vmem [resolvable:$true] %s3540_s29 }
 0x322   :  { %4165 = vrcp.f32 %v3303_v41  ;;  %v3027_v11 = vmul.f32 1.442695, %v2923_v48  ;;  %v3219_v61 = vmul.f32 1.442695, %v3115_v2  ;;  %v4152_v22 = vpop.eup %4151  ;;  %v2586_v36 = vpop.permute.xlu1 %2585  ;;  %s4366_s30 = scalar_lea.vmem %s3541_s29, 8192  ;;  %p4371_p9 = scmp.lt.s32.totalorder %s3541_s29, %s3541_s29 }
 0x323   :  { %3492 = vst [vmem:[#allocation4 + $0x108] sm:$0xff] %v3428_v13  ;;  %v4154_v19 = vpop.eup %4153  ;;  %v3304_v53 = vadd.f32 %v4152_v22, %v6176_v33  ;;  %v2924_v43 = vsub.f32 %v5772_v10, %v2860_v18  ;;  %v3116_v38 = vsub.f32 %v2796_v37, %v2860_v18  ;;  %v2712_v46 = vpop.permute.xlu0 %2711  ;;  %p4367_p8 = scmp.ne.s32.totalorder %s3541_s29, %s4366_s30  ;;  %p4372_p10 = scmp.lt.s32.totalorder %s4366_s30, %s4366_s30 }
 0x324   :  { %4167 = vpow2.f32 %v3027_v11  ;;  %v3429_v42 = vmul.f32 %v4154_v19, %v6141_v0  ;;  %v2797_v3 = vsel %vm5668_vm2, %v2584_v34, %v2712_v46  ;;  %v6184_v32 = vpop.eup %4155 }
 0x325   :  { %4169 = vpow2.f32 %v3219_v61  ;;  %v3029_v12 = vmul.f32 1.442695, %v2924_v43  ;;  %v3221_v51 = vmul.f32 1.442695, %v3116_v38  ;;  %v2861_v1 = vmax.f32 %v5796_v15, %v2797_v3  ;;  %v4158_v9 = vpop.eup %4157  ;;  %p4373_p11 = por %p4372_p10, %p4371_p9 }
 0x326   :  { %4171 = vrcp.f32 %v3304_v53  ;;  %3493 = vst [vmem:[#allocation4 + $0x110] sm:$0xff] %v3429_v42  ;;  %v3305_v10 = vadd.f32 %v4158_v9, %v6184_v32  ;;  %v2714_v62 = vpop.permute.xlu1 %2713 }
 0x327   :  { %4173 = vpow2.f32 %v3029_v12  ;;  %v2925_v39 = vsub.f32 %v5796_v15, %v2861_v1  ;;  %v3117_v0 = vsub.f32 %v2797_v3, %v2861_v1  ;;  %v2588_v57 = vpop.permute.xlu0 %2587  ;;  %v2798_v17 = vsel %vm5668_vm2, %v2586_v36, %v2714_v62  ;;  %p4374_p12 = pnand %p4373_p11, %p4367_p8 }
 0x328   :  { %v4160_v35 = vpop.eup %4159  ;;  %4175 = vpow2.f32 %v3221_v51  ;;  %v2862_v49 = vmax.f32 %v5803_v5, %v2798_v17 }
 0x329   :  { %v3430_v20 = vmul.f32 %v4160_v35, %v6147_v60  ;;  %4177 = vrcp.f32 %v3305_v10  ;;  %v3031_v50 = vmul.f32 1.442695, %v2925_v39  ;;  %v3223_v16 = vmul.f32 1.442695, %v3117_v0 }
 0x32a   :  { %v6192_v4 = vpop.eup %4161  ;;  %v2926_v41 = vsub.f32 %v5803_v5, %v2862_v49  ;;  %v3118_v60 = vsub.f32 %v2798_v17, %v2862_v49  ;;  %v2590_v48 = vpop.permute.xlu1 %2589 }
 0x32b   :  { %v4164_v7 = vpop.eup %4163  ;;  %3494 = vst [vmem:[#allocation4 + $0x118] sm:$0xff] %v3430_v20  ;;  %4179 = vpow2.f32 %v3031_v50  ;;  %v2716_v2 = vpop.permute.xlu0 %2715 }
 0x32c   :  { %v4166_v24 = vpop.eup %4165  ;;  %v3306_v15 = vadd.f32 %v4164_v7, %v6192_v4  ;;  %4181 = vpow2.f32 %v3223_v16  ;;  %v2799_v34 = vsel %vm5668_vm2, %v2588_v57, %v2716_v2  ;;  %v3033_v37 = vmul.f32 1.442695, %v2926_v41 }
 0x32d   :  { %v3431_v45 = vmul.f32 %v4166_v24, %v6168_v55  ;;  %v3225_v11 = vmul.f32 1.442695, %v3118_v60  ;;  %v2863_v61 = vmax.f32 %v5828_v30, %v2799_v34 }
 0x32e   :  { %v6200_v13 = vpop.eup %4167  ;;  %4183 = vrcp.f32 %v3306_v15  ;;  %v2718_v53 = vpop.permute.xlu1 %2717 }
 0x32f   :  { %v4170_v18 = vpop.eup %4169  ;;  %3495 = vst [vmem:[#allocation4 + $0x120] sm:$0xff] %v3431_v45  ;;  %4185 = vpow2.f32 %v3033_v37  ;;  %v2927_v19 = vsub.f32 %v5828_v30, %v2863_v61  ;;  %v3119_v55 = vsub.f32 %v2799_v34, %v2863_v61  ;;  %v2592_v43 = vpop.permute.xlu0 %2591  ;;  %v2800_v36 = vsel %vm5668_vm2, %v2590_v48, %v2718_v53 }
 0x330   :  { %v4172_v22 = vpop.eup %4171  ;;  %v3307_v5 = vadd.f32 %v4170_v18, %v6200_v13  ;;  %4187 = vpow2.f32 %v3225_v11  ;;  %v2864_v12 = vmax.f32 %v5835_v54, %v2800_v36 }
 0x331   :  { %v3432_v38 = vmul.f32 %v4172_v22, %v6176_v33  ;;  %v6208_v46 = vpop.eup %4173  ;;  %v3035_v42 = vmul.f32 1.442695, %v2927_v19  ;;  %v3227_v3 = vmul.f32 1.442695, %v3119_v55 }
 0x332   :  { %4189 = vrcp.f32 %v3307_v5  ;;  %v4176_v51 = vpop.eup %4175  ;;  %v2928_v9 = vsub.f32 %v5835_v54, %v2864_v12  ;;  %v3120_v33 = vsub.f32 %v2800_v36, %v2864_v12  ;;  %v2594_v35 = vpop.permute.xlu1 %2593 }
 0x333   :  { %3496 = vst [vmem:[#allocation4 + $0x128] sm:$0xff] %v3432_v38  ;;  %v4178_v1 = vpop.eup %4177  ;;  %v3308_v30 = vadd.f32 %v4176_v51, %v6208_v46  ;;  %4191 = vpow2.f32 %v3035_v42  ;;  %v2720_v10 = vpop.permute.xlu0 %2719 }
 0x334   :  { %v3433_v39 = vmul.f32 %v4178_v1, %v6184_v32  ;;  %4193 = vpow2.f32 %v3227_v3  ;;  %v2801_v0 = vsel %vm5668_vm2, %v2592_v43, %v2720_v10  ;;  %v3037_v57 = vmul.f32 1.442695, %v2928_v9 }
 0x335   :  { %v6216_v62 = vpop.eup %4179  ;;  %4195 = vrcp.f32 %v3308_v30  ;;  %v3229_v20 = vmul.f32 1.442695, %v3120_v33  ;;  %v2865_v17 = vmax.f32 %v5860_v26, %v2801_v0 }
 0x336   :  { %v4182_v50 = vpop.eup %4181  ;;  %3497 = vst [vmem:[#allocation4 + $0x130] sm:$0xff] %v3433_v39  ;;  %4197 = vpow2.f32 %v3037_v57  ;;  %v2722_v7 = vpop.permute.xlu1 %2721 }
 0x337   :  { %v3309_v54 = vadd.f32 %v4182_v50, %v6216_v62  ;;  %v2929_v49 = vsub.f32 %v5860_v26, %v2865_v17  ;;  %v3121_v32 = vsub.f32 %v2801_v0, %v2865_v17  ;;  %v2596_v24 = vpop.permute.xlu0 %2595  ;;  %4199 = vpow2.f32 %v3229_v20 }
 0x338   :  { %v4184_v16 = vpop.eup %4183  ;;  %v2802_v41 = vsel %vm5668_vm2, %v2594_v35, %v2722_v7 }
 0x339   :  { %v3434_v15 = vmul.f32 %v4184_v16, %v6192_v4  ;;  %v6224_v60 = vpop.eup %4185  ;;  %4201 = vrcp.f32 %v3309_v54  ;;  %v3039_v48 = vmul.f32 1.442695, %v2929_v49  ;;  %v3231_v2 = vmul.f32 1.442695, %v3121_v32 }
 0x33a   :  { %v2866_v45 = vmax.f32 %v5866_v63, %v2802_v41  ;;  %v4188_v34 = vpop.eup %4187  ;;  %v2598_v61 = vpop.permute.xlu1 %2597 }
 0x33b   :  { %3498 = vst [vmem:[#allocation4 + $0x138] sm:$0xff] %v3434_v15  ;;  %v3310_v26 = vadd.f32 %v4188_v34, %v6224_v60  ;;  %4203 = vpow2.f32 %v3039_v48  ;;  %v2724_v18 = vpop.permute.xlu0 %2723 }
 0x33c   :  { %v4190_v37 = vpop.eup %4189  ;;  %v2930_v11 = vsub.f32 %v5866_v63, %v2866_v45  ;;  %v3122_v4 = vsub.f32 %v2802_v41, %v2866_v45  ;;  %4205 = vpow2.f32 %v3231_v2  ;;  %v2803_v5 = vsel %vm5668_vm2, %v2596_v24, %v2724_v18 }
 0x33d   :  { %v3435_v22 = vmul.f32 %v4190_v37, %v6200_v13  ;;  %v6232_v19 = vpop.eup %4191  ;;  %4207 = vrcp.f32 %v3310_v26  ;;  %v2867_v43 = vmax.f32 %v5888_v56, %v2803_v5 }
 0x33e   :  { %v3041_v55 = vmul.f32 1.442695, %v2930_v11  ;;  %v3233_v53 = vmul.f32 1.442695, %v3122_v4  ;;  %v4194_v38 = vpop.eup %4193  ;;  %v2726_v3 = vpop.permute.xlu1 %2725 }
 0x33f   :  { %3499 = vst [vmem:[#allocation4 + $0x140] sm:$0xff] %v3435_v22  ;;  %v4196_v36 = vpop.eup %4195  ;;  %v3311_v63 = vadd.f32 %v4194_v38, %v6232_v19  ;;  %v2931_v42 = vsub.f32 %v5888_v56, %v2867_v43  ;;  %v3123_v13 = vsub.f32 %v2803_v5, %v2867_v43  ;;  %v2600_v12 = vpop.permute.xlu0 %2599  ;;  %v2804_v1 = vsel %vm5668_vm2, %v2598_v61, %v2726_v3 }
 0x340   :  { %4209 = vpow2.f32 %v3041_v55  ;;  %v3436_v51 = vmul.f32 %v4196_v36, %v6208_v46  ;;  %v6240_v30 = vpop.eup %4197  ;;  %v2868_v35 = vmax.f32 %v5894_v21, %v2804_v1 }
 0x341   :  { %4211 = vpow2.f32 %v3233_v53  ;;  %v3043_v9 = vmul.f32 1.442695, %v2931_v42  ;;  %v3235_v33 = vmul.f32 1.442695, %v3123_v13  ;;  %v4200_v10 = vpop.eup %4199 }
 0x342   :  { %4213 = vrcp.f32 %v3311_v63  ;;  %3500 = vst [vmem:[#allocation4 + $0x148] sm:$0xff] %v3436_v51  ;;  %v3312_v56 = vadd.f32 %v4200_v10, %v6240_v30  ;;  %v2932_v0 = vsub.f32 %v5894_v21, %v2868_v35  ;;  %v3124_v46 = vsub.f32 %v2804_v1, %v2868_v35  ;;  %v2602_v57 = vpop.permute.xlu1 %2601 }
 0x343   :  { %v4202_v39 = vpop.eup %4201  ;;  %4215 = vpow2.f32 %v3043_v9  ;;  %v2728_v20 = vpop.permute.xlu0 %2727 }
 0x344   :  { %v3437_v17 = vmul.f32 %v4202_v39, %v6216_v62  ;;  %4217 = vpow2.f32 %v3235_v33  ;;  %v2805_v50 = vsel %vm5668_vm2, %v2600_v12, %v2728_v20  ;;  %v3045_v54 = vmul.f32 1.442695, %v2932_v0 }
 0x345   :  { %v6248_v16 = vpop.eup %4203  ;;  %4219 = vrcp.f32 %v3312_v56  ;;  %v3237_v49 = vmul.f32 1.442695, %v3124_v46  ;;  %v2869_v32 = vmax.f32 %v5916_v25, %v2805_v50 }
 0x346   :  { %v4206_v7 = vpop.eup %4205  ;;  %3501 = vst [vmem:[#allocation4 + $0x150] sm:$0xff] %v3437_v17  ;;  %4221 = vpow2.f32 %v3045_v54  ;;  %v2730_v41 = vpop.permute.xlu1 %2729 }
 0x347   :  { %v4208_v24 = vpop.eup %4207  ;;  %v3313_v21 = vadd.f32 %v4206_v7, %v6248_v16  ;;  %v2933_v15 = vsub.f32 %v5916_v25, %v2869_v32  ;;  %v3125_v62 = vsub.f32 %v2805_v50, %v2869_v32  ;;  %v2604_v48 = vpop.permute.xlu0 %2603  ;;  %4223 = vpow2.f32 %v3237_v49 }
 0x348   :  { %v3438_v2 = vmul.f32 %v4208_v24, %v6224_v60  ;;  %v2806_v45 = vsel %vm5668_vm2, %v2602_v57, %v2730_v41 }
 0x349   :  { %4225 = vrcp.f32 %v3313_v21  ;;  %v3047_v37 = vmul.f32 1.442695, %v2933_v15  ;;  %v3239_v26 = vmul.f32 1.442695, %v3125_v62  ;;  %v2870_v11 = vmax.f32 %v5922_v44, %v2806_v45 }
 0x34a   :  { %v6256_v34 = vpop.eup %4209  ;;  %3502 = vst [vmem:[#allocation4 + $0x158] sm:$0xff] %v3438_v2  ;;  %v2606_v22 = vpop.permute.xlu1 %2605 }
 0x34b   :  { %v4212_v4 = vpop.eup %4211  ;;  %4227 = vpow2.f32 %v3047_v37  ;;  %v2934_v18 = vsub.f32 %v5922_v44, %v2870_v11  ;;  %v3126_v60 = vsub.f32 %v2806_v45, %v2870_v11  ;;  %v2732_v5 = vpop.permute.xlu0 %2731 }
 0x34c   :  { %v4214_v61 = vpop.eup %4213  ;;  %v3314_v25 = vadd.f32 %v4212_v4, %v6256_v34  ;;  %4229 = vpow2.f32 %v3239_v26  ;;  %v2807_v53 = vsel %vm5668_vm2, %v2604_v48, %v2732_v5 }
 0x34d   :  { %v3439_v55 = vmul.f32 %v4214_v61, %v6232_v19  ;;  %v6264_v43 = vpop.eup %4215  ;;  %v3049_v38 = vmul.f32 1.442695, %v2934_v18  ;;  %v3241_v36 = vmul.f32 1.442695, %v3126_v60  ;;  %v2871_v63 = vmax.f32 %v5944_v29, %v2807_v53 }
 0x34e   :  { %4231 = vrcp.f32 %v3314_v25  ;;  %v4218_v42 = vpop.eup %4217  ;;  %v2734_v12 = vpop.permute.xlu1 %2733 }
 0x34f   :  { %3503 = vst [vmem:[#allocation4 + $0x160] sm:$0xff] %v3439_v55  ;;  %v4220_v13 = vpop.eup %4219  ;;  %v3315_v44 = vadd.f32 %v4218_v42, %v6264_v43  ;;  %4233 = vpow2.f32 %v3049_v38  ;;  %v2935_v3 = vsub.f32 %v5944_v29, %v2871_v63  ;;  %v3127_v19 = vsub.f32 %v2807_v53, %v2871_v63  ;;  %v2608_v51 = vpop.permute.xlu0 %2607 }
 0x350   :  { %v3440_v1 = vmul.f32 %v4220_v13, %v6240_v30  ;;  %4235 = vpow2.f32 %v3241_v36  ;;  %v2808_v9 = vsel %vm5668_vm2, %v2606_v22, %v2734_v12  ;;  %v6272_v33 = vpop.eup %4221 }
 0x351   :  { %4237 = vrcp.f32 %v3315_v44  ;;  %v3051_v35 = vmul.f32 1.442695, %v2935_v3  ;;  %v3243_v10 = vmul.f32 1.442695, %v3127_v19  ;;  %v2872_v39 = vmax.f32 %v5950_v6, %v2808_v9  ;;  %v4224_v56 = vpop.eup %4223 }
 0x352   :  { %3504 = vst [vmem:[#allocation4 + $0x168] sm:$0xff] %v3440_v1  ;;  %v3316_v29 = vadd.f32 %v4224_v56, %v6272_v33  ;;  %v2610_v57 = vpop.permute.xlu1 %2609 }
 0x353   :  { %v4226_v0 = vpop.eup %4225  ;;  %4239 = vpow2.f32 %v3051_v35  ;;  %v2936_v46 = vsub.f32 %v5950_v6, %v2872_v39  ;;  %v3128_v30 = vsub.f32 %v2808_v9, %v2872_v39  ;;  %v2736_v20 = vpop.permute.xlu0 %2735 }
 0x354   :  { %v3441_v17 = vmul.f32 %v4226_v0, %v6248_v16  ;;  %4241 = vpow2.f32 %v3243_v10  ;;  %v2809_v50 = vsel %vm5668_vm2, %v2608_v51, %v2736_v20 }
 0x355   :  { %v6280_v54 = vpop.eup %4227  ;;  %4243 = vrcp.f32 %v3316_v29  ;;  %v3053_v49 = vmul.f32 1.442695, %v2936_v46  ;;  %v3245_v32 = vmul.f32 1.442695, %v3128_v30  ;;  %v2873_v7 = vmax.f32 %v5972_v58, %v2809_v50 }
 0x356   :  { %v4230_v24 = vpop.eup %4229  ;;  %3505 = vst [vmem:[#allocation4 + $0x170] sm:$0xff] %v3441_v17  ;;  %v2738_v62 = vpop.permute.xlu1 %2737 }
 0x357   :  { %v3317_v6 = vadd.f32 %v4230_v24, %v6280_v54  ;;  %4245 = vpow2.f32 %v3053_v49  ;;  %v2937_v15 = vsub.f32 %v5972_v58, %v2873_v7  ;;  %v3129_v16 = vsub.f32 %v2809_v50, %v2873_v7  ;;  %v2612_v41 = vpop.permute.xlu0 %2611 }
 0x358   :  { %v4232_v21 = vpop.eup %4231  ;;  %4247 = vpow2.f32 %v3245_v32  ;;  %v2810_v2 = vsel %vm5668_vm2, %v2610_v57, %v2738_v62 }
 0x359   :  { %v3442_v48 = vmul.f32 %v4232_v21, %v6256_v34  ;;  %v6288_v45 = vpop.eup %4233  ;;  %4249 = vrcp.f32 %v3317_v6  ;;  %v3055_v37 = vmul.f32 1.442695, %v2937_v15  ;;  %v3247_v26 = vmul.f32 1.442695, %v3129_v16 }
 0x35a   :  { %v2874_v11 = vmax.f32 %v5978_v59, %v2810_v2  ;;  %v4236_v4 = vpop.eup %4235  ;;  %v2614_v18 = vpop.permute.xlu1 %2613 }
 0x35b   :  { %3506 = vst [vmem:[#allocation4 + $0x178] sm:$0xff] %v3442_v48  ;;  %v4238_v61 = vpop.eup %4237  ;;  %v3318_v58 = vadd.f32 %v4236_v4, %v6288_v45  ;;  %4251 = vpow2.f32 %v3055_v37  ;;  %v2740_v60 = vpop.permute.xlu0 %2739 }
 0x35c   :  { %v2938_v25 = vsub.f32 %v5978_v59, %v2874_v11  ;;  %v3130_v34 = vsub.f32 %v2810_v2, %v2874_v11  ;;  %v3443_v22 = vmul.f32 %v4238_v61, %v6264_v43  ;;  %4253 = vpow2.f32 %v3247_v26 }
 0x35d   :  { %v2811_v5 = vsel %vm5668_vm2, %v2612_v41, %v2740_v60  ;;  %v6296_v55 = vpop.eup %4239  ;;  %4255 = vrcp.f32 %v3318_v58 }
 0x35e   :  { %v3057_v53 = vmul.f32 1.442695, %v2938_v25  ;;  %v3249_v38 = vmul.f32 1.442695, %v3130_v34  ;;  %v2875_v36 = vmax.f32 %v6000_v14, %v2811_v5  ;;  %v4242_v63 = vpop.eup %4241  ;;  %3507 = vst [vmem:[#allocation4 + $0x180] sm:$0xff] %v3443_v22  ;;  %v2742_v44 = vpop.permute.xlu1 %2741 }
 0x35f   :  { %v4244_v42 = vpop.eup %4243  ;;  %v3319_v59 = vadd.f32 %v4242_v63, %v6296_v55  ;;  %v2616_v3 = vpop.permute.xlu0 %2615  ;;  %v2812_v12 = vsel %vm5668_vm2, %v2614_v18, %v2742_v44 }
 0x360   :  { %4257 = vpow2.f32 %v3057_v53  ;;  %v2939_v13 = vsub.f32 %v6000_v14, %v2875_v36  ;;  %v3131_v43 = vsub.f32 %v2811_v5, %v2875_v36  ;;  %v3444_v19 = vmul.f32 %v4244_v42, %v6272_v33 }
 0x361   :  { %4259 = vpow2.f32 %v3249_v38  ;;  %v6304_v51 = vpop.eup %4245  ;;  %v2876_v35 = vmax.f32 %v6006_v8, %v2812_v12 }
 0x362   :  { %4261 = vrcp.f32 %v3319_v59  ;;  %v3059_v1 = vmul.f32 1.442695, %v2939_v13  ;;  %v3251_v9 = vmul.f32 1.442695, %v3131_v43  ;;  %v4248_v10 = vpop.eup %4247  ;;  %3508 = vst [vmem:[#allocation4 + $0x188] sm:$0xff] %v3444_v19  ;;  %v2618_v0 = vpop.permute.xlu1 %2617 }
 0x363   :  { %v4250_v39 = vpop.eup %4249  ;;  %v3320_v14 = vadd.f32 %v4248_v10, %v6304_v51  ;;  %v2940_v56 = vsub.f32 %v6006_v8, %v2876_v35  ;;  %v3132_v33 = vsub.f32 %v2812_v12, %v2876_v35  ;;  %v2744_v29 = vpop.permute.xlu0 %2743 }
 0x364   :  { %4263 = vpow2.f32 %v3059_v1  ;;  %v3445_v46 = vmul.f32 %v4250_v39, %v6280_v54  ;;  %v2813_v30 = vsel %vm5668_vm2, %v2616_v3, %v2744_v29 }
 0x365   :  { %4265 = vpow2.f32 %v3251_v9  ;;  %v6312_v57 = vpop.eup %4251  ;;  %v3061_v20 = vmul.f32 1.442695, %v2940_v56  ;;  %v3253_v17 = vmul.f32 1.442695, %v3132_v33  ;;  %v2877_v50 = vmax.f32 %v6028_v27, %v2813_v30 }
 0x366   :  { %4267 = vrcp.f32 %v3320_v14  ;;  %v4254_v49 = vpop.eup %4253  ;;  %3509 = vst [vmem:[#allocation4 + $0x190] sm:$0xff] %v3445_v46  ;;  %v2746_v24 = vpop.permute.xlu1 %2745 }
 0x367   :  { %v4256_v32 = vpop.eup %4255  ;;  %v3321_v8 = vadd.f32 %v4254_v49, %v6312_v57  ;;  %4269 = vpow2.f32 %v3061_v20  ;;  %v2941_v7 = vsub.f32 %v6028_v27, %v2877_v50  ;;  %v3133_v54 = vsub.f32 %v2813_v30, %v2877_v50  ;;  %v2620_v21 = vpop.permute.xlu0 %2619 }
 0x368   :  { %v3446_v6 = vmul.f32 %v4256_v32, %v6288_v45  ;;  %4271 = vpow2.f32 %v3253_v17  ;;  %v2814_v15 = vsel %vm5668_vm2, %v2618_v0, %v2746_v24 }
 0x369   :  { %4273 = vrcp.f32 %v3321_v8  ;;  %v3063_v62 = vmul.f32 1.442695, %v2941_v7  ;;  %v3255_v41 = vmul.f32 1.442695, %v3133_v54  ;;  %v2878_v48 = vmax.f32 %v6034_v31, %v2814_v15 }
 0x36a   :  { %v6320_v16 = vpop.eup %4257  ;;  %3510 = vst [vmem:[#allocation4 + $0x198] sm:$0xff] %v3446_v6  ;;  %v2622_v11 = vpop.permute.xlu1 %2621 }
 0x36b   :  { %v4260_v2 = vpop.eup %4259  ;;  %4275 = vpow2.f32 %v3063_v62  ;;  %v2942_v26 = vsub.f32 %v6034_v31, %v2878_v48  ;;  %v3134_v45 = vsub.f32 %v2814_v15, %v2878_v48  ;;  %v2748_v4 = vpop.permute.xlu0 %2747 }
 0x36c   :  { %v4262_v37 = vpop.eup %4261  ;;  %v3322_v27 = vadd.f32 %v4260_v2, %v6320_v16  ;;  %4277 = vpow2.f32 %v3255_v41  ;;  %v2815_v58 = vsel %vm5668_vm2, %v2620_v21, %v2748_v4 }
 0x36d   :  { %v3447_v61 = vmul.f32 %v4262_v37, %v6296_v55  ;;  %v3065_v34 = vmul.f32 1.442695, %v2942_v26  ;;  %v3257_v18 = vmul.f32 1.442695, %v3134_v45  ;;  %v2879_v60 = vmax.f32 %v6056_v28, %v2815_v58 }
 0x36e   :  { %v4264_v25 = vpop.eup %4263  ;;  %4279 = vrcp.f32 %v3322_v27  ;;  %v2750_v36 = vpop.permute.xlu1 %2749 }
 0x36f   :  { %v4266_v22 = vpop.eup %4265  ;;  %3511 = vst [vmem:[#allocation4 + $0x1a0] sm:$0xff] %v3447_v61  ;;  %4281 = vpow2.f32 %v3065_v34  ;;  %v2943_v31 = vsub.f32 %v6056_v28, %v2879_v60  ;;  %v3135_v38 = vsub.f32 %v2815_v58, %v2879_v60  ;;  %v2624_v55 = vpop.permute.xlu0 %2623  ;;  %v2816_v42 = vsel %vm5668_vm2, %v2622_v11, %v2750_v36 }
 0x370   :  { %v4268_v5 = vpop.eup %4267  ;;  %v3323_v53 = vadd.f32 %v4266_v22, %v4264_v25  ;;  %4283 = vpow2.f32 %v3257_v18  ;;  %v2880_v44 = vmax.f32 %v6064_v23, %v2816_v42 }
 0x371   :  { %v3448_v63 = vmul.f32 %v4268_v5, %v6304_v51  ;;  %v4270_v59 = vpop.eup %4269  ;;  %v3067_v13 = vmul.f32 1.442695, %v2943_v31  ;;  %v3259_v43 = vmul.f32 1.442695, %v3135_v38 }
 0x372   :  { %4285 = vrcp.f32 %v3323_v53  ;;  %v4272_v3 = vpop.eup %4271  ;;  %v2944_v28 = vsub.f32 %v6064_v23, %v2880_v44  ;;  %v3136_v1 = vsub.f32 %v2816_v42, %v2880_v44  ;;  %v2626_v9 = vpop.permute.xlu1 %2625 }
 0x373   :  { %3512 = vst [vmem:[#allocation4 + $0x1a8] sm:$0xff] %v3448_v63  ;;  %v4274_v19 = vpop.eup %4273  ;;  %v3324_v12 = vadd.f32 %v4272_v3, %v4270_v59  ;;  %4287 = vpow2.f32 %v3067_v13  ;;  %v2752_v51 = vpop.permute.xlu0 %2751 }
 0x374   :  { %v3449_v35 = vmul.f32 %v4274_v19, %v6312_v57  ;;  %4289 = vpow2.f32 %v3259_v43  ;;  %v2817_v10 = vsel %vm5668_vm2, %v2624_v55, %v2752_v51  ;;  %v3069_v14 = vmul.f32 1.442695, %v2944_v28 }
 0x375   :  { %v4276_v39 = vpop.eup %4275  ;;  %4291 = vrcp.f32 %v3324_v12  ;;  %v3261_v56 = vmul.f32 1.442695, %v3136_v1  ;;  %v2881_v33 = vmax.f32 %v6085_v47, %v2817_v10 }
 0x376   :  { %v4278_v0 = vpop.eup %4277  ;;  %3513 = vst [vmem:[#allocation4 + $0x1b0] sm:$0xff] %v3449_v35  ;;  %4293 = vpow2.f32 %v3069_v14  ;;  %v2754_v20 = vpop.permute.xlu1 %2753 }
 0x377   :  { %v3325_v46 = vadd.f32 %v4278_v0, %v4276_v39  ;;  %v2945_v23 = vsub.f32 %v6085_v47, %v2881_v33  ;;  %v3137_v30 = vsub.f32 %v2817_v10, %v2881_v33  ;;  %4295 = vpow2.f32 %v3261_v56 }
 0x378   :  { %v4280_v29 = vpop.eup %4279  ;;  %v2818_v17 = vsel %vm5668_vm2, %v2626_v9, %v2754_v20 }
 0x379   :  { %v3450_v57 = vmul.f32 %v4280_v29, %v6320_v16  ;;  %v4282_v50 = vpop.eup %4281  ;;  %4297 = vrcp.f32 %v3325_v46  ;;  %v3071_v49 = vmul.f32 1.442695, %v2945_v23  ;;  %v3263_v32 = vmul.f32 1.442695, %v3137_v30 }
 0x37a   :  { %v2882_v8 = vmax.f32 %v6090_v52, %v2818_v17  ;;  %v4284_v7 = vpop.eup %4283 }
 0x37b   :  { %3514 = vst [vmem:[#allocation4 + $0x1b8] sm:$0xff] %v3450_v57  ;;  %v3326_v24 = vadd.f32 %v4284_v7, %v4282_v50  ;;  %4299 = vpow2.f32 %v3071_v49 }
 0x37c   :  { %v4286_v54 = vpop.eup %4285  ;;  %v2946_v47 = vsub.f32 %v6090_v52, %v2882_v8  ;;  %v3138_v21 = vsub.f32 %v2818_v17, %v2882_v8  ;;  %4301 = vpow2.f32 %v3263_v32 }
 0x37d   :  { %v3451_v6 = vmul.f32 %v4286_v54, %v4264_v25  ;;  %v4288_v15 = vpop.eup %4287  ;;  %4303 = vrcp.f32 %v3326_v24 }
 0x37e   :  { %v3073_v40 = vmul.f32 1.442695, %v2946_v47  ;;  %v3265_v16 = vmul.f32 1.442695, %v3138_v21  ;;  %v4290_v62 = vpop.eup %4289 }
 0x37f   :  { %3515 = vst [vmem:[#allocation4 + $0x1c0] sm:$0xff] %v3451_v6  ;;  %v4292_v41 = vpop.eup %4291  ;;  %v3327_v48 = vadd.f32 %v4290_v62, %v4288_v15 }
 0x380   :  { %4305 = vpow2.f32 %v3073_v40  ;;  %v3452_v2 = vmul.f32 %v4292_v41, %v4270_v59  ;;  %v4294_v37 = vpop.eup %4293 }
 0x381   :  { %4307 = vpow2.f32 %v3265_v16  ;;  %v4296_v27 = vpop.eup %4295 }
 0x382   :  { %4309 = vrcp.f32 %v3327_v48  ;;  %3516 = vst [vmem:[#allocation4 + $0x1c8] sm:$0xff] %v3452_v2  ;;  %v3328_v52 = vadd.f32 %v4296_v27, %v4294_v37 }
 0x383   :  { %v4298_v26 = vpop.eup %4297 }
 0x384   :  { %v3453_v45 = vmul.f32 %v4298_v26, %v4276_v39  ;;  %4311 = vrcp.f32 %v3328_v52 }
 0x385   :  { %v4300_v11 = vpop.eup %4299 }
 0x386   :  { %v4302_v4 = vpop.eup %4301  ;;  %3517 = vst [vmem:[#allocation4 + $0x1d0] sm:$0xff] %v3453_v45 }
 0x387   :  { %v4304_v61 = vpop.eup %4303  ;;  %v3329_v58 = vadd.f32 %v4302_v4, %v4300_v11 }
 0x388   :  { %v3454_v25 = vmul.f32 %v4304_v61, %v4282_v50 }
 0x389   :  { %4313 = vrcp.f32 %v3329_v58 }
 0x38a   :  { %v4306_v34 = vpop.eup %4305  ;;  %3518 = vst [vmem:[#allocation4 + $0x1d8] sm:$0xff] %v3454_v25 }
 0x38b   :  { %v4308_v18 = vpop.eup %4307 }
 0x38c   :  { %v4310_v60 = vpop.eup %4309  ;;  %v3330_v22 = vadd.f32 %v4308_v18, %v4306_v34 }
 0x38d   :  { %v3455_v5 = vmul.f32 %v4310_v60, %v4288_v15 }
 0x38e   :  { %4315 = vrcp.f32 %v3330_v22  ;;  %v4312_v53 = vpop.eup %4311 }
 0x38f   :  { %3519 = vst [vmem:[#allocation4 + $0x1e0] sm:$0xff] %v3455_v5  ;;  %v3456_v31 = vmul.f32 %v4312_v53, %v4294_v37 }
 0x391   :  { %3520 = vst [vmem:[#allocation4 + $0x1e8] sm:$0xff] %v3456_v31 }
 0x393   :  { %v4314_v38 = vpop.eup %4313 }
 0x394   :  { %v3457_v36 = vmul.f32 %v4314_v38, %v4300_v11 }
 0x396   :  { %3521 = vst [vmem:[#allocation4 + $0x1f0] sm:$0xff] %v3457_v36 }
 0x398   :  { %v4316_v55 = vpop.eup %4315 }
 0x399   :  { %v3458_v63 = vmul.f32 %v4316_v55, %v4306_v34 }
 0x39b   :  { %3522 = vst [vmem:[#allocation4 + $0x1f8] sm:$0xff] %v3458_v63 }
 0x39c   :  { %4377 = shalt.err (!%p4374_p12)
}
 0x39d   :  { %s4378_s8 = scalar_lea.hbm %s6366_s6, 8192 }
 0x39e   :  { %p4379_p13 = scmp.ne.s32.totalorder %s6366_s6, %s4378_s8  ;;  %p4382_p0 = scmp.lt.u32.totalorder %s4378_s8, %s6366_s6 }
 0x3a0   :  { %p4384_p1 = pnand %p4382_p0, %p4379_p13 }
 0x3a2   :  { %4387 = shalt.err (!%p4384_p1)
}
 0x3a3   :  { %3546 = dma.vmem_to_hbm [thread:$0]  %s3541_s29, 8192, %s6366_s6, [#allocation5], %s4396_s26, %s4396_s26, %s4397_s2  }
 0x3a4   :  { %4388 = dma.done.wait [#allocation3], 8192  }
 0x3a5   :  { %4389 = vsyncadd [#allocation3], 4294959104 }
 0x3a6   :  { %4390 = dma.done.wait [#allocation5], 8192  }
 0x3a7   :  { %4391 = vsyncadd [#allocation5], 4294959104 }
 0x3a8   :  { %3553 = vsyncpa [#allocation3], 1 }
 0x3a9   :  { %3554 = vsyncpa [#allocation5], 1 }

</bundles_post_ra>
